<compile_context>
chip_gen: v5e
topology: v5e:2x2
jax: 0.10.0
libtpu: 0.0.40
codegen_flags: <defaults>
</compile_context>

<pallas_src>
import jax
import jax.numpy as jnp
from jax.experimental import pallas as pl
from jax.experimental.pallas import tpu as pltpu

B, C, H, W = 2, 8, 16, 16
NUM_PREV = 2
KH = KW = 3
EPS = 1e-5
HW = H * W
KC = KH * KW * C            # 72  : per-edge im2col K
KF = NUM_PREV * KC          # 144 : fused K over both edges


def node_kernel(x0_ref, x1_ref, w_ref, shift_ref, out_ref, patch_ref):
    """One batch element per grid step.

    x{i}_ref  : (1, H+2, W+2, C)  zero-padded NHWC input of previous node i
    w_ref     : (KF, C)           BN-scale-folded 3x3 conv weights, edges stacked on K
    shift_ref : (1, C)            combined BN shift (shift0 + shift1)
    out_ref   : (1, H*W, C)
    patch_ref : (H*W, KF) VMEM    scratch for in-kernel im2col of both edges
    """
    # op_i(x) = BN(conv3x3(ReLU(x))); ReLU commutes with zero padding (ReLU(0)=0).
    for e, x_ref in enumerate((x0_ref, x1_ref)):
        x = jnp.maximum(x_ref[0], 0.0)                       # (H+2, W+2, C)
        for dh in range(KH):
            for dw in range(KW):
                t = (e * KH + dh) * KW + dw                  # column block index
                tap = x[dh:dh + H, dw:dw + W, :].reshape(HW, C)
                patch_ref[:, t * C:(t + 1) * C] = tap
    # Single fused MXU matmul over both edges; InputChoice(n_chosen=2) == sum.
    y = jnp.dot(patch_ref[...], w_ref[...], preferred_element_type=jnp.float32)
    # TODO(synk): DropPath stochastic training branch not modeled (identity in eval).
    out_ref[0] = y + shift_ref[...]                          # folded-BN shift


def _pad_nhwc(x_nchw):
    x = jnp.transpose(x_nchw, (0, 2, 3, 1))                  # NCHW -> NHWC
    return jnp.pad(x, ((0, 0), (1, 1), (1, 1), (0, 0)))      # (B, H+2, W+2, C)


@jax.jit
def node_forward(prev0_nchw, prev1_nchw, w0_hwio, w1_hwio, bn_mean, bn_var):
    # Fold BatchNorm (affine=False, running stats) into the conv weights.
    scale = 1.0 / jnp.sqrt(bn_var + EPS)                     # (NUM_PREV, C)
    shift = -bn_mean * scale                                 # (NUM_PREV, C)
    # Row index kh*3*C + kw*C + ci matches the in-kernel tap/channel order.
    w_fused = jnp.concatenate(
        [w0_hwio.reshape(KC, C) * scale[0][None, :],
         w1_hwio.reshape(KC, C) * scale[1][None, :]], axis=0)          # (KF, C)
    shift_sum = (shift[0] + shift[1])[None, :]                         # (1, C)

    x0 = _pad_nhwc(prev0_nchw)
    x1 = _pad_nhwc(prev1_nchw)

    out_flat = pl.pallas_call(
        node_kernel,
        out_shape=jax.ShapeDtypeStruct((B, HW, C), jnp.float32),
        grid_spec=pltpu.PrefetchScalarGridSpec(
            num_scalar_prefetch=0,
            grid=(B,),
            in_specs=[
                pl.BlockSpec((1, H + 2, W + 2, C), lambda b: (b, 0, 0, 0)),
                pl.BlockSpec((1, H + 2, W + 2, C), lambda b: (b, 0, 0, 0)),
                pl.BlockSpec((KF, C), lambda b: (0, 0)),
                pl.BlockSpec((1, C), lambda b: (0, 0)),
            ],
            out_specs=pl.BlockSpec((1, HW, C), lambda b: (b, 0, 0)),
            scratch_shapes=[pltpu.VMEM((HW, KF), jnp.float32)],
        ),
        compiler_params=pltpu.CompilerParams(dimension_semantics=("parallel",)),
    )(x0, x1, w_fused, shift_sum)
    return out_flat.reshape(B, H, W, C)                      # NHWC output


def ref_forward(prev_list_nchw, w_hwio_list, bn_mean, bn_var):
    # Pure-JAX reference (NHWC conv) for correctness check.
    outs = []
    for i in range(NUM_PREV):
        x = jnp.transpose(prev_list_nchw[i], (0, 2, 3, 1))
        x = jnp.maximum(x, 0.0)
        y = jax.lax.conv_general_dilated(
            x, w_hwio_list[i], window_strides=(1, 1), padding="SAME",
            dimension_numbers=("NHWC", "HWIO", "NHWC"))
        y = (y - bn_mean[i]) / jnp.sqrt(bn_var[i] + EPS)
        outs.append(y)
    return outs[0] + outs[1]


if __name__ == "__main__":
    key = jax.random.PRNGKey(0)
    k = jax.random.split(key, 6)
    # Inputs mirror PyTorch NCHW: two previous-node feature maps (B, C, H, W).
    prev0 = jax.random.normal(k[0], (B, C, H, W), jnp.float32)
    prev1 = jax.random.normal(k[1], (B, C, H, W), jnp.float32)
    # Deterministic parameter init (HWIO conv weights + BN running stats).
    w0 = 0.1 * jax.random.normal(k[2], (KH, KW, C, C), jnp.float32)
    w1 = 0.1 * jax.random.normal(k[3], (KH, KW, C, C), jnp.float32)
    bn_mean = 0.1 * jax.random.normal(k[4], (NUM_PREV, C), jnp.float32)
    bn_var = jax.random.uniform(k[5], (NUM_PREV, C), jnp.float32, 0.5, 1.5)

    out = node_forward(prev0, prev1, w0, w1, bn_mean, bn_var)
    jax.block_until_ready(out)

    ref = ref_forward([prev0, prev1], [w0, w1], bn_mean, bn_var)
    assert out.shape == (B, H, W, C)
    assert jnp.allclose(out, ref, atol=1e-4, rtol=1e-4), "mismatch vs JAX reference"
    print("KERNEL_OK")
</pallas_src>

<mosaic_0001>
module attributes {stable_mosaic.version = 11 : i64} {
  func.func @node_kernel(%arg0: i32, %arg1: memref<1x18x18x8xf32, #tpu.memory_space<vmem>>, %arg2: memref<1x18x18x8xf32, #tpu.memory_space<vmem>>, %arg3: memref<144x8xf32, #tpu.memory_space<vmem>>, %arg4: memref<1x8xf32, #tpu.memory_space<vmem>>, %arg5: memref<1x256x8xf32, #tpu.memory_space<vmem>>, %arg6: memref<256x144xf32, #tpu.memory_space<vmem>>) attributes {dimension_semantics = [#tpu.dimension_semantics<parallel>], iteration_bounds = array<i64: 2>, scalar_prefetch = 0 : i64, scratch_operands = 1 : i64, tpu.core_type = #tpu.core_type<tc>, window_params = [{transform_indices = @transform_0, window_bounds = array<i64: 1, 18, 18, 8>}, {transform_indices = @transform_1, window_bounds = array<i64: 1, 18, 18, 8>}, {pipeline_mode = #tpu.pipeline_mode<synchronous>, transform_indices = @transform_2, window_bounds = array<i64: 144, 8>}, {pipeline_mode = #tpu.pipeline_mode<synchronous>, transform_indices = @transform_3, window_bounds = array<i64: 1, 8>}, {transform_indices = @transform_4, window_bounds = array<i64: 1, 256, 8>}]} {
    %c0 = arith.constant 0 : index
    %c0_0 = arith.constant 0 : index
    %c0_1 = arith.constant 0 : index
    %c0_2 = arith.constant 0 : index
    %0 = vector.load %arg1[%c0, %c0_0, %c0_1, %c0_2] : memref<1x18x18x8xf32, #tpu.memory_space<vmem>>, vector<1x18x18x8xf32>
    %1 = vector.shape_cast %0 : vector<1x18x18x8xf32> to vector<18x18x8xf32>
    %cst = arith.constant 0.000000e+00 : f32
    %2 = vector.broadcast %cst : f32 to vector<18x18x8xf32>
    %3 = arith.maximumf %1, %2 : vector<18x18x8xf32>
    %4 = vector.extract_strided_slice %3 {offsets = [0, 0, 0], sizes = [16, 16, 8], strides = [1, 1, 1]} : vector<18x18x8xf32> to vector<16x16x8xf32>
    %5 = vector.shape_cast %4 : vector<16x16x8xf32> to vector<256x8xf32>
    %c0_3 = arith.constant 0 : index
    %c0_4 = arith.constant 0 : index
    %6 = vector.load %arg6[%c0_3, %c0_4] : memref<256x144xf32, #tpu.memory_space<vmem>>, vector<256x8xf32>
    tpu.vector_store %arg6[%c0_3, %c0_4], %5 {strides = array<i32>} : memref<256x144xf32, #tpu.memory_space<vmem>>, vector<256x8xf32>,
    %7 = vector.extract_strided_slice %3 {offsets = [0, 1, 0], sizes = [16, 16, 8], strides = [1, 1, 1]} : vector<18x18x8xf32> to vector<16x16x8xf32>
    %8 = vector.shape_cast %7 : vector<16x16x8xf32> to vector<256x8xf32>
    %c0_5 = arith.constant 0 : index
    %c8 = arith.constant 8 : index
    %9 = vector.load %arg6[%c0_5, %c8] : memref<256x144xf32, #tpu.memory_space<vmem>>, vector<256x8xf32>
    tpu.vector_store %arg6[%c0_5, %c8], %8 {strides = array<i32>} : memref<256x144xf32, #tpu.memory_space<vmem>>, vector<256x8xf32>,
    %10 = vector.extract_strided_slice %3 {offsets = [0, 2, 0], sizes = [16, 16, 8], strides = [1, 1, 1]} : vector<18x18x8xf32> to vector<16x16x8xf32>
    %11 = vector.shape_cast %10 : vector<16x16x8xf32> to vector<256x8xf32>
    %c0_6 = arith.constant 0 : index
    %c16 = arith.constant 16 : index
    %12 = vector.load %arg6[%c0_6, %c16] : memref<256x144xf32, #tpu.memory_space<vmem>>, vector<256x8xf32>
    tpu.vector_store %arg6[%c0_6, %c16], %11 {strides = array<i32>} : memref<256x144xf32, #tpu.memory_space<vmem>>, vector<256x8xf32>,
    %13 = vector.extract_strided_slice %3 {offsets = [1, 0, 0], sizes = [16, 16, 8], strides = [1, 1, 1]} : vector<18x18x8xf32> to vector<16x16x8xf32>
    %14 = vector.shape_cast %13 : vector<16x16x8xf32> to vector<256x8xf32>
    %c0_7 = arith.constant 0 : index
    %c24 = arith.constant 24 : index
    %15 = vector.load %arg6[%c0_7, %c24] : memref<256x144xf32, #tpu.memory_space<vmem>>, vector<256x8xf32>
    tpu.vector_store %arg6[%c0_7, %c24], %14 {strides = array<i32>} : memref<256x144xf32, #tpu.memory_space<vmem>>, vector<256x8xf32>,
    %16 = vector.extract_strided_slice %3 {offsets = [1, 1, 0], sizes = [16, 16, 8], strides = [1, 1, 1]} : vector<18x18x8xf32> to vector<16x16x8xf32>
    %17 = vector.shape_cast %16 : vector<16x16x8xf32> to vector<256x8xf32>
    %c0_8 = arith.constant 0 : index
    %c32 = arith.constant 32 : index
    %18 = vector.load %arg6[%c0_8, %c32] : memref<256x144xf32, #tpu.memory_space<vmem>>, vector<256x8xf32>
    tpu.vector_store %arg6[%c0_8, %c32], %17 {strides = array<i32>} : memref<256x144xf32, #tpu.memory_space<vmem>>, vector<256x8xf32>,
    %19 = vector.extract_strided_slice %3 {offsets = [1, 2, 0], sizes = [16, 16, 8], strides = [1, 1, 1]} : vector<18x18x8xf32> to vector<16x16x8xf32>
    %20 = vector.shape_cast %19 : vector<16x16x8xf32> to vector<256x8xf32>
    %c0_9 = arith.constant 0 : index
    %c40 = arith.constant 40 : index
    %21 = vector.load %arg6[%c0_9, %c40] : memref<256x144xf32, #tpu.memory_space<vmem>>, vector<256x8xf32>
    tpu.vector_store %arg6[%c0_9, %c40], %20 {strides = array<i32>} : memref<256x144xf32, #tpu.memory_space<vmem>>, vector<256x8xf32>,
    %22 = vector.extract_strided_slice %3 {offsets = [2, 0, 0], sizes = [16, 16, 8], strides = [1, 1, 1]} : vector<18x18x8xf32> to vector<16x16x8xf32>
    %23 = vector.shape_cast %22 : vector<16x16x8xf32> to vector<256x8xf32>
    %c0_10 = arith.constant 0 : index
    %c48 = arith.constant 48 : index
    %24 = vector.load %arg6[%c0_10, %c48] : memref<256x144xf32, #tpu.memory_space<vmem>>, vector<256x8xf32>
    tpu.vector_store %arg6[%c0_10, %c48], %23 {strides = array<i32>} : memref<256x144xf32, #tpu.memory_space<vmem>>, vector<256x8xf32>,
    %25 = vector.extract_strided_slice %3 {offsets = [2, 1, 0], sizes = [16, 16, 8], strides = [1, 1, 1]} : vector<18x18x8xf32> to vector<16x16x8xf32>
    %26 = vector.shape_cast %25 : vector<16x16x8xf32> to vector<256x8xf32>
    %c0_11 = arith.constant 0 : index
    %c56 = arith.constant 56 : index
    %27 = vector.load %arg6[%c0_11, %c56] : memref<256x144xf32, #tpu.memory_space<vmem>>, vector<256x8xf32>
    tpu.vector_store %arg6[%c0_11, %c56], %26 {strides = array<i32>} : memref<256x144xf32, #tpu.memory_space<vmem>>, vector<256x8xf32>,
    %28 = vector.extract_strided_slice %3 {offsets = [2, 2, 0], sizes = [16, 16, 8], strides = [1, 1, 1]} : vector<18x18x8xf32> to vector<16x16x8xf32>
    %29 = vector.shape_cast %28 : vector<16x16x8xf32> to vector<256x8xf32>
    %c0_12 = arith.constant 0 : index
    %c64 = arith.constant 64 : index
    %30 = vector.load %arg6[%c0_12, %c64] : memref<256x144xf32, #tpu.memory_space<vmem>>, vector<256x8xf32>
    tpu.vector_store %arg6[%c0_12, %c64], %29 {strides = array<i32>} : memref<256x144xf32, #tpu.memory_space<vmem>>, vector<256x8xf32>,
    %c0_13 = arith.constant 0 : index
    %c0_14 = arith.constant 0 : index
    %c0_15 = arith.constant 0 : index
    %c0_16 = arith.constant 0 : index
    %31 = vector.load %arg2[%c0_13, %c0_14, %c0_15, %c0_16] : memref<1x18x18x8xf32, #tpu.memory_space<vmem>>, vector<1x18x18x8xf32>
    %32 = vector.shape_cast %31 : vector<1x18x18x8xf32> to vector<18x18x8xf32>
    %cst_17 = arith.constant 0.000000e+00 : f32
    %33 = vector.broadcast %cst_17 : f32 to vector<18x18x8xf32>
    %34 = arith.maximumf %32, %33 : vector<18x18x8xf32>
    %35 = vector.extract_strided_slice %34 {offsets = [0, 0, 0], sizes = [16, 16, 8], strides = [1, 1, 1]} : vector<18x18x8xf32> to vector<16x16x8xf32>
    %36 = vector.shape_cast %35 : vector<16x16x8xf32> to vector<256x8xf32>
    %c0_18 = arith.constant 0 : index
    %c72 = arith.constant 72 : index
    %37 = vector.load %arg6[%c0_18, %c72] : memref<256x144xf32, #tpu.memory_space<vmem>>, vector<256x8xf32>
    tpu.vector_store %arg6[%c0_18, %c72], %36 {strides = array<i32>} : memref<256x144xf32, #tpu.memory_space<vmem>>, vector<256x8xf32>,
    %38 = vector.extract_strided_slice %34 {offsets = [0, 1, 0], sizes = [16, 16, 8], strides = [1, 1, 1]} : vector<18x18x8xf32> to vector<16x16x8xf32>
    %39 = vector.shape_cast %38 : vector<16x16x8xf32> to vector<256x8xf32>
    %c0_19 = arith.constant 0 : index
    %c80 = arith.constant 80 : index
    %40 = vector.load %arg6[%c0_19, %c80] : memref<256x144xf32, #tpu.memory_space<vmem>>, vector<256x8xf32>
    tpu.vector_store %arg6[%c0_19, %c80], %39 {strides = array<i32>} : memref<256x144xf32, #tpu.memory_space<vmem>>, vector<256x8xf32>,
    %41 = vector.extract_strided_slice %34 {offsets = [0, 2, 0], sizes = [16, 16, 8], strides = [1, 1, 1]} : vector<18x18x8xf32> to vector<16x16x8xf32>
    %42 = vector.shape_cast %41 : vector<16x16x8xf32> to vector<256x8xf32>
    %c0_20 = arith.constant 0 : index
    %c88 = arith.constant 88 : index
    %43 = vector.load %arg6[%c0_20, %c88] : memref<256x144xf32, #tpu.memory_space<vmem>>, vector<256x8xf32>
    tpu.vector_store %arg6[%c0_20, %c88], %42 {strides = array<i32>} : memref<256x144xf32, #tpu.memory_space<vmem>>, vector<256x8xf32>,
    %44 = vector.extract_strided_slice %34 {offsets = [1, 0, 0], sizes = [16, 16, 8], strides = [1, 1, 1]} : vector<18x18x8xf32> to vector<16x16x8xf32>
    %45 = vector.shape_cast %44 : vector<16x16x8xf32> to vector<256x8xf32>
    %c0_21 = arith.constant 0 : index
    %c96 = arith.constant 96 : index
    %46 = vector.load %arg6[%c0_21, %c96] : memref<256x144xf32, #tpu.memory_space<vmem>>, vector<256x8xf32>
    tpu.vector_store %arg6[%c0_21, %c96], %45 {strides = array<i32>} : memref<256x144xf32, #tpu.memory_space<vmem>>, vector<256x8xf32>,
    %47 = vector.extract_strided_slice %34 {offsets = [1, 1, 0], sizes = [16, 16, 8], strides = [1, 1, 1]} : vector<18x18x8xf32> to vector<16x16x8xf32>
    %48 = vector.shape_cast %47 : vector<16x16x8xf32> to vector<256x8xf32>
    %c0_22 = arith.constant 0 : index
    %c104 = arith.constant 104 : index
    %49 = vector.load %arg6[%c0_22, %c104] : memref<256x144xf32, #tpu.memory_space<vmem>>, vector<256x8xf32>
    tpu.vector_store %arg6[%c0_22, %c104], %48 {strides = array<i32>} : memref<256x144xf32, #tpu.memory_space<vmem>>, vector<256x8xf32>,
    %50 = vector.extract_strided_slice %34 {offsets = [1, 2, 0], sizes = [16, 16, 8], strides = [1, 1, 1]} : vector<18x18x8xf32> to vector<16x16x8xf32>
    %51 = vector.shape_cast %50 : vector<16x16x8xf32> to vector<256x8xf32>
    %c0_23 = arith.constant 0 : index
    %c112 = arith.constant 112 : index
    %52 = vector.load %arg6[%c0_23, %c112] : memref<256x144xf32, #tpu.memory_space<vmem>>, vector<256x8xf32>
    tpu.vector_store %arg6[%c0_23, %c112], %51 {strides = array<i32>} : memref<256x144xf32, #tpu.memory_space<vmem>>, vector<256x8xf32>,
    %53 = vector.extract_strided_slice %34 {offsets = [2, 0, 0], sizes = [16, 16, 8], strides = [1, 1, 1]} : vector<18x18x8xf32> to vector<16x16x8xf32>
    %54 = vector.shape_cast %53 : vector<16x16x8xf32> to vector<256x8xf32>
    %c0_24 = arith.constant 0 : index
    %c120 = arith.constant 120 : index
    %55 = vector.load %arg6[%c0_24, %c120] : memref<256x144xf32, #tpu.memory_space<vmem>>, vector<256x8xf32>
    tpu.vector_store %arg6[%c0_24, %c120], %54 {strides = array<i32>} : memref<256x144xf32, #tpu.memory_space<vmem>>, vector<256x8xf32>,
    %56 = vector.extract_strided_slice %34 {offsets = [2, 1, 0], sizes = [16, 16, 8], strides = [1, 1, 1]} : vector<18x18x8xf32> to vector<16x16x8xf32>
    %57 = vector.shape_cast %56 : vector<16x16x8xf32> to vector<256x8xf32>
    %c0_25 = arith.constant 0 : index
    %c128 = arith.constant 128 : index
    %58 = vector.load %arg6[%c0_25, %c128] : memref<256x144xf32, #tpu.memory_space<vmem>>, vector<256x8xf32>
    tpu.vector_store %arg6[%c0_25, %c128], %57 {strides = array<i32>} : memref<256x144xf32, #tpu.memory_space<vmem>>, vector<256x8xf32>,
    %59 = vector.extract_strided_slice %34 {offsets = [2, 2, 0], sizes = [16, 16, 8], strides = [1, 1, 1]} : vector<18x18x8xf32> to vector<16x16x8xf32>
    %60 = vector.shape_cast %59 : vector<16x16x8xf32> to vector<256x8xf32>
    %c0_26 = arith.constant 0 : index
    %c136 = arith.constant 136 : index
    %61 = vector.load %arg6[%c0_26, %c136] : memref<256x144xf32, #tpu.memory_space<vmem>>, vector<256x8xf32>
    tpu.vector_store %arg6[%c0_26, %c136], %60 {strides = array<i32>} : memref<256x144xf32, #tpu.memory_space<vmem>>, vector<256x8xf32>,
    %c0_27 = arith.constant 0 : index
    %c0_28 = arith.constant 0 : index
    %62 = vector.load %arg6[%c0_27, %c0_28] : memref<256x144xf32, #tpu.memory_space<vmem>>, vector<256x144xf32>
    %c0_29 = arith.constant 0 : index
    %c0_30 = arith.constant 0 : index
    %63 = vector.load %arg3[%c0_29, %c0_30] : memref<144x8xf32, #tpu.memory_space<vmem>>, vector<144x8xf32>
    %cst_31 = arith.constant dense<0.000000e+00> : vector<256x8xf32>
    %64 = tpu.matmul %62, %63, %cst_31 {dimension_numbers = #tpu.dot_dimension_numbers<[1], [0], [0], [1], [0, 0, 1, 1], [], []>} : vector<256x144xf32>, vector<144x8xf32>, vector<256x8xf32> -> vector<256x8xf32>
    %c0_32 = arith.constant 0 : index
    %c0_33 = arith.constant 0 : index
    %65 = vector.load %arg4[%c0_32, %c0_33] : memref<1x8xf32, #tpu.memory_space<vmem>>, vector<1x8xf32>
    %66 = vector.broadcast %65 : vector<1x8xf32> to vector<256x8xf32>
    %67 = arith.addf %64, %66 : vector<256x8xf32>
    %c0_34 = arith.constant 0 : index
    %c0_35 = arith.constant 0 : index
    %c0_36 = arith.constant 0 : index
    %68 = vector.load %arg5[%c0_34, %c0_35, %c0_36] : memref<1x256x8xf32, #tpu.memory_space<vmem>>, vector<1x256x8xf32>
    %69 = vector.shape_cast %68 : vector<1x256x8xf32> to vector<256x8xf32>
    %70 = vector.shape_cast %67 : vector<256x8xf32> to vector<1x256x8xf32>
    tpu.vector_store %arg5[%c0_34, %c0_35, %c0_36], %70 {strides = array<i32>} : memref<1x256x8xf32, #tpu.memory_space<vmem>>, vector<1x256x8xf32>,
    return
  }
  func.func @transform_0(%arg0: i32) -> (i32, i32, i32, i32) {
    %c0_i32 = arith.constant 0 : i32
    %c0_i32_0 = arith.constant 0 : i32
    %c0_i32_1 = arith.constant 0 : i32
    %c0_i32_2 = arith.constant 0 : i32
    return %arg0, %c0_i32, %c0_i32_0, %c0_i32_1 : i32, i32, i32, i32
  }
  func.func @transform_1(%arg0: i32) -> (i32, i32, i32, i32) {
    %c0_i32 = arith.constant 0 : i32
    %c0_i32_0 = arith.constant 0 : i32
    %c0_i32_1 = arith.constant 0 : i32
    %c0_i32_2 = arith.constant 0 : i32
    return %arg0, %c0_i32, %c0_i32_0, %c0_i32_1 : i32, i32, i32, i32
  }
  func.func @transform_2(%arg0: i32) -> (i32, i32) {
    %c0_i32 = arith.constant 0 : i32
    %c0_i32_0 = arith.constant 0 : i32
    %c0_i32_1 = arith.constant 0 : i32
    return %c0_i32, %c0_i32_0 : i32, i32
  }
  func.func @transform_3(%arg0: i32) -> (i32, i32) {
    %c0_i32 = arith.constant 0 : i32
    %c0_i32_0 = arith.constant 0 : i32
    %c0_i32_1 = arith.constant 0 : i32
    return %c0_i32, %c0_i32_0 : i32, i32
  }
  func.func @transform_4(%arg0: i32) -> (i32, i32, i32) {
    %c0_i32 = arith.constant 0 : i32
    %c0_i32_0 = arith.constant 0 : i32
    %c0_i32_1 = arith.constant 0 : i32
    return %arg0, %c0_i32, %c0_i32_0 : i32, i32, i32
  }
}

</mosaic_0001>

<bundles_post_ra>
// kernel: node_forward.1
= control target key start
LH: loop header
LB: loop body
LE: loop exit
PB: predicated region body
PF: predicated region fallthrough
CT: control target
= control target key end

     0   :  { %s3723_s15 = smov 0   ;;  %s6649_s0 = inlined_call_operand.vmem [shape: f32[2,18,18,8], index: 0, kind: input, shape index: {}]   ;;  %s6650_s1 = inlined_call_operand.vmem [shape: f32[2,18,18,8], index: 1, kind: input, shape index: {}]   ;;  %s6651_s2 = inlined_call_operand.vmem [shape: f32[144,8], index: 2, kind: input, shape index: {}]   ;;  %s6652_s3 = inlined_call_operand.vmem [shape: f32[1,8], index: 3, kind: input, shape index: {}]   ;;  %s6653_s4 = inlined_call_operand.vmem [shape: f32[2,256,8], index: 4, kind: output, shape index: {}]  }
   0x1 LB: > { %s3572_s16 = sadd.s32 4294967295, %s3681_s15   ;;  %p3576_p0 = scmp.ge.s32.totalorder %s3681_s15, 1  ;;  %s3681_s15 = sphi %s3723_s15, %s14_s15  }
   0x2   : > { %p172_p1 = scmp.lt.s32.totalorder %s3681_s15, 3 }
   0x4   : > { %p173_p2 = pnand %p3576_p0, %p172_p1 }
   0x6   : > { %176 = sbr.rel (%p173_p2) target bundleno = 1638 (0x666), region = 36 }
   0xb   : > { %p203_p3 = scmp.lt.s32.totalorder %s3572_s16, 1  ;;  %vm407_vm0 = vcmask 1046528   ;;  %s3683_s21 = smov 8   ;;  %vm326_vm1 = vcmask 64512   ;;  %vm617_vm2 = vcmask 1045504   ;;  %vm584_vm3 = vcmask 130112  }
   0xc   : > { %s3684_s22 = smov 16   ;;  %s3685_s23 = smov 24   ;;  %vm794_vm4 = vcmask 195712   ;;  %vm925_vm5 = vcmask 261312   ;;  %vm1060_vm6 = vcmask 326912   ;;  %vm1194_vm7 = vcmask 392512  }
   0xd   : > { %s7041_s16 = smov (!%p203_p3, %s3572_s16), 1  ;;  %s3686_s24 = smov 32   ;;  %vm1325_vm8 = vcmask 458112   ;;  %vm1460_vm9 = vcmask 523712   ;;  %vm1594_vm10 = vcmask 589312   ;;  %vm1863_vm11 = vcmask 654912  }
   0xe   : > { %s3650_s17 = smul.u32 432, %s7041_s16  ;;  %s3687_s25 = smov 40   ;;  %vm2088_vm12 = vcmask 720512   ;;  %vm2297_vm13 = vcmask 786112   ;;  %vm2428_vm14 = vcmask 851712   ;;  %vm2563_vm15 = vcmask 917312  }
   0xf   : > { %s3688_s26 = smov 48   ;;  %s3689_s27 = smov 56  }
  0x10   : > { %s3739_s20 = scalar_lea.vmem %s6649_s0, %s3650_s17  ;;  %s3690_s28 = smov 64  }
  0x11   : > { %v221_v0 = vld [vmem:[%s3739_s20 + $0x18] sm:$0xff]  ;;  %v222_v1 = vld [vmem:[%s3739_s20 + $0x20] sm:$0xff]  ;;  %v219_v5 = vld [vmem:[%s3739_s20 + $0x8] sm:$0xff]  ;;  %s5039_s5 = scalar_lea.vmem %s6650_s1, %s3650_s17  ;;  %s3691_s6 = smov 72  }
  0x12   : > { %v218_v2 = vld [vmem:[%s3739_s20] sm:$0xff]  ;;  %v3744_v3 = vmax.f32 %v221_v0, 0.0  ;;  %v3746_v4 = vmax.f32 %v222_v1, 0.0  ;;  %v3752_v7 = vld [vmem:[%s3739_s20 + $0x28] sm:$0x3]  ;;  %v3754_v8 = vmax.f32 %v219_v5, 0.0 }
  0x13   : > { %v3749_v6 = vmax.f32 %v218_v2, 0.0  ;;  %v3757_v9 = vld [vmem:[%s3739_s20 + $0x10] sm:$0x3]  ;;  %v225_v11 = vld [vmem:[%s3739_s20 + $0x38] sm:$0xff]  ;;  %v6662_v15 = vmax.f32 %v3752_v7, 0.0  ;;  %v227_v31 = vld [vmem:[%s3739_s20 + $0x48] sm:$0xff] }
  0x14   : > { %v224_v10 = vld [vmem:[%s3739_s20 + $0x30] sm:$0xff]  ;;  %v413_v12 = vrot.slane %v3744_v3, 1  ;;  %v414_v13 = vrot.slane %v3746_v4, 1  ;;  %v409_v16 = vrot.slane %v3754_v8, 1  ;;  %v6663_v17 = vmax.f32 %v3757_v9, 0.0  ;;  %v230_v36 = vld [vmem:[%s3739_s20 + $0x60] sm:$0xff] }
  0x15   : > { %v408_v14 = vrot.slane %v3749_v6, 1  ;;  %v3767_v18 = vmax.f32 %v224_v10, 0.0  ;;  %v3769_v19 = vmax.f32 %v225_v11, 0.0  ;;  %v3775_v21 = vld [vmem:[%s3739_s20 + $0x40] sm:$0x3]  ;;  %v416_v25 = vrot.slane %v6662_v15, 1 }
  0x16   : > { %v3772_v20 = vsel %vm407_vm0, %v413_v12, %v414_v13  ;;  %v411_v26 = vrot.slane %v6663_v17, 1  ;;  %v228_v28 = vld [vmem:[%s3739_s20 + $0x50] sm:$0xff]  ;;  %v3792_v29 = vld [vmem:[%s3739_s20 + $0x58] sm:$0x3]  ;;  %v6661_v30 = vmax.f32 %v3775_v21, 0.0  ;;  %v3808_v38 = vmax.f32 %v227_v31, 0.0 }
  0x17   : > { %492 = vrot.lane.b32.xlu1 %v3772_v20, %s3683_s21  ;;  %v410_v22 = vsel %vm407_vm0, %v408_v14, %v409_v16  ;;  %v418_v23 = vrot.slane %v3767_v18, 1  ;;  %v419_v24 = vrot.slane %v3769_v19, 1  ;;  %v3801_v33 = vsel %vm407_vm0, %v414_v13, %v416_v25  ;;  %v231_v39 = vld [vmem:[%s3739_s20 + $0x68] sm:$0xff]  ;;  %v233_v45 = vld [vmem:[%s3739_s20 + $0x78] sm:$0xff]  ;;  %v234_v46 = vld [vmem:[%s3739_s20 + $0x80] sm:$0xff]  ;;  %331 = vst.msk [vmem:[#allocation2 + $0x40] sm:$0xff] %vm326_vm1, %v3767_v18 }
  0x18   : > { %488 = vrot.lane.b32.xlu0 %v410_v22, %s3683_s21  ;;  %v421_v32 = vrot.slane %v6661_v30, 1  ;;  %v3803_v34 = vmax.f32 %v228_v28, 0.0  ;;  %v6660_v35 = vmax.f32 %v3792_v29, 0.0  ;;  %v412_v37 = vsel %vm407_vm0, %v409_v16, %v411_v26  ;;  %v3830_v48 = vld [vmem:[%s3739_s20 + $0x70] sm:$0x3]  ;;  %v237_v62 = vld [vmem:[%s3739_s20 + $0x98] sm:$0xff] }
  0x19   : > { %v3788_v27 = vsel %vm407_vm0, %v418_v23, %v419_v24  ;;  %v3816_v41 = vmax.f32 %v230_v36, 0.0  ;;  %v423_v44 = vrot.slane %v3808_v38, 1  ;;  %v3825_v47 = vmax.f32 %v231_v39, 0.0  ;;  %v3841_v53 = vld [vmem:[%s3739_s20 + $0x88] sm:$0x3]  ;;  %v236_v0 = vld [vmem:[%s3739_s20 + $0x90] sm:$0xff] }
  0x1a   : > { %496 = vrot.lane.b32.xlu2 %v3788_v27, %s3683_s21  ;;  %v3814_v40 = vsel %vm407_vm0, %v419_v24, %v421_v32  ;;  %v424_v42 = vrot.slane %v3803_v34, 1  ;;  %v426_v43 = vrot.slane %v6660_v35, 1  ;;  %v3836_v51 = vmax.f32 %v233_v45, 0.0  ;;  %v3862_v63 = vld [vmem:[%s3739_s20 + $0xa0] sm:$0x3]  ;;  %v239_v11 = vld [vmem:[%s3739_s20 + $0xa8] sm:$0xff] }
  0x1b   : > { %6817 = vst [vmem:[#allocation3_spill] sm:$0xff] %v3814_v40  ;;  %v428_v49 = vrot.slane %v3816_v41, 1  ;;  %v3838_v52 = vmax.f32 %v234_v46, 0.0  ;;  %v6659_v55 = vmax.f32 %v3830_v48, 0.0  ;;  %v429_v56 = vrot.slane %v3825_v47, 1  ;;  %v240_v14 = vld [vmem:[%s3739_s20 + $0xb0] sm:$0xff] }
  0x1c   : > { %v3834_v50 = vsel %vm407_vm0, %v424_v42, %v426_v43  ;;  %v3844_v54 = vsel %vm407_vm0, %v423_v44, %v424_v42  ;;  %v6657_v58 = vmax.f32 %v3841_v53, 0.0  ;;  %v433_v59 = vrot.slane %v3836_v51, 1  ;;  %v242_v26 = vld [vmem:[%s3739_s20 + $0xc0] sm:$0xff]  ;;  %v243_v28 = vld [vmem:[%s3739_s20 + $0xc8] sm:$0xff]  ;;  %v3902_v32 = vld [vmem:[%s3739_s20 + $0xb8] sm:$0x3] }
  0x1d   : > { %6818 = vst [vmem:[#allocation4_spill] sm:$0xff] %v3834_v50  ;;  %v3851_v57 = vsel %vm407_vm0, %v428_v49, %v429_v56  ;;  %v434_v60 = vrot.slane %v3838_v52, 1  ;;  %v431_v61 = vrot.slane %v6659_v55, 1  ;;  %v3872_v5 = vmax.f32 %v237_v62, 0.0  ;;  %v3913_v43 = vld [vmem:[%s3739_s20 + $0xd0] sm:$0x3] }
  0x1e   : > { %6819 = vst [vmem:[#allocation5_spill] sm:$0xff] %v3851_v57  ;;  %v436_v1 = vrot.slane %v6657_v58, 1  ;;  %v6656_v10 = vmax.f32 %v3862_v63, 0.0  ;;  %v3879_v13 = vmax.f32 %v236_v0, 0.0  ;;  %v3887_v22 = vmax.f32 %v239_v11, 0.0  ;;  %v246_v62 = vld [vmem:[%s3739_s20 + $0xe0] sm:$0xff] }
  0x1f   : > { %494 = vrot.lane.b32.xlu1 %v3801_v33, %s3683_s21  ;;  %v3870_v2 = vsel %vm407_vm0, %v433_v59, %v434_v60  ;;  %v3877_v12 = vsel %vm407_vm0, %v429_v56, %v431_v61  ;;  %v439_v23 = vrot.slane %v3872_v5, 1  ;;  %v3897_v31 = vmax.f32 %v240_v14, 0.0  ;;  %v3934_v0 = vld [vmem:[%s3739_s20 + $0xe8] sm:$0x3]  ;;  %v3985_v55 = vld [vmem:[%s3739_s20 + $0x118] sm:$0x3] }
  0x20   : > { %490 = vrot.lane.b32.xlu0 %v412_v37, %s3683_s21  ;;  %6820 = vst [vmem:[#allocation6_spill] sm:$0xff] %v3870_v2  ;;  %v3885_v16 = vsel %vm407_vm0, %v434_v60, %v436_v1  ;;  %v441_v24 = vrot.slane %v6656_v10, 1  ;;  %v438_v25 = vrot.slane %v3879_v13, 1  ;;  %v443_v36 = vrot.slane %v3887_v22, 1  ;;  %v245_v1 = vld [vmem:[%s3739_s20 + $0xd8] sm:$0xff]  ;;  %v255_v15 = vld [vmem:[%s3739_s20 + $0x128] sm:$0xff] }
  0x21   : > { %6821 = vst [vmem:[#allocation7_spill] sm:$0xff] %v3877_v12  ;;  %v3908_v39 = vmax.f32 %v242_v26, 0.0  ;;  %v3910_v42 = vmax.f32 %v243_v28, 0.0  ;;  %v6655_v45 = vmax.f32 %v3902_v32, 0.0  ;;  %v444_v46 = vrot.slane %v3897_v31, 1  ;;  %s3692_s7 = smov 80  }
  0x22   : > { %498 = vrot.lane.b32.xlu2 %v3814_v40, %s3683_s21  ;;  %6822 = vst [vmem:[#allocation8_spill] sm:$0xff] %v3885_v16  ;;  %v3906_v37 = vsel %vm407_vm0, %v439_v23, %v441_v24  ;;  %v3916_v44 = vsel %vm407_vm0, %v438_v25, %v439_v23  ;;  %v6654_v56 = vmax.f32 %v3913_v43, 0.0  ;;  %v3944_v23 = vmax.f32 %v246_v62, 0.0  ;;  %v248_v25 = vld [vmem:[%s3739_s20 + $0xf0] sm:$0xff]  ;;  %s3693_s8 = smov 88   ;;  %s3694_s9 = smov 96  }
  0x23   : > { %6823 = vst [vmem:[#allocation9_spill] sm:$0xff] %v3906_v37  ;;  %v3923_v49 = vsel %vm407_vm0, %v443_v36, %v444_v46  ;;  %v448_v59 = vrot.slane %v3908_v39, 1  ;;  %v449_v60 = vrot.slane %v3910_v42, 1  ;;  %v446_v61 = vrot.slane %v6655_v45, 1  ;;  %v249_v36 = vld [vmem:[%s3739_s20 + $0xf8] sm:$0xff]  ;;  %v252_v45 = vld [vmem:[%s3739_s20 + $0x110] sm:$0xff] }
  0x24   : > { %6824 = vst [vmem:[#allocation10_spill] sm:$0xff] %v3916_v44  ;;  %v451_v11 = vrot.slane %v6654_v56, 1  ;;  %v6658_v24 = vmax.f32 %v3934_v0, 0.0  ;;  %v3951_v28 = vmax.f32 %v245_v1, 0.0  ;;  %v454_v62 = vrot.slane %v3944_v23, 1  ;;  %v251_v1 = vld [vmem:[%s3739_s20 + $0x108] sm:$0xff] }
  0x25   : > { %6825 = vst [vmem:[#allocation11_spill] sm:$0xff] %v3923_v49  ;;  %v3942_v14 = vsel %vm407_vm0, %v448_v59, %v449_v60  ;;  %v3949_v26 = vsel %vm407_vm0, %v444_v46, %v446_v61  ;;  %v3959_v59 = vmax.f32 %v248_v25, 0.0  ;;  %v3969_v10 = vmax.f32 %v249_v36, 0.0  ;;  %v4006_v17 = vld [vmem:[%s3739_s20 + $0x130] sm:$0x3]  ;;  %s3695_s10 = smov 104  }
  0x26   : > { %6826 = vst [vmem:[#allocation12_spill] sm:$0xff] %v3942_v14  ;;  %v3957_v56 = vsel %vm407_vm0, %v449_v60, %v451_v11  ;;  %v456_v46 = vrot.slane %v6658_v24, 1  ;;  %v453_v61 = vrot.slane %v3951_v28, 1  ;;  %v3974_v60 = vld [vmem:[%s3739_s20 + $0x100] sm:$0x3]  ;;  %v3980_v58 = vmax.f32 %v251_v1, 0.0 }
  0x27   : > { %502 = vrot.lane.b32.xlu1 %v3834_v50, %s3683_s21  ;;  %6827 = vst [vmem:[#allocation13_spill] sm:$0xff] %v3949_v26  ;;  %v458_v11 = vrot.slane %v3959_v59, 1  ;;  %v3982_v24 = vmax.f32 %v252_v45, 0.0  ;;  %v6672_v35 = vmax.f32 %v3974_v60, 0.0  ;;  %v459_v30 = vrot.slane %v3969_v10, 1  ;;  %s3696_s11 = smov 120  }
  0x28   : > { %500 = vrot.lane.b32.xlu0 %v3844_v54, %s3683_s21  ;;  %6828 = vst [vmem:[#allocation14_spill] sm:$0xff] %v3957_v56  ;;  %v3978_v25 = vsel %vm407_vm0, %v454_v62, %v456_v46  ;;  %v3988_v36 = vsel %vm407_vm0, %v453_v61, %v454_v62  ;;  %v6679_v1 = vmax.f32 %v3985_v55, 0.0  ;;  %v463_v45 = vrot.slane %v3980_v58, 1  ;;  %s3697_s12 = smov 112  }
  0x29   : > { %6829 = vst [vmem:[#allocation15_spill] sm:$0xff] %v3978_v25  ;;  %v3995_v46 = vsel %vm407_vm0, %v458_v11, %v459_v30  ;;  %v464_v62 = vrot.slane %v3982_v24, 1  ;;  %v461_v61 = vrot.slane %v6672_v35, 1  ;;  %v254_v11 = vld [vmem:[%s3739_s20 + $0x120] sm:$0xff]  ;;  %v257_v35 = vld [vmem:[%s3739_s20 + $0x138] sm:$0xff] }
  0x2a   : > { %504 = vrot.lane.b32.xlu2 %v3851_v57, %s3683_s21  ;;  %6830 = vst [vmem:[#allocation16_spill] sm:$0xff] %v3988_v36  ;;  %v4078_v57 = vld [vmem:[%s3739_s20 + $0x178] sm:$0x3] }
  0x2b   : > { %6831 = vst [vmem:[#allocation17_spill] sm:$0xff] %v3995_v46  ;;  %v6710_v50 = vmax.f32 %v4078_v57, 0.0 }
  0x2c   : > { %327 = vst.msk [vmem:[#allocation2] sm:$0xff] %vm326_vm1, %v3749_v6 }
  0x2d   : > { %328 = vst.msk [vmem:[#allocation2 + $0x10] sm:$0xff] %vm326_vm1, %v3754_v8 }
  0x2e   : > { %329 = vst.msk [vmem:[#allocation2 + $0x20] sm:$0xff] %vm326_vm1, %v3744_v3 }
  0x2f   : > { %508 = vrot.lane.b32.xlu1 %v3870_v2, %s3683_s21  ;;  %v264_v2 = vld [vmem:[%s3739_s20 + $0x170] sm:$0xff]  ;;  %330 = vst.msk [vmem:[#allocation2 + $0x30] sm:$0xff] %vm326_vm1, %v3746_v4 }
  0x30   : > { %506 = vrot.lane.b32.xlu0 %v3877_v12, %s3683_s21  ;;  %332 = vst.msk [vmem:[#allocation2 + $0x50] sm:$0xff] %vm326_vm1, %v3769_v19 }
  0x31   : > { %333 = vst.msk [vmem:[#allocation2 + $0x60] sm:$0xff] %vm326_vm1, %v3808_v38 }
  0x32   : > { %510 = vrot.lane.b32.xlu2 %v3885_v16, %s3683_s21  ;;  %334 = vst.msk [vmem:[#allocation2 + $0x70] sm:$0xff] %vm326_vm1, %v3803_v34 }
  0x33   : > { %335 = vst.msk [vmem:[#allocation2 + $0x80] sm:$0xff] %vm326_vm1, %v3816_v41 }
  0x34   : > { %336 = vst.msk [vmem:[#allocation2 + $0x90] sm:$0xff] %vm326_vm1, %v3825_v47 }
  0x35   : > { %337 = vst.msk [vmem:[#allocation2 + $0xa0] sm:$0xff] %vm326_vm1, %v3836_v51 }
  0x36   : > { %338 = vst.msk [vmem:[#allocation2 + $0xb0] sm:$0xff] %vm326_vm1, %v3838_v52 }
  0x37   : > { %514 = vrot.lane.b32.xlu1 %v3906_v37, %s3683_s21  ;;  %v261_v37 = vld [vmem:[%s3739_s20 + $0x158] sm:$0xff]  ;;  %339 = vst.msk [vmem:[#allocation2 + $0xc0] sm:$0xff] %vm326_vm1, %v3879_v13 }
  0x38   : > { %512 = vrot.lane.b32.xlu0 %v3916_v44, %s3683_s21  ;;  %340 = vst.msk [vmem:[#allocation2 + $0xd0] sm:$0xff] %vm326_vm1, %v3872_v5 }
  0x39   : > { %341 = vst.msk [vmem:[#allocation2 + $0xe0] sm:$0xff] %vm326_vm1, %v3887_v22 }
  0x3a   : > { %516 = vrot.lane.b32.xlu2 %v3923_v49, %s3683_s21  ;;  %v4021_v49 = vsel %vm407_vm0, %v459_v30, %v461_v61  ;;  %342 = vst.msk [vmem:[#allocation2 + $0xf0] sm:$0xff] %vm326_vm1, %v3897_v31 }
  0x3b   : > { %6833 = vst [vmem:[#allocation19_spill] sm:$0xff] %v4021_v49 }
  0x3c   : > { %343 = vst.msk [vmem:[#allocation2 + $0x100] sm:$0xff] %vm326_vm1, %v3908_v39 }
  0x3d   : > { %344 = vst.msk [vmem:[#allocation2 + $0x110] sm:$0xff] %vm326_vm1, %v3910_v42 }
  0x3e   : > { %345 = vst.msk [vmem:[#allocation2 + $0x120] sm:$0xff] %vm326_vm1, %v3951_v28 }
  0x3f   : > { %520 = vrot.lane.b32.xlu1 %v3942_v14, %s3683_s21  ;;  %v6686_v14 = vmax.f32 %v4006_v17, 0.0  ;;  %346 = vst.msk [vmem:[#allocation2 + $0x130] sm:$0xff] %vm326_vm1, %v3944_v23 }
  0x40   : > { %518 = vrot.lane.b32.xlu0 %v3949_v26, %s3683_s21  ;;  %v4023_v26 = vmax.f32 %v254_v11, 0.0  ;;  %v260_v11 = vld [vmem:[%s3739_s20 + $0x150] sm:$0xff]  ;;  %347 = vst.msk [vmem:[#allocation2 + $0x140] sm:$0xff] %vm326_vm1, %v3959_v59 }
  0x41   : > { %v471_v30 = vrot.slane %v6686_v14, 1  ;;  %v4054_v14 = vmax.f32 %v261_v37, 0.0  ;;  %348 = vst.msk [vmem:[#allocation2 + $0x150] sm:$0xff] %vm326_vm1, %v3969_v10 }
  0x42   : > { %522 = vrot.lane.b32.xlu2 %v3957_v56, %s3683_s21  ;;  %v4014_v56 = vsel %vm407_vm0, %v463_v45, %v464_v62  ;;  %v4031_v45 = vmax.f32 %v257_v35, 0.0  ;;  %v468_v61 = vrot.slane %v4023_v26, 1  ;;  %349 = vst.msk [vmem:[#allocation2 + $0x160] sm:$0xff] %vm326_vm1, %v3980_v58 }
  0x43   : > { %6832 = vst [vmem:[#allocation18_spill] sm:$0xff] %v4014_v56 }
  0x44   : > { %v473_v35 = vrot.slane %v4031_v45, 1  ;;  %350 = vst.msk [vmem:[#allocation2 + $0x170] sm:$0xff] %vm326_vm1, %v3982_v24 }
  0x45   : > { %351 = vst.msk [vmem:[#allocation2 + $0x180] sm:$0xff] %vm326_vm1, %v4023_v26 }
  0x46   : > { %353 = vst.msk [vmem:[#allocation2 + $0x1a0] sm:$0xff] %vm326_vm1, %v4031_v45 }
  0x47   : > { %526 = vrot.lane.b32.xlu1 %v3978_v25, %s3683_s21  ;;  %v466_v25 = vrot.slane %v6679_v1, 1  ;;  %356 = vst.msk [vmem:[#allocation2 + $0x1d0] sm:$0xff] %vm326_vm1, %v4054_v14 }
  0x48   : > { %524 = vrot.lane.b32.xlu0 %v3988_v36, %s3683_s21  ;;  %v4016_v36 = vmax.f32 %v255_v15, 0.0 }
  0x49   : > { %v4029_v1 = vsel %vm407_vm0, %v464_v62, %v466_v25  ;;  %v4046_v25 = vld [vmem:[%s3739_s20 + $0x148] sm:$0x3] }
  0x4a   : > { %528 = vrot.lane.b32.xlu2 %v3995_v46, %s3683_s21  ;;  %v258_v46 = vld [vmem:[%s3739_s20 + $0x140] sm:$0xff]  ;;  %6834 = vst [vmem:[#allocation20_spill] sm:$0xff] %v4029_v1  ;;  %v469_v15 = vrot.slane %v4016_v36, 1 }
  0x4b   : > { %v4041_v16 = vmax.f32 %v258_v46, 0.0  ;;  %352 = vst.msk [vmem:[#allocation2 + $0x190] sm:$0xff] %vm326_vm1, %v4016_v36 }
  0x4c   : > { %v4050_v62 = vsel %vm407_vm0, %v469_v15, %v471_v30  ;;  %v4060_v46 = vsel %vm407_vm0, %v468_v61, %v469_v15  ;;  %v479_v15 = vrot.slane %v4054_v14, 1 }
  0x4d   : > { %6835 = vst [vmem:[#allocation21_spill] sm:$0xff] %v4050_v62  ;;  %v474_v44 = vrot.slane %v4041_v16, 1 }
  0x4e   : > { %6836 = vst [vmem:[#allocation22_spill] sm:$0xff] %v4060_v46 }
  0x4f   : > { %532 = vrot.lane.b32.xlu1 %v4014_v56, %s3683_s21  ;;  %v4052_v56 = vmax.f32 %v260_v11, 0.0  ;;  %v4067_v30 = vsel %vm407_vm0, %v473_v35, %v474_v44  ;;  %v263_v35 = vld [vmem:[%s3739_s20 + $0x168] sm:$0xff]  ;;  %354 = vst.msk [vmem:[#allocation2 + $0x1b0] sm:$0xff] %vm326_vm1, %v4041_v16 }
  0x50   : > { %530 = vrot.lane.b32.xlu0 %v4021_v49, %s3683_s21  ;;  %v4057_v49 = vld [vmem:[%s3739_s20 + $0x160] sm:$0x3]  ;;  %6837 = vst [vmem:[#allocation23_spill] sm:$0xff] %v4067_v30 }
  0x51   : > { %v6711_v11 = vmax.f32 %v4057_v49, 0.0  ;;  %v478_v37 = vrot.slane %v4052_v56, 1  ;;  %355 = vst.msk [vmem:[#allocation2 + $0x1c0] sm:$0xff] %vm326_vm1, %v4052_v56 }
  0x52   : > { %534 = vrot.lane.b32.xlu2 %v4029_v1, %s3683_s21  ;;  %v6707_v1 = vmax.f32 %v4046_v25, 0.0 }
  0x53   : > { %v4086_v12 = vsel %vm407_vm0, %v478_v37, %v479_v15 }
  0x54   : > { %v476_v61 = vrot.slane %v6707_v1, 1  ;;  %6838 = vst [vmem:[#allocation24_spill] sm:$0xff] %v4086_v12  ;;  %v4094_v1 = vmax.f32 %v263_v35, 0.0  ;;  %v619_v35 = vrot.slane %v3754_v8, 2  ;;  %v623_v8 = vrot.slane %v3744_v3, 2 }
  0x56   : > { %v4092_v40 = vsel %vm407_vm0, %v474_v44, %v476_v61  ;;  %v483_v44 = vrot.slane %v4094_v1, 1  ;;  %357 = vst.msk [vmem:[#allocation2 + $0x1e0] sm:$0xff] %vm326_vm1, %v4094_v1 }
  0x57   : > { %538 = vrot.lane.b32.xlu1 %v4050_v62, %s3683_s21  ;;  %v481_v62 = vrot.slane %v6711_v11, 1  ;;  %6839 = vst [vmem:[#allocation25_spill] sm:$0xff] %v4092_v40 }
  0x58   : > { %536 = vrot.lane.b32.xlu0 %v4060_v46, %s3683_s21  ;;  %v4088_v46 = vmax.f32 %v264_v2, 0.0  ;;  %v486_v2 = vrot.slane %v6710_v50, 1 }
  0x5a   : > { %540 = vrot.lane.b32.xlu2 %v4067_v30, %s3683_s21  ;;  %v4099_v30 = vsel %vm407_vm0, %v479_v15, %v481_v62  ;;  %v484_v37 = vrot.slane %v4088_v46, 1  ;;  %v618_v62 = vrot.slane %v3749_v6, 2  ;;  %358 = vst.msk [vmem:[#allocation2 + $0x1f0] sm:$0xff] %vm326_vm1, %v4088_v46 }
  0x5b   : > { %6840 = vst [vmem:[#allocation26_spill] sm:$0xff] %v4099_v30 }
  0x5c   : > { %v4117_v15 = vsel %vm407_vm0, %v484_v37, %v486_v2  ;;  %v4122_v61 = vsel %vm407_vm0, %v483_v44, %v484_v37  ;;  %v620_v6 = vsel %vm617_vm2, %v618_v62, %v619_v35  ;;  %v624_v37 = vrot.slane %v3746_v4, 2 }
  0x5d   : > { %6841 = vst [vmem:[#allocation27_spill] sm:$0xff] %v4122_v61  ;;  %v6842_v2 = vmax.f32 %v3757_v9, 0.0  ;;  %v6843_v62 = vmax.f32 %v3752_v7, 0.0 }
  0x5e   : > { %v4152_v11 = vsel %vm617_vm2, %v623_v8, %v624_v37 }
  0x5f   : > { %544 = vrot.lane.b32.xlu1 %v4086_v12, %s3683_s21  ;;  %v621_v44 = vrot.slane %v6842_v2, 2  ;;  %v626_v50 = vrot.slane %v6843_v62, 2  ;;  %v628_v2 = vrot.slane %v3767_v18, 2  ;;  %v634_v62 = vrot.slane %v3803_v34, 2 }
  0x60   : > { %542 = vrot.lane.b32.xlu0 %v4092_v40, %s3683_s21 }
  0x61   : > { %v622_v9 = vsel %vm617_vm2, %v619_v35, %v621_v44  ;;  %v4164_v7 = vsel %vm617_vm2, %v624_v37, %v626_v50  ;;  %v6845_v35 = vmax.f32 %v3775_v21, 0.0  ;;  %v633_v21 = vrot.slane %v3808_v38, 2 }
  0x62   : > { %546 = vrot.lane.b32.xlu2 %v4099_v30, %s3683_s21  ;;  %6844 = vst [vmem:[#allocation28_spill] sm:$0xff] %v4164_v7 }
  0x63   : > { %v631_v8 = vrot.slane %v6845_v35, 2  ;;  %v639_v35 = vrot.slane %v3825_v47, 2 }
  0x67   : > { %550 = vrot.lane.b32.xlu1 %v4117_v15, %s3683_s21 }
  0x68   : > { %548 = vrot.lane.b32.xlu0 %v4122_v61, %s3683_s21 }
  0x6a   : > { %698 = vrot.lane.b32.xlu2 %v620_v6, %s3684_s22  ;;  %v629_v6 = vrot.slane %v3769_v19, 2 }
  0x6c   : > { %v4185_v50 = vsel %vm617_vm2, %v629_v6, %v631_v8  ;;  %v4190_v44 = vsel %vm617_vm2, %v628_v2, %v629_v6  ;;  %v638_v6 = vrot.slane %v3816_v41, 2  ;;  %v6848_v8 = vmax.f32 %v3792_v29, 0.0 }
  0x6d   : > { %6846 = vst [vmem:[#allocation29_spill] sm:$0xff] %v4185_v50 }
  0x6e   : > { %v636_v2 = vrot.slane %v6848_v8, 2 }
  0x6f   : > { %702 = vrot.lane.b32.xlu1 %v4152_v11, %s3684_s22 }
  0x70   : > { %700 = vrot.lane.b32.xlu0 %v622_v9, %s3684_s22  ;;  %v4201_v9 = vsel %vm617_vm2, %v633_v21, %v634_v62  ;;  %v6849_v21 = vmax.f32 %v3830_v48, 0.0  ;;  %v4227_v8 = vsel %vm617_vm2, %v634_v62, %v636_v2  ;;  %v644_v62 = vrot.slane %v3838_v52, 2 }
  0x71   : > { %6847 = vst [vmem:[#allocation30_spill] sm:$0xff] %v4201_v9 }
  0x72   : > { %704 = vrot.lane.b32.xlu2 %v4164_v7, %s3684_s22  ;;  %6851 = vst [vmem:[#allocation32_spill] sm:$0xff] %v4227_v8 }
  0x74   : > { %v497_v37 = vpop.permute.xlu2 %496 }
  0x75   : > { %589 = vst.msk [vmem:[#allocation2 + $0x40] sm:$0xff] %vm584_vm3, %v497_v37  ;;  %v641_v37 = vrot.slane %v6849_v21, 2  ;;  %v643_v21 = vrot.slane %v3836_v51, 2 }
  0x77   : > { %708 = vrot.lane.b32.xlu1 %v4185_v50, %s3684_s22  ;;  %v4222_v50 = vsel %vm617_vm2, %v638_v6, %v639_v35  ;;  %v4238_v48 = vsel %vm617_vm2, %v639_v35, %v641_v37  ;;  %v6853_v6 = vmax.f32 %v3841_v53, 0.0  ;;  %v648_v35 = vrot.slane %v3879_v13, 2 }
  0x78   : > { %706 = vrot.lane.b32.xlu0 %v4190_v44, %s3684_s22  ;;  %6850 = vst [vmem:[#allocation31_spill] sm:$0xff] %v4222_v50  ;;  %v649_v53 = vrot.slane %v3872_v5, 2 }
  0x79   : > { %6852 = vst [vmem:[#allocation33_spill] sm:$0xff] %v4238_v48  ;;  %v646_v2 = vrot.slane %v6853_v6, 2  ;;  %v653_v6 = vrot.slane %v3887_v22, 2 }
  0x7a   : > { %710 = vrot.lane.b32.xlu2 %v4201_v9, %s3684_s22  ;;  %v4258_v9 = vsel %vm617_vm2, %v643_v21, %v644_v62 }
  0x7b   : > { %v4255_v37 = vsel %vm617_vm2, %v644_v62, %v646_v2  ;;  %6855 = vst [vmem:[#allocation35_spill] sm:$0xff] %v4258_v9  ;;  %v654_v2 = vrot.slane %v3897_v31, 2  ;;  %v6856_v62 = vmax.f32 %v3862_v63, 0.0 }
  0x7c   : > { %v499_v29 = vpop.permute.xlu2 %498  ;;  %6854 = vst [vmem:[#allocation34_spill] sm:$0xff] %v4255_v37 }
  0x7d   : > { %590 = vst.msk [vmem:[#allocation2 + $0x50] sm:$0xff] %vm584_vm3, %v499_v29  ;;  %v4265_v29 = vsel %vm617_vm2, %v648_v35, %v649_v53  ;;  %v651_v21 = vrot.slane %v6856_v62, 2  ;;  %v6857_v35 = vmax.f32 %v3902_v32, 0.0  ;;  %v659_v32 = vrot.slane %v3910_v42, 2 }
  0x7f   : > { %714 = vrot.lane.b32.xlu1 %v4222_v50, %s3684_s22  ;;  %v4283_v7 = vsel %vm617_vm2, %v649_v53, %v651_v21  ;;  %v658_v53 = vrot.slane %v3908_v39, 2 }
  0x80   : > { %712 = vrot.lane.b32.xlu0 %v4227_v8, %s3684_s22  ;;  %6859 = vst [vmem:[#allocation37_spill] sm:$0xff] %v4283_v7 }
  0x82   : > { %716 = vrot.lane.b32.xlu2 %v4238_v48, %s3684_s22 }
  0x84   : > { %v505_v50 = vpop.permute.xlu2 %504 }
  0x85   : > { %593 = vst.msk [vmem:[#allocation2 + $0x80] sm:$0xff] %vm584_vm3, %v505_v50 }
  0x87   : > { %720 = vrot.lane.b32.xlu1 %v4255_v37, %s3684_s22  ;;  %v656_v37 = vrot.slane %v6857_v35, 2 }
  0x88   : > { %718 = vrot.lane.b32.xlu0 %v4258_v9, %s3684_s22  ;;  %v4280_v9 = vsel %vm617_vm2, %v653_v6, %v654_v2 }
  0x89   : > { %v493_v48 = vpop.permute.xlu1 %492  ;;  %6858 = vst [vmem:[#allocation36_spill] sm:$0xff] %v4280_v9  ;;  %v4289_v63 = vsel %vm617_vm2, %v654_v2, %v656_v37  ;;  %v663_v37 = vrot.slane %v3951_v28, 2 }
  0x8a   : > { %587 = vst.msk [vmem:[#allocation2 + $0x20] sm:$0xff] %vm584_vm3, %v493_v48  ;;  %v489_v50 = vpop.permute.xlu0 %488  ;;  %722 = vrot.lane.b32.xlu2 %v4265_v29, %s3684_s22  ;;  %v6861_v48 = vmax.f32 %v3913_v43, 0.0  ;;  %v4306_v43 = vsel %vm617_vm2, %v658_v53, %v659_v32 }
  0x8b   : > { %585 = vst.msk [vmem:[#allocation2] sm:$0xff] %vm584_vm3, %v489_v50  ;;  %v664_v50 = vrot.slane %v3944_v23, 2 }
  0x8c   : > { %v511_v8 = vpop.permute.xlu2 %510  ;;  %6860 = vst [vmem:[#allocation38_spill] sm:$0xff] %v4289_v63  ;;  %v661_v6 = vrot.slane %v6861_v48, 2  ;;  %v668_v48 = vrot.slane %v3959_v59, 2 }
  0x8d   : > { %596 = vst.msk [vmem:[#allocation2 + $0xb0] sm:$0xff] %vm584_vm3, %v511_v8  ;;  %v4313_v35 = vsel %vm617_vm2, %v663_v37, %v664_v50  ;;  %v6865_v37 = vmax.f32 %v3974_v60, 0.0  ;;  %v674_v60 = vrot.slane %v3982_v24, 2 }
  0x8e   : > { %v4303_v2 = vsel %vm617_vm2, %v659_v32, %v661_v6  ;;  %6863 = vst [vmem:[#allocation40_spill] sm:$0xff] %v4306_v43  ;;  %v669_v6 = vrot.slane %v3969_v10, 2  ;;  %v6864_v32 = vmax.f32 %v3934_v0, 0.0 }
  0x8f   : > { %726 = vrot.lane.b32.xlu1 %v4280_v9, %s3684_s22  ;;  %6862 = vst [vmem:[#allocation39_spill] sm:$0xff] %v4303_v2 }
  0x90   : > { %724 = vrot.lane.b32.xlu0 %v4283_v7, %s3684_s22  ;;  %v666_v53 = vrot.slane %v6864_v32, 2 }
  0x91   : > { %v495_v62 = vpop.permute.xlu1 %494 }
  0x92   : > { %588 = vst.msk [vmem:[#allocation2 + $0x30] sm:$0xff] %vm584_vm3, %v495_v62  ;;  %v491_v8 = vpop.permute.xlu0 %490  ;;  %728 = vrot.lane.b32.xlu2 %v4289_v63, %s3684_s22 }
  0x93   : > { %586 = vst.msk [vmem:[#allocation2 + $0x10] sm:$0xff] %vm584_vm3, %v491_v8 }
  0x94   : > { %v517_v21 = vpop.permute.xlu2 %516 }
  0x95   : > { %599 = vst.msk [vmem:[#allocation2 + $0xe0] sm:$0xff] %vm584_vm3, %v517_v21  ;;  %v671_v21 = vrot.slane %v6865_v37, 2  ;;  %v679_v37 = vrot.slane %v4016_v36, 2 }
  0x97   : > { %732 = vrot.lane.b32.xlu1 %v4303_v2, %s3684_s22  ;;  %v4328_v2 = vsel %vm617_vm2, %v668_v48, %v669_v6  ;;  %v4337_v0 = vsel %vm617_vm2, %v669_v6, %v671_v21  ;;  %v6869_v48 = vmax.f32 %v3985_v55, 0.0  ;;  %v678_v6 = vrot.slane %v4023_v26, 2 }
  0x98   : > { %730 = vrot.lane.b32.xlu0 %v4306_v43, %s3684_s22  ;;  %6866 = vst [vmem:[#allocation41_spill] sm:$0xff] %v4328_v2  ;;  %v4331_v43 = vsel %vm617_vm2, %v664_v50, %v666_v53  ;;  %v673_v50 = vrot.slane %v3980_v58, 2 }
  0x99   : > { %v503_v62 = vpop.permute.xlu1 %502  ;;  %6867 = vst [vmem:[#allocation42_spill] sm:$0xff] %v4331_v43  ;;  %v4361_v21 = vsel %vm617_vm2, %v678_v6, %v679_v37  ;;  %v6873_v6 = vmax.f32 %v4046_v25, 0.0  ;;  %v689_v25 = vrot.slane %v4054_v14, 2 }
  0x9a   : > { %592 = vst.msk [vmem:[#allocation2 + $0x70] sm:$0xff] %vm584_vm3, %v503_v62  ;;  %v501_v8 = vpop.permute.xlu0 %500  ;;  %734 = vrot.lane.b32.xlu2 %v4313_v35, %s3684_s22  ;;  %v676_v62 = vrot.slane %v6869_v48, 2  ;;  %v4354_v55 = vsel %vm617_vm2, %v673_v50, %v674_v60  ;;  %v683_v48 = vrot.slane %v4031_v45, 2 }
  0x9b   : > { %591 = vst.msk [vmem:[#allocation2 + $0x60] sm:$0xff] %vm584_vm3, %v501_v8 }
  0x9c   : > { %v523_v63 = vpop.permute.xlu2 %522  ;;  %6868 = vst [vmem:[#allocation43_spill] sm:$0xff] %v4337_v0  ;;  %v4351_v53 = vsel %vm617_vm2, %v674_v60, %v676_v62  ;;  %v684_v62 = vrot.slane %v4041_v16, 2  ;;  %v6872_v60 = vmax.f32 %v4006_v17, 0.0 }
  0x9d   : > { %602 = vst.msk [vmem:[#allocation2 + $0x110] sm:$0xff] %vm584_vm3, %v523_v63 }
  0x9e   : > { %6870 = vst [vmem:[#allocation44_spill] sm:$0xff] %v4351_v53  ;;  %v681_v50 = vrot.slane %v6872_v60, 2 }
  0x9f   : > { %738 = vrot.lane.b32.xlu1 %v4328_v2, %s3684_s22  ;;  %6871 = vst [vmem:[#allocation45_spill] sm:$0xff] %v4354_v55 }
  0xa0   : > { %736 = vrot.lane.b32.xlu0 %v4331_v43, %s3684_s22 }
  0xa1   : > { %v509_v32 = vpop.permute.xlu1 %508 }
  0xa2   : > { %595 = vst.msk [vmem:[#allocation2 + $0xa0] sm:$0xff] %vm584_vm3, %v509_v32  ;;  %v507_v63 = vpop.permute.xlu0 %506  ;;  %740 = vrot.lane.b32.xlu2 %v4337_v0, %s3684_s22 }
  0xa3   : > { %594 = vst.msk [vmem:[#allocation2 + $0x90] sm:$0xff] %vm584_vm3, %v507_v63 }
  0xa4   : > { %v529_v8 = vpop.permute.xlu2 %528 }
  0xa5   : > { %605 = vst.msk [vmem:[#allocation2 + $0x140] sm:$0xff] %vm584_vm3, %v529_v8  ;;  %v686_v8 = vrot.slane %v6873_v6, 2  ;;  %v694_v6 = vrot.slane %v4088_v46, 2 }
  0xa7   : > { %744 = vrot.lane.b32.xlu1 %v4351_v53, %s3684_s22  ;;  %v4376_v53 = vsel %vm617_vm2, %v683_v48, %v684_v62  ;;  %v4385_v17 = vsel %vm617_vm2, %v684_v62, %v686_v8  ;;  %v6875_v48 = vmax.f32 %v4057_v49, 0.0  ;;  %v693_v62 = vrot.slane %v4094_v1, 2 }
  0xa8   : > { %742 = vrot.lane.b32.xlu0 %v4354_v55, %s3684_s22  ;;  %6874 = vst [vmem:[#allocation46_spill] sm:$0xff] %v4376_v53  ;;  %v4379_v55 = vsel %vm617_vm2, %v679_v37, %v681_v50  ;;  %v688_v37 = vrot.slane %v4052_v56, 2 }
  0xa9   : > { %v515_v32 = vpop.permute.xlu1 %514  ;;  %v4409_v8 = vsel %vm617_vm2, %v693_v62, %v694_v6 }
  0xaa   : > { %598 = vst.msk [vmem:[#allocation2 + $0xd0] sm:$0xff] %vm584_vm3, %v515_v32  ;;  %v513_v63 = vpop.permute.xlu0 %512  ;;  %746 = vrot.lane.b32.xlu2 %v4361_v21, %s3684_s22  ;;  %v691_v32 = vrot.slane %v6875_v48, 2  ;;  %v4402_v49 = vsel %vm617_vm2, %v688_v37, %v689_v25 }
  0xab   : > { %597 = vst.msk [vmem:[#allocation2 + $0xc0] sm:$0xff] %vm584_vm3, %v513_v63 }
  0xac   : > { %v535_v0 = vpop.permute.xlu2 %534  ;;  %v4399_v50 = vsel %vm617_vm2, %v689_v25, %v691_v32  ;;  %6877 = vst [vmem:[#allocation48_spill] sm:$0xff] %v4402_v49  ;;  %v6878_v32 = vmax.f32 %v4078_v57, 0.0 }
  0xad   : > { %608 = vst.msk [vmem:[#allocation2 + $0x170] sm:$0xff] %vm584_vm3, %v535_v0 }
  0xae   : > { %6876 = vst [vmem:[#allocation47_spill] sm:$0xff] %v4399_v50 }
  0xaf   : > { %750 = vrot.lane.b32.xlu1 %v4376_v53, %s3684_s22 }
  0xb0   : > { %748 = vrot.lane.b32.xlu0 %v4379_v55, %s3684_s22 }
  0xb1   : > { %v521_v60 = vpop.permute.xlu1 %520 }
  0xb2   : > { %601 = vst.msk [vmem:[#allocation2 + $0x100] sm:$0xff] %vm584_vm3, %v521_v60  ;;  %v519_v0 = vpop.permute.xlu0 %518  ;;  %752 = vrot.lane.b32.xlu2 %v4385_v17, %s3684_s22  ;;  %v696_v60 = vrot.slane %v6878_v32, 2 }
  0xb3   : > { %600 = vst.msk [vmem:[#allocation2 + $0xf0] sm:$0xff] %vm584_vm3, %v519_v0 }
  0xb4   : > { %v541_v63 = vpop.permute.xlu2 %540  ;;  %v4420_v0 = vsel %vm617_vm2, %v694_v6, %v696_v60 }
  0xb5   : > { %611 = vst.msk [vmem:[#allocation2 + $0x1a0] sm:$0xff] %vm584_vm3, %v541_v63 }
  0xb6   : > { %6879 = vst [vmem:[#allocation49_spill] sm:$0xff] %v4420_v0 }
  0xb7   : > { %756 = vrot.lane.b32.xlu1 %v4399_v50, %s3684_s22 }
  0xb8   : > { %754 = vrot.lane.b32.xlu0 %v4402_v49, %s3684_s22 }
  0xb9   : > { %v527_v48 = vpop.permute.xlu1 %526 }
  0xba   : > { %604 = vst.msk [vmem:[#allocation2 + $0x130] sm:$0xff] %vm584_vm3, %v527_v48  ;;  %v525_v25 = vpop.permute.xlu0 %524  ;;  %758 = vrot.lane.b32.xlu2 %v4409_v8, %s3684_s22 }
  0xbb   : > { %603 = vst.msk [vmem:[#allocation2 + $0x120] sm:$0xff] %vm584_vm3, %v525_v25 }
  0xbc   : > { %v547_v37 = vpop.permute.xlu2 %546 }
  0xbd   : > { %614 = vst.msk [vmem:[#allocation2 + $0x1d0] sm:$0xff] %vm584_vm3, %v547_v37 }
  0xbf   : > { %829 = vrot.lane.b32.xlu1 %v3744_v3, %s3685_s23 }
  0xc0   : > { %760 = vrot.lane.b32.xlu0 %v4420_v0, %s3684_s22 }
  0xc1   : > { %v533_v57 = vpop.permute.xlu1 %532 }
  0xc2   : > { %607 = vst.msk [vmem:[#allocation2 + $0x160] sm:$0xff] %vm584_vm3, %v533_v57  ;;  %v531_v62 = vpop.permute.xlu0 %530  ;;  %831 = vrot.lane.b32.xlu2 %v3746_v4, %s3685_s23 }
  0xc3   : > { %606 = vst.msk [vmem:[#allocation2 + $0x150] sm:$0xff] %vm584_vm3, %v531_v62 }
  0xc4   : > { %v699_v63 = vpop.permute.xlu2 %698 }
  0xc5   : > { %795 = vst.msk [vmem:[#allocation2] sm:$0xff] %vm794_vm4, %v699_v63 }
  0xc7   : > { %835 = vrot.lane.b32.xlu1 %v3769_v19, %s3685_s23 }
  0xc8   : > { %833 = vrot.lane.b32.xlu0 %v3767_v18, %s3685_s23 }
  0xc9   : > { %v539_v3 = vpop.permute.xlu1 %538 }
  0xca   : > { %610 = vst.msk [vmem:[#allocation2 + $0x190] sm:$0xff] %vm584_vm3, %v539_v3  ;;  %v537_v6 = vpop.permute.xlu0 %536  ;;  %837 = vrot.lane.b32.xlu2 %v3808_v38, %s3685_s23 }
  0xcb   : > { %609 = vst.msk [vmem:[#allocation2 + $0x180] sm:$0xff] %vm584_vm3, %v537_v6 }
  0xcc   : > { %v705_v4 = vpop.permute.xlu2 %704 }
  0xcd   : > { %798 = vst.msk [vmem:[#allocation2 + $0x30] sm:$0xff] %vm794_vm4, %v705_v4 }
  0xcf   : > { %841 = vrot.lane.b32.xlu1 %v3816_v41, %s3685_s23 }
  0xd0   : > { %839 = vrot.lane.b32.xlu0 %v3803_v34, %s3685_s23 }
  0xd1   : > { %v545_v48 = vpop.permute.xlu1 %544 }
  0xd2   : > { %613 = vst.msk [vmem:[#allocation2 + $0x1c0] sm:$0xff] %vm584_vm3, %v545_v48  ;;  %v543_v32 = vpop.permute.xlu0 %542  ;;  %843 = vrot.lane.b32.xlu2 %v3825_v47, %s3685_s23 }
  0xd3   : > { %612 = vst.msk [vmem:[#allocation2 + $0x1b0] sm:$0xff] %vm584_vm3, %v543_v32 }
  0xd4   : > { %v711_v60 = vpop.permute.xlu2 %710 }
  0xd5   : > { %801 = vst.msk [vmem:[#allocation2 + $0x60] sm:$0xff] %vm794_vm4, %v711_v60 }
  0xd7   : > { %847 = vrot.lane.b32.xlu1 %v3838_v52, %s3685_s23 }
  0xd8   : > { %845 = vrot.lane.b32.xlu0 %v3836_v51, %s3685_s23 }
  0xd9   : > { %v551_v25 = vpop.permute.xlu1 %550 }
  0xda   : > { %616 = vst.msk [vmem:[#allocation2 + $0x1f0] sm:$0xff] %vm584_vm3, %v551_v25  ;;  %v549_v37 = vpop.permute.xlu0 %548  ;;  %849 = vrot.lane.b32.xlu2 %v3879_v13, %s3685_s23 }
  0xdb   : > { %615 = vst.msk [vmem:[#allocation2 + $0x1e0] sm:$0xff] %vm584_vm3, %v549_v37 }
  0xdc   : > { %v717_v57 = vpop.permute.xlu2 %716 }
  0xdd   : > { %804 = vst.msk [vmem:[#allocation2 + $0x90] sm:$0xff] %vm794_vm4, %v717_v57 }
  0xdf   : > { %853 = vrot.lane.b32.xlu1 %v3887_v22, %s3685_s23 }
  0xe0   : > { %851 = vrot.lane.b32.xlu0 %v3872_v5, %s3685_s23 }
  0xe1   : > { %v703_v62 = vpop.permute.xlu1 %702 }
  0xe2   : > { %797 = vst.msk [vmem:[#allocation2 + $0x20] sm:$0xff] %vm794_vm4, %v703_v62  ;;  %v701_v63 = vpop.permute.xlu0 %700  ;;  %855 = vrot.lane.b32.xlu2 %v3897_v31, %s3685_s23 }
  0xe3   : > { %796 = vst.msk [vmem:[#allocation2 + $0x10] sm:$0xff] %vm794_vm4, %v701_v63 }
  0xe4   : > { %v723_v3 = vpop.permute.xlu2 %722 }
  0xe5   : > { %807 = vst.msk [vmem:[#allocation2 + $0xc0] sm:$0xff] %vm794_vm4, %v723_v3 }
  0xe7   : > { %859 = vrot.lane.b32.xlu1 %v3910_v42, %s3685_s23 }
  0xe8   : > { %857 = vrot.lane.b32.xlu0 %v3908_v39, %s3685_s23 }
  0xe9   : > { %v709_v6 = vpop.permute.xlu1 %708 }
  0xea   : > { %800 = vst.msk [vmem:[#allocation2 + $0x50] sm:$0xff] %vm794_vm4, %v709_v6  ;;  %v707_v4 = vpop.permute.xlu0 %706  ;;  %861 = vrot.lane.b32.xlu2 %v3951_v28, %s3685_s23 }
  0xeb   : > { %799 = vst.msk [vmem:[#allocation2 + $0x40] sm:$0xff] %vm794_vm4, %v707_v4  ;;  %v266_v4 = vld [vmem:[%s3739_s20 + $0x180] sm:$0xff] }
  0xec   : > { %v729_v48 = vpop.permute.xlu2 %728 }
  0xed   : > { %810 = vst.msk [vmem:[#allocation2 + $0xf0] sm:$0xff] %vm794_vm4, %v729_v48 }
  0xef   : > { %865 = vrot.lane.b32.xlu1 %v3959_v59, %s3685_s23 }
  0xf0   : > { %863 = vrot.lane.b32.xlu0 %v3944_v23, %s3685_s23 }
  0xf1   : > { %v715_v32 = vpop.permute.xlu1 %714 }
  0xf2   : > { %803 = vst.msk [vmem:[#allocation2 + $0x80] sm:$0xff] %vm794_vm4, %v715_v32  ;;  %v713_v60 = vpop.permute.xlu0 %712  ;;  %867 = vrot.lane.b32.xlu2 %v3969_v10, %s3685_s23 }
  0xf3   : > { %802 = vst.msk [vmem:[#allocation2 + $0x70] sm:$0xff] %vm794_vm4, %v713_v60  ;;  %v4513_v60 = vmax.f32 %v266_v4, 0.0 }
  0xf4   : > { %v735_v25 = vpop.permute.xlu2 %734 }
  0xf5   : > { %813 = vst.msk [vmem:[#allocation2 + $0x120] sm:$0xff] %vm794_vm4, %v735_v25  ;;  %v267_v25 = vld [vmem:[%s3739_s20 + $0x188] sm:$0xff] }
  0xf7   : > { %871 = vrot.lane.b32.xlu1 %v3982_v24, %s3685_s23 }
  0xf8   : > { %869 = vrot.lane.b32.xlu0 %v3980_v58, %s3685_s23 }
  0xf9   : > { %v721_v37 = vpop.permute.xlu1 %720 }
  0xfa   : > { %806 = vst.msk [vmem:[#allocation2 + $0xb0] sm:$0xff] %vm794_vm4, %v721_v37  ;;  %v719_v57 = vpop.permute.xlu0 %718  ;;  %873 = vrot.lane.b32.xlu2 %v4023_v26, %s3685_s23 }
  0xfb   : > { %805 = vst.msk [vmem:[#allocation2 + $0xa0] sm:$0xff] %vm794_vm4, %v719_v57  ;;  %v4517_v57 = vmax.f32 %v267_v25, 0.0  ;;  %v6881_v25 = vld [vmem:[#allocation4_spill] sm:$0xff] }
  0xfc   : > { %v741_v62 = vpop.permute.xlu2 %740 }
  0xfd   : > { %816 = vst.msk [vmem:[#allocation2 + $0x150] sm:$0xff] %vm794_vm4, %v741_v62 }
  0xff   : > { %877 = vrot.lane.b32.xlu1 %v4031_v45, %s3685_s23 }
 0x100   : > { %875 = vrot.lane.b32.xlu0 %v4016_v36, %s3685_s23 }
 0x101   : > { %v727_v63 = vpop.permute.xlu1 %726 }
 0x102   : > { %809 = vst.msk [vmem:[#allocation2 + $0xe0] sm:$0xff] %vm794_vm4, %v727_v63  ;;  %v725_v3 = vpop.permute.xlu0 %724  ;;  %879 = vrot.lane.b32.xlu2 %v4041_v16, %s3685_s23 }
 0x103   : > { %808 = vst.msk [vmem:[#allocation2 + $0xd0] sm:$0xff] %vm794_vm4, %v725_v3 }
 0x104   : > { %v747_v6 = vpop.permute.xlu2 %746 }
 0x105   : > { %819 = vst.msk [vmem:[#allocation2 + $0x180] sm:$0xff] %vm794_vm4, %v747_v6 }
 0x107   : > { %883 = vrot.lane.b32.xlu1 %v4054_v14, %s3685_s23 }
 0x108   : > { %881 = vrot.lane.b32.xlu0 %v4052_v56, %s3685_s23 }
 0x109   : > { %v733_v48 = vpop.permute.xlu1 %732 }
 0x10a   : > { %812 = vst.msk [vmem:[#allocation2 + $0x110] sm:$0xff] %vm794_vm4, %v733_v48  ;;  %v731_v32 = vpop.permute.xlu0 %730  ;;  %885 = vrot.lane.b32.xlu2 %v4094_v1, %s3685_s23 }
 0x10b   : > { %811 = vst.msk [vmem:[#allocation2 + $0x100] sm:$0xff] %vm794_vm4, %v731_v32 }
 0x10c   : > { %v753_v37 = vpop.permute.xlu2 %752 }
 0x10d   : > { %822 = vst.msk [vmem:[#allocation2 + $0x1b0] sm:$0xff] %vm794_vm4, %v753_v37 }
 0x10f   : > { %889 = vrot.lane.b32.xlu1 %v4513_v60, %s3685_s23 }
 0x110   : > { %887 = vrot.lane.b32.xlu0 %v4088_v46, %s3685_s23 }
 0x111   : > { %v739_v62 = vpop.permute.xlu1 %738 }
 0x112   : > { %815 = vst.msk [vmem:[#allocation2 + $0x140] sm:$0xff] %vm794_vm4, %v739_v62  ;;  %v737_v63 = vpop.permute.xlu0 %736  ;;  %891 = vrot.lane.b32.xlu2 %v4517_v57, %s3685_s23  ;;  %v6882_v62 = vld [vmem:[#allocation7_spill] sm:$0xff] }
 0x113   : > { %814 = vst.msk [vmem:[#allocation2 + $0x130] sm:$0xff] %vm794_vm4, %v737_v63  ;;  %v6883_v63 = vld [vmem:[#allocation5_spill] sm:$0xff] }
 0x114   : > { %v759_v3 = vpop.permute.xlu2 %758 }
 0x115   : > { %825 = vst.msk [vmem:[#allocation2 + $0x1e0] sm:$0xff] %vm794_vm4, %v759_v3 }
 0x117   : > { %966 = vrot.lane.b32.xlu1 %v3801_v33, %s3686_s24  ;;  %v6880_v33 = vld [vmem:[#allocation3_spill] sm:$0xff] }
 0x118   : > { %964 = vrot.lane.b32.xlu0 %v3772_v20, %s3686_s24 }
 0x119   : > { %v745_v6 = vpop.permute.xlu1 %744 }
 0x11a   : > { %818 = vst.msk [vmem:[#allocation2 + $0x170] sm:$0xff] %vm794_vm4, %v745_v6  ;;  %v743_v4 = vpop.permute.xlu0 %742  ;;  %968 = vrot.lane.b32.xlu2 %v3788_v27, %s3686_s24 }
 0x11b   : > { %817 = vst.msk [vmem:[#allocation2 + $0x160] sm:$0xff] %vm794_vm4, %v743_v4  ;;  %v6884_v4 = vld [vmem:[#allocation6_spill] sm:$0xff] }
 0x11c   : > { %v832_v48 = vpop.permute.xlu2 %831 }
 0x11d   : > { %927 = vst.msk [vmem:[#allocation2 + $0x10] sm:$0xff] %vm925_vm5, %v832_v48 }
 0x11f   : > { %972 = vrot.lane.b32.xlu1 %v3844_v54, %s3686_s24 }
 0x120   : > { %970 = vrot.lane.b32.xlu0 %v6880_v33, %s3686_s24 }
 0x121   : > { %v751_v20 = vpop.permute.xlu1 %750 }
 0x122   : > { %821 = vst.msk [vmem:[#allocation2 + $0x1a0] sm:$0xff] %vm794_vm4, %v751_v20  ;;  %v749_v32 = vpop.permute.xlu0 %748  ;;  %974 = vrot.lane.b32.xlu2 %v6881_v25, %s3686_s24  ;;  %v6885_v20 = vld [vmem:[#allocation10_spill] sm:$0xff] }
 0x123   : > { %820 = vst.msk [vmem:[#allocation2 + $0x190] sm:$0xff] %vm794_vm4, %v749_v32  ;;  %v6886_v32 = vld [vmem:[#allocation8_spill] sm:$0xff] }
 0x124   : > { %v838_v37 = vpop.permute.xlu2 %837 }
 0x125   : > { %930 = vst.msk [vmem:[#allocation2 + $0x40] sm:$0xff] %vm925_vm5, %v838_v37 }
 0x127   : > { %978 = vrot.lane.b32.xlu1 %v6882_v62, %s3686_s24 }
 0x128   : > { %976 = vrot.lane.b32.xlu0 %v6883_v63, %s3686_s24 }
 0x129   : > { %v757_v3 = vpop.permute.xlu1 %756 }
 0x12a   : > { %824 = vst.msk [vmem:[#allocation2 + $0x1d0] sm:$0xff] %vm794_vm4, %v757_v3  ;;  %v755_v6 = vpop.permute.xlu0 %754  ;;  %980 = vrot.lane.b32.xlu2 %v6884_v4, %s3686_s24  ;;  %v6887_v3 = vld [vmem:[#allocation9_spill] sm:$0xff] }
 0x12b   : > { %823 = vst.msk [vmem:[#allocation2 + $0x1c0] sm:$0xff] %vm794_vm4, %v755_v6  ;;  %v6888_v6 = vld [vmem:[#allocation13_spill] sm:$0xff] }
 0x12c   : > { %v844_v48 = vpop.permute.xlu2 %843 }
 0x12d   : > { %933 = vst.msk [vmem:[#allocation2 + $0x70] sm:$0xff] %vm925_vm5, %v844_v48  ;;  %v6889_v48 = vld [vmem:[#allocation11_spill] sm:$0xff] }
 0x12f   : > { %984 = vrot.lane.b32.xlu1 %v6885_v20, %s3686_s24 }
 0x130   : > { %982 = vrot.lane.b32.xlu0 %v6886_v32, %s3686_s24 }
 0x131   : > { %v830_v37 = vpop.permute.xlu1 %829 }
 0x132   : > { %926 = vst.msk [vmem:[#allocation2] sm:$0xff] %vm925_vm5, %v830_v37  ;;  %v761_v62 = vpop.permute.xlu0 %760  ;;  %986 = vrot.lane.b32.xlu2 %v6887_v3, %s3686_s24  ;;  %v6890_v37 = vld [vmem:[#allocation12_spill] sm:$0xff] }
 0x133   : > { %826 = vst.msk [vmem:[#allocation2 + $0x1f0] sm:$0xff] %vm794_vm4, %v761_v62  ;;  %v6891_v62 = vld [vmem:[#allocation16_spill] sm:$0xff]  ;;  %vm3150_vm4 = vcmask 130048  }
 0x134   : > { %v850_v4 = vpop.permute.xlu2 %849 }
 0x135   : > { %936 = vst.msk [vmem:[#allocation2 + $0xa0] sm:$0xff] %vm925_vm5, %v850_v4  ;;  %v6892_v4 = vld [vmem:[#allocation14_spill] sm:$0xff] }
 0x137   : > { %990 = vrot.lane.b32.xlu1 %v6888_v6, %s3686_s24 }
 0x138   : > { %988 = vrot.lane.b32.xlu0 %v6889_v48, %s3686_s24 }
 0x139   : > { %v836_v20 = vpop.permute.xlu1 %835 }
 0x13a   : > { %929 = vst.msk [vmem:[#allocation2 + $0x30] sm:$0xff] %vm925_vm5, %v836_v20  ;;  %v834_v32 = vpop.permute.xlu0 %833  ;;  %992 = vrot.lane.b32.xlu2 %v6890_v37, %s3686_s24  ;;  %v6893_v20 = vld [vmem:[#allocation15_spill] sm:$0xff] }
 0x13b   : > { %928 = vst.msk [vmem:[#allocation2 + $0x20] sm:$0xff] %vm925_vm5, %v834_v32  ;;  %v6894_v32 = vld [vmem:[#allocation19_spill] sm:$0xff] }
 0x13c   : > { %v856_v3 = vpop.permute.xlu2 %855 }
 0x13d   : > { %939 = vst.msk [vmem:[#allocation2 + $0xd0] sm:$0xff] %vm925_vm5, %v856_v3  ;;  %v6895_v3 = vld [vmem:[#allocation17_spill] sm:$0xff] }
 0x13f   : > { %996 = vrot.lane.b32.xlu1 %v6891_v62, %s3686_s24 }
 0x140   : > { %994 = vrot.lane.b32.xlu0 %v6892_v4, %s3686_s24 }
 0x141   : > { %v842_v6 = vpop.permute.xlu1 %841 }
 0x142   : > { %932 = vst.msk [vmem:[#allocation2 + $0x60] sm:$0xff] %vm925_vm5, %v842_v6  ;;  %v840_v48 = vpop.permute.xlu0 %839  ;;  %998 = vrot.lane.b32.xlu2 %v6893_v20, %s3686_s24  ;;  %v6896_v6 = vld [vmem:[#allocation18_spill] sm:$0xff] }
 0x143   : > { %931 = vst.msk [vmem:[#allocation2 + $0x50] sm:$0xff] %vm925_vm5, %v840_v48 }
 0x144   : > { %v862_v37 = vpop.permute.xlu2 %861 }
 0x145   : > { %942 = vst.msk [vmem:[#allocation2 + $0x100] sm:$0xff] %vm925_vm5, %v862_v37  ;;  %v6897_v37 = vld [vmem:[#allocation22_spill] sm:$0xff] }
 0x147   : > { %1002 = vrot.lane.b32.xlu1 %v6894_v32, %s3686_s24  ;;  %v6898_v32 = vld [vmem:[#allocation20_spill] sm:$0xff] }
 0x148   : > { %1000 = vrot.lane.b32.xlu0 %v6895_v3, %s3686_s24  ;;  %v6899_v3 = vld [vmem:[#allocation21_spill] sm:$0xff] }
 0x149   : > { %v848_v62 = vpop.permute.xlu1 %847 }
 0x14a   : > { %935 = vst.msk [vmem:[#allocation2 + $0x90] sm:$0xff] %vm925_vm5, %v848_v62  ;;  %v846_v4 = vpop.permute.xlu0 %845  ;;  %1004 = vrot.lane.b32.xlu2 %v6896_v6, %s3686_s24 }
 0x14b   : > { %934 = vst.msk [vmem:[#allocation2 + $0x80] sm:$0xff] %vm925_vm5, %v846_v4  ;;  %v6900_v4 = vld [vmem:[#allocation23_spill] sm:$0xff] }
 0x14c   : > { %v868_v48 = vpop.permute.xlu2 %867 }
 0x14d   : > { %945 = vst.msk [vmem:[#allocation2 + $0x130] sm:$0xff] %vm925_vm5, %v868_v48 }
 0x14f   : > { %1008 = vrot.lane.b32.xlu1 %v6897_v37, %s3686_s24  ;;  %v4605_v37 = vld [vmem:[%s3739_s20 + $0x190] sm:$0x3] }
 0x150   : > { %1006 = vrot.lane.b32.xlu0 %v6898_v32, %s3686_s24 }
 0x151   : > { %v854_v20 = vpop.permute.xlu1 %853 }
 0x152   : > { %938 = vst.msk [vmem:[#allocation2 + $0xc0] sm:$0xff] %vm925_vm5, %v854_v20  ;;  %v852_v62 = vpop.permute.xlu0 %851  ;;  %1010 = vrot.lane.b32.xlu2 %v6899_v3, %s3686_s24 }
 0x153   : > { %937 = vst.msk [vmem:[#allocation2 + $0xb0] sm:$0xff] %vm925_vm5, %v852_v62  ;;  %v6743_v62 = vmax.f32 %v4605_v37, 0.0 }
 0x154   : > { %v874_v6 = vpop.permute.xlu2 %873 }
 0x155   : > { %948 = vst.msk [vmem:[#allocation2 + $0x160] sm:$0xff] %vm925_vm5, %v874_v6 }
 0x157   : > { %1014 = vrot.lane.b32.xlu1 %v4092_v40, %s3686_s24  ;;  %v960_v40 = vrot.slane %v4517_v57, 1 }
 0x158   : > { %1012 = vrot.lane.b32.xlu0 %v6900_v4, %s3686_s24 }
 0x159   : > { %v860_v48 = vpop.permute.xlu1 %859 }
 0x15a   : > { %941 = vst.msk [vmem:[#allocation2 + $0xf0] sm:$0xff] %vm925_vm5, %v860_v48  ;;  %v858_v20 = vpop.permute.xlu0 %857  ;;  %1016 = vrot.lane.b32.xlu2 %v4086_v12, %s3686_s24  ;;  %v962_v48 = vrot.slane %v6743_v62, 1  ;;  %v959_v12 = vrot.slane %v4513_v60, 1 }
 0x15b   : > { %940 = vst.msk [vmem:[#allocation2 + $0xe0] sm:$0xff] %vm925_vm5, %v858_v20 }
 0x15c   : > { %v880_v6 = vpop.permute.xlu2 %879 }
 0x15d   : > { %951 = vst.msk [vmem:[#allocation2 + $0x190] sm:$0xff] %vm925_vm5, %v880_v6  ;;  %v4626_v6 = vsel %vm407_vm0, %v960_v40, %v962_v48 }
 0x15f   : > { %1020 = vrot.lane.b32.xlu1 %v4122_v61, %s3686_s24 }
 0x160   : > { %1018 = vrot.lane.b32.xlu0 %v4099_v30, %s3686_s24  ;;  %v4629_v30 = vsel %vm407_vm0, %v959_v12, %v960_v40  ;;  %v6901_v12 = vld [vmem:[#allocation28_spill] sm:$0xff] }
 0x161   : > { %v866_v3 = vpop.permute.xlu1 %865 }
 0x162   : > { %944 = vst.msk [vmem:[#allocation2 + $0x120] sm:$0xff] %vm925_vm5, %v866_v3  ;;  %v864_v20 = vpop.permute.xlu0 %863  ;;  %1022 = vrot.lane.b32.xlu2 %v4117_v15, %s3686_s24 }
 0x163   : > { %943 = vst.msk [vmem:[#allocation2 + $0x110] sm:$0xff] %vm925_vm5, %v864_v20  ;;  %v6902_v20 = vld [vmem:[#allocation29_spill] sm:$0xff] }
 0x164   : > { %v886_v61 = vpop.permute.xlu2 %885 }
 0x165   : > { %954 = vst.msk [vmem:[#allocation2 + $0x1c0] sm:$0xff] %vm925_vm5, %v886_v61 }
 0x167   : > { %1026 = vrot.lane.b32.xlu1 %v4626_v6, %s3686_s24 }
 0x168   : > { %1024 = vrot.lane.b32.xlu0 %v4629_v30, %s3686_s24 }
 0x169   : > { %v872_v3 = vpop.permute.xlu1 %871 }
 0x16a   : > { %947 = vst.msk [vmem:[#allocation2 + $0x150] sm:$0xff] %vm925_vm5, %v872_v3  ;;  %v870_v62 = vpop.permute.xlu0 %869  ;;  %1098 = vrot.lane.b32.xlu2 %v4152_v11, %s3687_s25  ;;  %v6904_v3 = vld [vmem:[#allocation30_spill] sm:$0xff] }
 0x16b   : > { %946 = vst.msk [vmem:[#allocation2 + $0x140] sm:$0xff] %vm925_vm5, %v870_v62  ;;  %v6903_v62 = vld [vmem:[#allocation32_spill] sm:$0xff] }
 0x16c   : > { %v892_v40 = vpop.permute.xlu2 %891 }
 0x16d   : > { %957 = vst.msk [vmem:[#allocation2 + $0x1f0] sm:$0xff] %vm925_vm5, %v892_v40 }
 0x16f   : > { %1102 = vrot.lane.b32.xlu1 %v4190_v44, %s3687_s25 }
 0x170   : > { %1100 = vrot.lane.b32.xlu0 %v6901_v12, %s3687_s25 }
 0x171   : > { %v878_v61 = vpop.permute.xlu1 %877 }
 0x172   : > { %950 = vst.msk [vmem:[#allocation2 + $0x180] sm:$0xff] %vm925_vm5, %v878_v61  ;;  %v876_v48 = vpop.permute.xlu0 %875  ;;  %1104 = vrot.lane.b32.xlu2 %v6902_v20, %s3687_s25  ;;  %v6905_v61 = vld [vmem:[#allocation31_spill] sm:$0xff] }
 0x173   : > { %949 = vst.msk [vmem:[#allocation2 + $0x170] sm:$0xff] %vm925_vm5, %v876_v48 }
 0x174   : > { %v969_v11 = vpop.permute.xlu2 %968 }
 0x175   : > { %1063 = vst.msk [vmem:[#allocation2 + $0x20] sm:$0xff] %vm1060_vm6, %v969_v11  ;;  %v6906_v11 = vld [vmem:[#allocation35_spill] sm:$0xff] }
 0x177   : > { %1108 = vrot.lane.b32.xlu1 %v6903_v62, %s3687_s25  ;;  %v6907_v62 = vld [vmem:[#allocation33_spill] sm:$0xff] }
 0x178   : > { %1106 = vrot.lane.b32.xlu0 %v6904_v3, %s3687_s25 }
 0x179   : > { %v884_v40 = vpop.permute.xlu1 %883 }
 0x17a   : > { %953 = vst.msk [vmem:[#allocation2 + $0x1b0] sm:$0xff] %vm925_vm5, %v884_v40  ;;  %v882_v12 = vpop.permute.xlu0 %881  ;;  %1110 = vrot.lane.b32.xlu2 %v6905_v61, %s3687_s25  ;;  %v6908_v40 = vld [vmem:[#allocation34_spill] sm:$0xff] }
 0x17b   : > { %952 = vst.msk [vmem:[#allocation2 + $0x1a0] sm:$0xff] %vm925_vm5, %v882_v12 }
 0x17c   : > { %v975_v48 = vpop.permute.xlu2 %974 }
 0x17d   : > { %1066 = vst.msk [vmem:[#allocation2 + $0x50] sm:$0xff] %vm1060_vm6, %v975_v48 }
 0x17f   : > { %1114 = vrot.lane.b32.xlu1 %v6906_v11, %s3687_s25 }
 0x180   : > { %1112 = vrot.lane.b32.xlu0 %v6907_v62, %s3687_s25 }
 0x181   : > { %v890_v20 = vpop.permute.xlu1 %889 }
 0x182   : > { %956 = vst.msk [vmem:[#allocation2 + $0x1e0] sm:$0xff] %vm925_vm5, %v890_v20  ;;  %v888_v3 = vpop.permute.xlu0 %887  ;;  %1116 = vrot.lane.b32.xlu2 %v6908_v40, %s3687_s25 }
 0x183   : > { %955 = vst.msk [vmem:[#allocation2 + $0x1d0] sm:$0xff] %vm925_vm5, %v888_v3  ;;  %v6909_v3 = vld [vmem:[#allocation40_spill] sm:$0xff]  ;;  %vm2697_vm5 = vcmask 982912  }
 0x184   : > { %v981_v61 = vpop.permute.xlu2 %980 }
 0x185   : > { %1069 = vst.msk [vmem:[#allocation2 + $0x80] sm:$0xff] %vm1060_vm6, %v981_v61  ;;  %v6910_v61 = vld [vmem:[#allocation38_spill] sm:$0xff] }
 0x187   : > { %1120 = vrot.lane.b32.xlu1 %v4283_v7, %s3687_s25 }
 0x188   : > { %1118 = vrot.lane.b32.xlu0 %v4265_v29, %s3687_s25 }
 0x189   : > { %v967_v12 = vpop.permute.xlu1 %966 }
 0x18a   : > { %1062 = vst.msk [vmem:[#allocation2 + $0x10] sm:$0xff] %vm1060_vm6, %v967_v12  ;;  %v965_v48 = vpop.permute.xlu0 %964  ;;  %1122 = vrot.lane.b32.xlu2 %v4280_v9, %s3687_s25  ;;  %v6911_v12 = vld [vmem:[#allocation39_spill] sm:$0xff] }
 0x18b   : > { %1061 = vst.msk [vmem:[#allocation2] sm:$0xff] %vm1060_vm6, %v965_v48 }
 0x18c   : > { %v987_v20 = vpop.permute.xlu2 %986 }
 0x18d   : > { %1072 = vst.msk [vmem:[#allocation2 + $0xb0] sm:$0xff] %vm1060_vm6, %v987_v20 }
 0x18f   : > { %1126 = vrot.lane.b32.xlu1 %v6909_v3, %s3687_s25 }
 0x190   : > { %1124 = vrot.lane.b32.xlu0 %v6910_v61, %s3687_s25 }
 0x191   : > { %v973_v7 = vpop.permute.xlu1 %972 }
 0x192   : > { %1065 = vst.msk [vmem:[#allocation2 + $0x40] sm:$0xff] %vm1060_vm6, %v973_v7  ;;  %v971_v40 = vpop.permute.xlu0 %970  ;;  %1128 = vrot.lane.b32.xlu2 %v6911_v12, %s3687_s25 }
 0x193   : > { %1064 = vst.msk [vmem:[#allocation2 + $0x30] sm:$0xff] %vm1060_vm6, %v971_v40  ;;  %v6913_v40 = vld [vmem:[#allocation43_spill] sm:$0xff] }
 0x194   : > { %v993_v9 = vpop.permute.xlu2 %992 }
 0x195   : > { %1075 = vst.msk [vmem:[#allocation2 + $0xe0] sm:$0xff] %vm1060_vm6, %v993_v9  ;;  %v6912_v9 = vld [vmem:[#allocation45_spill] sm:$0xff] }
 0x197   : > { %1132 = vrot.lane.b32.xlu1 %v4331_v43, %s3687_s25 }
 0x198   : > { %1130 = vrot.lane.b32.xlu0 %v4313_v35, %s3687_s25 }
 0x199   : > { %v979_v48 = vpop.permute.xlu1 %978 }
 0x19a   : > { %1068 = vst.msk [vmem:[#allocation2 + $0x70] sm:$0xff] %vm1060_vm6, %v979_v48  ;;  %v977_v20 = vpop.permute.xlu0 %976  ;;  %1134 = vrot.lane.b32.xlu2 %v4328_v2, %s3687_s25  ;;  %v6914_v48 = vld [vmem:[#allocation44_spill] sm:$0xff] }
 0x19b   : > { %1067 = vst.msk [vmem:[#allocation2 + $0x60] sm:$0xff] %vm1060_vm6, %v977_v20 }
 0x19c   : > { %v999_v7 = vpop.permute.xlu2 %998 }
 0x19d   : > { %1078 = vst.msk [vmem:[#allocation2 + $0x110] sm:$0xff] %vm1060_vm6, %v999_v7 }
 0x19f   : > { %1138 = vrot.lane.b32.xlu1 %v6912_v9, %s3687_s25 }
 0x1a0   : > { %1136 = vrot.lane.b32.xlu0 %v6913_v40, %s3687_s25 }
 0x1a1   : > { %v985_v43 = vpop.permute.xlu1 %984 }
 0x1a2   : > { %1071 = vst.msk [vmem:[#allocation2 + $0xa0] sm:$0xff] %vm1060_vm6, %v985_v43  ;;  %v983_v12 = vpop.permute.xlu0 %982  ;;  %1140 = vrot.lane.b32.xlu2 %v6914_v48, %s3687_s25 }
 0x1a3   : > { %1070 = vst.msk [vmem:[#allocation2 + $0x90] sm:$0xff] %vm1060_vm6, %v983_v12 }
 0x1a4   : > { %v1005_v2 = vpop.permute.xlu2 %1004 }
 0x1a5   : > { %1081 = vst.msk [vmem:[#allocation2 + $0x140] sm:$0xff] %vm1060_vm6, %v1005_v2 }
 0x1a7   : > { %1144 = vrot.lane.b32.xlu1 %v4379_v55, %s3687_s25 }
 0x1a8   : > { %1142 = vrot.lane.b32.xlu0 %v4361_v21, %s3687_s25 }
 0x1a9   : > { %v991_v20 = vpop.permute.xlu1 %990 }
 0x1aa   : > { %1074 = vst.msk [vmem:[#allocation2 + $0xd0] sm:$0xff] %vm1060_vm6, %v991_v20  ;;  %v989_v7 = vpop.permute.xlu0 %988  ;;  %1146 = vrot.lane.b32.xlu2 %v4376_v53, %s3687_s25  ;;  %v1093_v20 = vrot.slane %v4513_v60, 2 }
 0x1ab   : > { %1073 = vst.msk [vmem:[#allocation2 + $0xc0] sm:$0xff] %vm1060_vm6, %v989_v7 }
 0x1ac   : > { %v1011_v43 = vpop.permute.xlu2 %1010 }
 0x1ad   : > { %1084 = vst.msk [vmem:[#allocation2 + $0x170] sm:$0xff] %vm1060_vm6, %v1011_v43  ;;  %v1094_v43 = vrot.slane %v4517_v57, 2 }
 0x1af   : > { %1150 = vrot.lane.b32.xlu1 %v4402_v49, %s3687_s25  ;;  %v4727_v49 = vsel %vm617_vm2, %v1093_v20, %v1094_v43 }
 0x1b0   : > { %1148 = vrot.lane.b32.xlu0 %v4385_v17, %s3687_s25 }
 0x1b1   : > { %v997_v2 = vpop.permute.xlu1 %996 }
 0x1b2   : > { %1077 = vst.msk [vmem:[#allocation2 + $0x100] sm:$0xff] %vm1060_vm6, %v997_v2  ;;  %v995_v12 = vpop.permute.xlu0 %994  ;;  %1152 = vrot.lane.b32.xlu2 %v4399_v50, %s3687_s25  ;;  %v6915_v50 = vmax.f32 %v4605_v37, 0.0 }
 0x1b3   : > { %1076 = vst.msk [vmem:[#allocation2 + $0xf0] sm:$0xff] %vm1060_vm6, %v995_v12 }
 0x1b4   : > { %v1017_v7 = vpop.permute.xlu2 %1016  ;;  %v1096_v12 = vrot.slane %v6915_v50, 2 }
 0x1b5   : > { %1087 = vst.msk [vmem:[#allocation2 + $0x1a0] sm:$0xff] %vm1060_vm6, %v1017_v7 }
 0x1b7   : > { %1156 = vrot.lane.b32.xlu1 %v4420_v0, %s3687_s25  ;;  %v4738_v0 = vsel %vm617_vm2, %v1094_v43, %v1096_v12 }
 0x1b8   : > { %1154 = vrot.lane.b32.xlu0 %v4409_v8, %s3687_s25 }
 0x1b9   : > { %v1003_v2 = vpop.permute.xlu1 %1002 }
 0x1ba   : > { %1080 = vst.msk [vmem:[#allocation2 + $0x130] sm:$0xff] %vm1060_vm6, %v1003_v2  ;;  %v1001_v53 = vpop.permute.xlu0 %1000  ;;  %1158 = vrot.lane.b32.xlu2 %v4727_v49, %s3687_s25  ;;  %v270_v2 = vld [vmem:[%s3739_s20 + $0x1a0] sm:$0xff] }
 0x1bb   : > { %1079 = vst.msk [vmem:[#allocation2 + $0x120] sm:$0xff] %vm1060_vm6, %v1001_v53 }
 0x1bc   : > { %v1023_v7 = vpop.permute.xlu2 %1022 }
 0x1bd   : > { %1090 = vst.msk [vmem:[#allocation2 + $0x1d0] sm:$0xff] %vm1060_vm6, %v1023_v7 }
 0x1bf   : > { %1229 = vrot.lane.b32.xlu1 %v3767_v18, %s3688_s26 }
 0x1c0   : > { %1160 = vrot.lane.b32.xlu0 %v4738_v0, %s3687_s25 }
 0x1c1   : > { %v1009_v50 = vpop.permute.xlu1 %1008 }
 0x1c2   : > { %1083 = vst.msk [vmem:[#allocation2 + $0x160] sm:$0xff] %vm1060_vm6, %v1009_v50  ;;  %v1007_v37 = vpop.permute.xlu0 %1006  ;;  %1231 = vrot.lane.b32.xlu2 %v3769_v19, %s3688_s26 }
 0x1c3   : > { %1082 = vst.msk [vmem:[#allocation2 + $0x150] sm:$0xff] %vm1060_vm6, %v1007_v37 }
 0x1c4   : > { %v1099_v53 = vpop.permute.xlu2 %1098 }
 0x1c5   : > { %1195 = vst.msk [vmem:[#allocation2] sm:$0xff] %vm1194_vm7, %v1099_v53  ;;  %v6916_v53 = vld [vmem:[#allocation7_spill] sm:$0xff] }
 0x1c7   : > { %1235 = vrot.lane.b32.xlu1 %v3803_v34, %s3688_s26 }
 0x1c8   : > { %1233 = vrot.lane.b32.xlu0 %v3808_v38, %s3688_s26 }
 0x1c9   : > { %v1015_v18 = vpop.permute.xlu1 %1014 }
 0x1ca   : > { %1086 = vst.msk [vmem:[#allocation2 + $0x190] sm:$0xff] %vm1060_vm6, %v1015_v18  ;;  %v1013_v20 = vpop.permute.xlu0 %1012  ;;  %1237 = vrot.lane.b32.xlu2 %v3816_v41, %s3688_s26  ;;  %v6917_v18 = vld [vmem:[#allocation8_spill] sm:$0xff] }
 0x1cb   : > { %1085 = vst.msk [vmem:[#allocation2 + $0x180] sm:$0xff] %vm1060_vm6, %v1013_v20 }
 0x1cc   : > { %v1105_v19 = vpop.permute.xlu2 %1104 }
 0x1cd   : > { %1198 = vst.msk [vmem:[#allocation2 + $0x30] sm:$0xff] %vm1194_vm7, %v1105_v19  ;;  %v6919_v19 = vld [vmem:[#allocation10_spill] sm:$0xff] }
 0x1cf   : > { %1241 = vrot.lane.b32.xlu1 %v3836_v51, %s3688_s26 }
 0x1d0   : > { %1239 = vrot.lane.b32.xlu0 %v3825_v47, %s3688_s26 }
 0x1d1   : > { %v1021_v34 = vpop.permute.xlu1 %1020 }
 0x1d2   : > { %1089 = vst.msk [vmem:[#allocation2 + $0x1c0] sm:$0xff] %vm1060_vm6, %v1021_v34  ;;  %v1019_v38 = vpop.permute.xlu0 %1018  ;;  %1243 = vrot.lane.b32.xlu2 %v3838_v52, %s3688_s26 }
 0x1d3   : > { %1088 = vst.msk [vmem:[#allocation2 + $0x1b0] sm:$0xff] %vm1060_vm6, %v1019_v38  ;;  %v6920_v38 = vld [vmem:[#allocation11_spill] sm:$0xff] }
 0x1d4   : > { %v1111_v41 = vpop.permute.xlu2 %1110 }
 0x1d5   : > { %1201 = vst.msk [vmem:[#allocation2 + $0x60] sm:$0xff] %vm1194_vm7, %v1111_v41  ;;  %v6921_v41 = vld [vmem:[#allocation9_spill] sm:$0xff] }
 0x1d7   : > { %1247 = vrot.lane.b32.xlu1 %v3872_v5, %s3688_s26 }
 0x1d8   : > { %1245 = vrot.lane.b32.xlu0 %v3879_v13, %s3688_s26 }
 0x1d9   : > { %v1027_v51 = vpop.permute.xlu1 %1026 }
 0x1da   : > { %1092 = vst.msk [vmem:[#allocation2 + $0x1f0] sm:$0xff] %vm1060_vm6, %v1027_v51  ;;  %v1025_v47 = vpop.permute.xlu0 %1024  ;;  %1249 = vrot.lane.b32.xlu2 %v3887_v22, %s3688_s26 }
 0x1db   : > { %1091 = vst.msk [vmem:[#allocation2 + $0x1e0] sm:$0xff] %vm1060_vm6, %v1025_v47  ;;  %vm2828_vm6 = vcmask 1048512  }
 0x1dc   : > { %v1117_v52 = vpop.permute.xlu2 %1116 }
 0x1dd   : > { %1204 = vst.msk [vmem:[#allocation2 + $0x90] sm:$0xff] %vm1194_vm7, %v1117_v52  ;;  %v6922_v52 = vld [vmem:[#allocation13_spill] sm:$0xff] }
 0x1df   : > { %1253 = vrot.lane.b32.xlu1 %v3908_v39, %s3688_s26 }
 0x1e0   : > { %1251 = vrot.lane.b32.xlu0 %v3897_v31, %s3688_s26 }
 0x1e1   : > { %v1103_v5 = vpop.permute.xlu1 %1102 }
 0x1e2   : > { %1197 = vst.msk [vmem:[#allocation2 + $0x20] sm:$0xff] %vm1194_vm7, %v1103_v5  ;;  %v1101_v13 = vpop.permute.xlu0 %1100  ;;  %1255 = vrot.lane.b32.xlu2 %v3910_v42, %s3688_s26 }
 0x1e3   : > { %1196 = vst.msk [vmem:[#allocation2 + $0x10] sm:$0xff] %vm1194_vm7, %v1101_v13  ;;  %v6923_v13 = vld [vmem:[#allocation14_spill] sm:$0xff] }
 0x1e4   : > { %v1123_v22 = vpop.permute.xlu2 %1122 }
 0x1e5   : > { %1207 = vst.msk [vmem:[#allocation2 + $0xc0] sm:$0xff] %vm1194_vm7, %v1123_v22  ;;  %v6924_v22 = vld [vmem:[#allocation12_spill] sm:$0xff] }
 0x1e7   : > { %1259 = vrot.lane.b32.xlu1 %v3944_v23, %s3688_s26 }
 0x1e8   : > { %1257 = vrot.lane.b32.xlu0 %v3951_v28, %s3688_s26 }
 0x1e9   : > { %v1109_v39 = vpop.permute.xlu1 %1108 }
 0x1ea   : > { %1200 = vst.msk [vmem:[#allocation2 + $0x50] sm:$0xff] %vm1194_vm7, %v1109_v39  ;;  %v1107_v31 = vpop.permute.xlu0 %1106  ;;  %1261 = vrot.lane.b32.xlu2 %v3959_v59, %s3688_s26 }
 0x1eb   : > { %1199 = vst.msk [vmem:[#allocation2 + $0x40] sm:$0xff] %vm1194_vm7, %v1107_v31 }
 0x1ec   : > { %v1129_v42 = vpop.permute.xlu2 %1128 }
 0x1ed   : > { %1210 = vst.msk [vmem:[#allocation2 + $0xf0] sm:$0xff] %vm1194_vm7, %v1129_v42  ;;  %v6925_v42 = vld [vmem:[#allocation16_spill] sm:$0xff] }
 0x1ef   : > { %1265 = vrot.lane.b32.xlu1 %v3980_v58, %s3688_s26 }
 0x1f0   : > { %1263 = vrot.lane.b32.xlu0 %v3969_v10, %s3688_s26 }
 0x1f1   : > { %v1115_v23 = vpop.permute.xlu1 %1114 }
 0x1f2   : > { %1203 = vst.msk [vmem:[#allocation2 + $0x80] sm:$0xff] %vm1194_vm7, %v1115_v23  ;;  %v1113_v28 = vpop.permute.xlu0 %1112  ;;  %1267 = vrot.lane.b32.xlu2 %v3982_v24, %s3688_s26 }
 0x1f3   : > { %1202 = vst.msk [vmem:[#allocation2 + $0x70] sm:$0xff] %vm1194_vm7, %v1113_v28  ;;  %v6926_v28 = vld [vmem:[#allocation17_spill] sm:$0xff] }
 0x1f4   : > { %v1135_v59 = vpop.permute.xlu2 %1134 }
 0x1f5   : > { %1213 = vst.msk [vmem:[#allocation2 + $0x120] sm:$0xff] %vm1194_vm7, %v1135_v59  ;;  %v6927_v59 = vld [vmem:[#allocation15_spill] sm:$0xff] }
 0x1f7   : > { %1271 = vrot.lane.b32.xlu1 %v4016_v36, %s3688_s26 }
 0x1f8   : > { %1269 = vrot.lane.b32.xlu0 %v4023_v26, %s3688_s26 }
 0x1f9   : > { %v1121_v58 = vpop.permute.xlu1 %1120 }
 0x1fa   : > { %1206 = vst.msk [vmem:[#allocation2 + $0xb0] sm:$0xff] %vm1194_vm7, %v1121_v58  ;;  %v1119_v10 = vpop.permute.xlu0 %1118  ;;  %1273 = vrot.lane.b32.xlu2 %v4031_v45, %s3688_s26 }
 0x1fb   : > { %1205 = vst.msk [vmem:[#allocation2 + $0xa0] sm:$0xff] %vm1194_vm7, %v1119_v10 }
 0x1fc   : > { %v1141_v24 = vpop.permute.xlu2 %1140 }
 0x1fd   : > { %1216 = vst.msk [vmem:[#allocation2 + $0x150] sm:$0xff] %vm1194_vm7, %v1141_v24  ;;  %v6928_v24 = vld [vmem:[#allocation19_spill] sm:$0xff] }
 0x1ff   : > { %1277 = vrot.lane.b32.xlu1 %v4052_v56, %s3688_s26 }
 0x200   : > { %1275 = vrot.lane.b32.xlu0 %v4041_v16, %s3688_s26  ;;  %v269_v16 = vld [vmem:[%s3739_s20 + $0x198] sm:$0xff] }
 0x201   : > { %v1127_v26 = vpop.permute.xlu1 %1126 }
 0x202   : > { %1209 = vst.msk [vmem:[#allocation2 + $0xe0] sm:$0xff] %vm1194_vm7, %v1127_v26  ;;  %v1125_v36 = vpop.permute.xlu0 %1124  ;;  %1279 = vrot.lane.b32.xlu2 %v4054_v14, %s3688_s26  ;;  %v4831_v14 = vmax.f32 %v269_v16, 0.0 }
 0x203   : > { %1208 = vst.msk [vmem:[#allocation2 + $0xd0] sm:$0xff] %vm1194_vm7, %v1125_v36  ;;  %v6929_v36 = vld [vmem:[#allocation18_spill] sm:$0xff] }
 0x204   : > { %v1147_v45 = vpop.permute.xlu2 %1146 }
 0x205   : > { %1219 = vst.msk [vmem:[#allocation2 + $0x180] sm:$0xff] %vm1194_vm7, %v1147_v45 }
 0x207   : > { %1283 = vrot.lane.b32.xlu1 %v4088_v46, %s3688_s26  ;;  %v4835_v46 = vmax.f32 %v270_v2, 0.0 }
 0x208   : > { %1281 = vrot.lane.b32.xlu0 %v4094_v1, %s3688_s26 }
 0x209   : > { %v1133_v56 = vpop.permute.xlu1 %1132 }
 0x20a   : > { %1212 = vst.msk [vmem:[#allocation2 + $0x110] sm:$0xff] %vm1194_vm7, %v1133_v56  ;;  %v1131_v43 = vpop.permute.xlu0 %1130  ;;  %1285 = vrot.lane.b32.xlu2 %v4513_v60, %s3688_s26  ;;  %v6930_v56 = vld [vmem:[#allocation22_spill] sm:$0xff] }
 0x20b   : > { %1211 = vst.msk [vmem:[#allocation2 + $0x100] sm:$0xff] %vm1194_vm7, %v1131_v43 }
 0x20c   : > { %v1153_v12 = vpop.permute.xlu2 %1152 }
 0x20d   : > { %1222 = vst.msk [vmem:[#allocation2 + $0x1b0] sm:$0xff] %vm1194_vm7, %v1153_v12 }
 0x20f   : > { %1289 = vrot.lane.b32.xlu1 %v4831_v14, %s3688_s26 }
 0x210   : > { %1287 = vrot.lane.b32.xlu0 %v4517_v57, %s3688_s26 }
 0x211   : > { %v1139_v1 = vpop.permute.xlu1 %1138 }
 0x212   : > { %1215 = vst.msk [vmem:[#allocation2 + $0x140] sm:$0xff] %vm1194_vm7, %v1139_v1  ;;  %v1137_v60 = vpop.permute.xlu0 %1136  ;;  %1291 = vrot.lane.b32.xlu2 %v4835_v46, %s3688_s26  ;;  %v6932_v1 = vld [vmem:[#allocation25_spill] sm:$0xff] }
 0x213   : > { %1214 = vst.msk [vmem:[#allocation2 + $0x130] sm:$0xff] %vm1194_vm7, %v1137_v60 }
 0x214   : > { %v1159_v7 = vpop.permute.xlu2 %1158 }
 0x215   : > { %1225 = vst.msk [vmem:[#allocation2 + $0x1e0] sm:$0xff] %vm1194_vm7, %v1159_v7  ;;  %v6933_v7 = vld [vmem:[#allocation26_spill] sm:$0xff] }
 0x217   : > { %1366 = vrot.lane.b32.xlu1 %v6880_v33, %s3689_s27 }
 0x218   : > { %1364 = vrot.lane.b32.xlu0 %v3788_v27, %s3689_s27 }
 0x219   : > { %v1145_v57 = vpop.permute.xlu1 %1144 }
 0x21a   : > { %1218 = vst.msk [vmem:[#allocation2 + $0x170] sm:$0xff] %vm1194_vm7, %v1145_v57  ;;  %v1143_v50 = vpop.permute.xlu0 %1142  ;;  %1368 = vrot.lane.b32.xlu2 %v3844_v54, %s3689_s27 }
 0x21b   : > { %1217 = vst.msk [vmem:[#allocation2 + $0x160] sm:$0xff] %vm1194_vm7, %v1143_v50  ;;  %v4923_v50 = vld [vmem:[%s3739_s20 + $0x1a8] sm:$0x3] }
 0x21c   : > { %v1232_v37 = vpop.permute.xlu2 %1231 }
 0x21d   : > { %1327 = vst.msk [vmem:[#allocation2 + $0x10] sm:$0xff] %vm1325_vm8, %v1232_v37 }
 0x21f   : > { %1372 = vrot.lane.b32.xlu1 %v6883_v63, %s3689_s27  ;;  %v6918_v63 = vld [vmem:[#allocation6_spill] sm:$0xff] }
 0x220   : > { %1370 = vrot.lane.b32.xlu0 %v6881_v25, %s3689_s27 }
 0x221   : > { %v1151_v27 = vpop.permute.xlu1 %1150 }
 0x222   : > { %1221 = vst.msk [vmem:[#allocation2 + $0x1a0] sm:$0xff] %vm1194_vm7, %v1151_v27  ;;  %v1149_v33 = vpop.permute.xlu0 %1148  ;;  %1374 = vrot.lane.b32.xlu2 %v6916_v53, %s3689_s27  ;;  %v6935_v27 = vld [vmem:[#allocation27_spill] sm:$0xff] }
 0x223   : > { %1220 = vst.msk [vmem:[#allocation2 + $0x190] sm:$0xff] %vm1194_vm7, %v1149_v33  ;;  %v325_v33 = vmax.f32 %v4923_v50, 0.0  ;;  %v1631_v50 = vld [vmem:[%s5039_s5 + $0x20] sm:$0xff] }
 0x224   : > { %v1238_v54 = vpop.permute.xlu2 %1237 }
 0x225   : > { %1330 = vst.msk [vmem:[#allocation2 + $0x40] sm:$0xff] %vm1325_vm8, %v1238_v54  ;;  %v1360_v54 = vrot.slane %v4835_v46, 1 }
 0x227   : > { %1378 = vrot.lane.b32.xlu1 %v6917_v18, %s3689_s27  ;;  %v1362_v18 = vrot.slane %v325_v33, 1 }
 0x228   : > { %1376 = vrot.lane.b32.xlu0 %v6918_v63, %s3689_s27 }
 0x229   : > { %v1157_v20 = vpop.permute.xlu1 %1156 }
 0x22a   : > { %1224 = vst.msk [vmem:[#allocation2 + $0x1d0] sm:$0xff] %vm1194_vm7, %v1157_v20  ;;  %v1155_v25 = vpop.permute.xlu0 %1154  ;;  %1380 = vrot.lane.b32.xlu2 %v6919_v19, %s3689_s27  ;;  %v1359_v20 = vrot.slane %v4831_v14, 1 }
 0x22b   : > { %1223 = vst.msk [vmem:[#allocation2 + $0x1c0] sm:$0xff] %vm1194_vm7, %v1155_v25 }
 0x22c   : > { %v1244_v34 = vpop.permute.xlu2 %1243 }
 0x22d   : > { %1333 = vst.msk [vmem:[#allocation2 + $0x70] sm:$0xff] %vm1325_vm8, %v1244_v34 }
 0x22f   : > { %1384 = vrot.lane.b32.xlu1 %v6920_v38, %s3689_s27 }
 0x230   : > { %1382 = vrot.lane.b32.xlu0 %v6921_v41, %s3689_s27  ;;  %v6936_v41 = vld [vmem:[#allocation30_spill] sm:$0xff] }
 0x231   : > { %v1230_v51 = vpop.permute.xlu1 %1229 }
 0x232   : > { %1326 = vst.msk [vmem:[#allocation2] sm:$0xff] %vm1325_vm8, %v1230_v51  ;;  %v1161_v47 = vpop.permute.xlu0 %1160  ;;  %1386 = vrot.lane.b32.xlu2 %v6922_v52, %s3689_s27  ;;  %v6937_v51 = vld [vmem:[#allocation29_spill] sm:$0xff] }
 0x233   : > { %1226 = vst.msk [vmem:[#allocation2 + $0x1f0] sm:$0xff] %vm1194_vm7, %v1161_v47 }
 0x234   : > { %v1250_v5 = vpop.permute.xlu2 %1249 }
 0x235   : > { %1336 = vst.msk [vmem:[#allocation2 + $0xa0] sm:$0xff] %vm1325_vm8, %v1250_v5  ;;  %v6938_v5 = vld [vmem:[#allocation32_spill] sm:$0xff] }
 0x237   : > { %1390 = vrot.lane.b32.xlu1 %v6923_v13, %s3689_s27  ;;  %v6939_v13 = vld [vmem:[#allocation31_spill] sm:$0xff] }
 0x238   : > { %1388 = vrot.lane.b32.xlu0 %v6924_v22, %s3689_s27 }
 0x239   : > { %v1236_v39 = vpop.permute.xlu1 %1235 }
 0x23a   : > { %1329 = vst.msk [vmem:[#allocation2 + $0x30] sm:$0xff] %vm1325_vm8, %v1236_v39  ;;  %v1234_v31 = vpop.permute.xlu0 %1233  ;;  %1392 = vrot.lane.b32.xlu2 %v6925_v42, %s3689_s27 }
 0x23b   : > { %1328 = vst.msk [vmem:[#allocation2 + $0x20] sm:$0xff] %vm1325_vm8, %v1234_v31 }
 0x23c   : > { %v1256_v23 = vpop.permute.xlu2 %1255 }
 0x23d   : > { %1339 = vst.msk [vmem:[#allocation2 + $0xd0] sm:$0xff] %vm1325_vm8, %v1256_v23 }
 0x23f   : > { %1396 = vrot.lane.b32.xlu1 %v6926_v28, %s3689_s27  ;;  %v6941_v28 = vld [vmem:[#allocation37_spill] sm:$0xff] }
 0x240   : > { %1394 = vrot.lane.b32.xlu0 %v6927_v59, %s3689_s27 }
 0x241   : > { %v1242_v58 = vpop.permute.xlu1 %1241 }
 0x242   : > { %1332 = vst.msk [vmem:[#allocation2 + $0x60] sm:$0xff] %vm1325_vm8, %v1242_v58  ;;  %v1240_v10 = vpop.permute.xlu0 %1239  ;;  %1398 = vrot.lane.b32.xlu2 %v6928_v24, %s3689_s27 }
 0x243   : > { %1331 = vst.msk [vmem:[#allocation2 + $0x50] sm:$0xff] %vm1325_vm8, %v1240_v10 }
 0x244   : > { %v1262_v26 = vpop.permute.xlu2 %1261 }
 0x245   : > { %1342 = vst.msk [vmem:[#allocation2 + $0x100] sm:$0xff] %vm1325_vm8, %v1262_v26 }
 0x247   : > { %1402 = vrot.lane.b32.xlu1 %v6898_v32, %s3689_s27  ;;  %v6931_v32 = vld [vmem:[#allocation21_spill] sm:$0xff] }
 0x248   : > { %1400 = vrot.lane.b32.xlu0 %v6929_v36, %s3689_s27  ;;  %v6944_v36 = vld [vmem:[#allocation42_spill] sm:$0xff] }
 0x249   : > { %v1248_v45 = vpop.permute.xlu1 %1247 }
 0x24a   : > { %1335 = vst.msk [vmem:[#allocation2 + $0x90] sm:$0xff] %vm1325_vm8, %v1248_v45  ;;  %v1246_v16 = vpop.permute.xlu0 %1245  ;;  %1404 = vrot.lane.b32.xlu2 %v6930_v56, %s3689_s27 }
 0x24b   : > { %1334 = vst.msk [vmem:[#allocation2 + $0x80] sm:$0xff] %vm1325_vm8, %v1246_v16 }
 0x24c   : > { %v1268_v43 = vpop.permute.xlu2 %1267 }
 0x24d   : > { %1345 = vst.msk [vmem:[#allocation2 + $0x130] sm:$0xff] %vm1325_vm8, %v1268_v43 }
 0x24f   : > { %1408 = vrot.lane.b32.xlu1 %v6900_v4, %s3689_s27  ;;  %v6934_v4 = vld [vmem:[#allocation24_spill] sm:$0xff] }
 0x250   : > { %1406 = vrot.lane.b32.xlu0 %v6931_v32, %s3689_s27 }
 0x251   : > { %v1254_v2 = vpop.permute.xlu1 %1253 }
 0x252   : > { %1338 = vst.msk [vmem:[#allocation2 + $0xc0] sm:$0xff] %vm1325_vm8, %v1254_v2  ;;  %v1252_v12 = vpop.permute.xlu0 %1251  ;;  %1410 = vrot.lane.b32.xlu2 %v6932_v1, %s3689_s27  ;;  %v6947_v2 = vld [vmem:[#allocation48_spill] sm:$0xff] }
 0x253   : > { %1337 = vst.msk [vmem:[#allocation2 + $0xb0] sm:$0xff] %vm1325_vm8, %v1252_v12 }
 0x254   : > { %v1274_v60 = vpop.permute.xlu2 %1273 }
 0x255   : > { %1348 = vst.msk [vmem:[#allocation2 + $0x160] sm:$0xff] %vm1325_vm8, %v1274_v60  ;;  %v6949_v60 = vld [vmem:[#allocation49_spill] sm:$0xff] }
 0x257   : > { %1414 = vrot.lane.b32.xlu1 %v6933_v7, %s3689_s27  ;;  %v1493_v7 = vrot.slane %v4831_v14, 2  ;;  %v1627_v14 = vld [vmem:[%s5039_s5] sm:$0xff] }
 0x258   : > { %1412 = vrot.lane.b32.xlu0 %v6934_v4, %s3689_s27 }
 0x259   : > { %v1260_v57 = vpop.permute.xlu1 %1259 }
 0x25a   : > { %1341 = vst.msk [vmem:[#allocation2 + $0xf0] sm:$0xff] %vm1325_vm8, %v1260_v57  ;;  %v1258_v37 = vpop.permute.xlu0 %1257  ;;  %1416 = vrot.lane.b32.xlu2 %v6935_v27, %s3689_s27  ;;  %v1496_v27 = vrot.slane %v325_v33, 2 }
 0x25b   : > { %1340 = vst.msk [vmem:[#allocation2 + $0xe0] sm:$0xff] %vm1325_vm8, %v1258_v37 }
 0x25c   : > { %v1280_v53 = vpop.permute.xlu2 %1279 }
 0x25d   : > { %1351 = vst.msk [vmem:[#allocation2 + $0x190] sm:$0xff] %vm1325_vm8, %v1280_v53  ;;  %v1628_v53 = vld [vmem:[%s5039_s5 + $0x8] sm:$0xff] }
 0x25f   : > { %1420 = vrot.lane.b32.xlu1 %v4629_v30, %s3689_s27  ;;  %v1363_v30 = vsel %vm407_vm0, %v1360_v54, %v1362_v18  ;;  %v5059_v18 = vmax.f32 %v1628_v53, 0.0  ;;  %v1660_v53 = vld [vmem:[%s5039_s5 + $0x108] sm:$0xff] }
 0x260   : > { %1418 = vrot.lane.b32.xlu0 %v4117_v15, %s3689_s27  ;;  %v1361_v15 = vsel %vm407_vm0, %v1359_v20, %v1360_v54 }
 0x261   : > { %v1266_v63 = vpop.permute.xlu1 %1265 }
 0x262   : > { %1344 = vst.msk [vmem:[#allocation2 + $0x120] sm:$0xff] %vm1325_vm8, %v1266_v63  ;;  %v1264_v25 = vpop.permute.xlu0 %1263  ;;  %1422 = vrot.lane.b32.xlu2 %v4626_v6, %s3689_s27  ;;  %v1630_v63 = vld [vmem:[%s5039_s5 + $0x18] sm:$0xff] }
 0x263   : > { %1343 = vst.msk [vmem:[#allocation2 + $0x110] sm:$0xff] %vm1325_vm8, %v1264_v25  ;;  %v5070_v25 = vmax.f32 %v1631_v50, 0.0  ;;  %v5184_v50 = vmax.f32 %v1660_v53, 0.0 }
 0x264   : > { %v1286_v19 = vpop.permute.xlu2 %1285 }
 0x265   : > { %1354 = vst.msk [vmem:[#allocation2 + $0x1c0] sm:$0xff] %vm1325_vm8, %v1286_v19  ;;  %v5073_v19 = vmax.f32 %v1630_v63, 0.0 }
 0x267   : > { %1426 = vrot.lane.b32.xlu1 %v1363_v30, %s3689_s27  ;;  %v1633_v30 = vld [vmem:[%s5039_s5 + $0x30] sm:$0xff] }
 0x268   : > { %1424 = vrot.lane.b32.xlu0 %v1361_v15, %s3689_s27 }
 0x269   : > { %v1272_v34 = vpop.permute.xlu1 %1271 }
 0x26a   : > { %1347 = vst.msk [vmem:[#allocation2 + $0x150] sm:$0xff] %vm1325_vm8, %v1272_v34  ;;  %v1270_v38 = vpop.permute.xlu0 %1269  ;;  %1498 = vrot.lane.b32.xlu2 %v4190_v44, %s3690_s28  ;;  %v5076_v34 = vmax.f32 %v1633_v30, 0.0 }
 0x26b   : > { %1346 = vst.msk [vmem:[#allocation2 + $0x140] sm:$0xff] %vm1325_vm8, %v1270_v38  ;;  %v1636_v38 = vld [vmem:[%s5039_s5 + $0x48] sm:$0xff] }
 0x26c   : > { %v1292_v6 = vpop.permute.xlu2 %1291 }
 0x26d   : > { %1357 = vst.msk [vmem:[#allocation2 + $0x1f0] sm:$0xff] %vm1325_vm8, %v1292_v6 }
 0x26f   : > { %1502 = vrot.lane.b32.xlu1 %v6936_v41, %s3690_s28  ;;  %v1634_v41 = vld [vmem:[%s5039_s5 + $0x38] sm:$0xff] }
 0x270   : > { %1500 = vrot.lane.b32.xlu0 %v6937_v51, %s3690_s28 }
 0x271   : > { %v1278_v47 = vpop.permute.xlu1 %1277 }
 0x272   : > { %1350 = vst.msk [vmem:[#allocation2 + $0x180] sm:$0xff] %vm1325_vm8, %v1278_v47  ;;  %v1276_v52 = vpop.permute.xlu0 %1275  ;;  %1504 = vrot.lane.b32.xlu2 %v6938_v5, %s3690_s28  ;;  %v5088_v47 = vmax.f32 %v1636_v38, 0.0  ;;  %v5091_v5 = vmax.f32 %v1634_v41, 0.0  ;;  %v1664_v38 = vld [vmem:[%s5039_s5 + $0x128] sm:$0xff] }
 0x273   : > { %1349 = vst.msk [vmem:[#allocation2 + $0x170] sm:$0xff] %vm1325_vm8, %v1276_v52  ;;  %v1637_v52 = vld [vmem:[%s5039_s5 + $0x50] sm:$0xff] }
 0x274   : > { %v1369_v44 = vpop.permute.xlu2 %1368  ;;  %v1923_v41 = vrot.slane %v5091_v5, 1 }
 0x275   : > { %1463 = vst.msk [vmem:[#allocation2 + $0x20] sm:$0xff] %vm1460_vm9, %v1369_v44 }
 0x277   : > { %1508 = vrot.lane.b32.xlu1 %v6907_v62, %s3690_s28  ;;  %v6940_v62 = vld [vmem:[#allocation34_spill] sm:$0xff] }
 0x278   : > { %1506 = vrot.lane.b32.xlu0 %v6939_v13, %s3690_s28  ;;  %v5094_v13 = vmax.f32 %v1637_v52, 0.0 }
 0x279   : > { %v1284_v22 = vpop.permute.xlu1 %1283 }
 0x27a   : > { %1353 = vst.msk [vmem:[#allocation2 + $0x1b0] sm:$0xff] %vm1325_vm8, %v1284_v22  ;;  %v1282_v39 = vpop.permute.xlu0 %1281  ;;  %1510 = vrot.lane.b32.xlu2 %v6906_v11, %s3690_s28  ;;  %v1640_v22 = vld [vmem:[%s5039_s5 + $0x68] sm:$0xff] }
 0x27b   : > { %1352 = vst.msk [vmem:[#allocation2 + $0x1a0] sm:$0xff] %vm1325_vm8, %v1282_v39 }
 0x27c   : > { %v1375_v31 = vpop.permute.xlu2 %1374 }
 0x27d   : > { %1466 = vst.msk [vmem:[#allocation2 + $0x50] sm:$0xff] %vm1460_vm9, %v1375_v31  ;;  %v1639_v31 = vld [vmem:[%s5039_s5 + $0x60] sm:$0xff] }
 0x27f   : > { %1514 = vrot.lane.b32.xlu1 %v4265_v29, %s3690_s28  ;;  %v6942_v29 = vld [vmem:[#allocation36_spill] sm:$0xff] }
 0x280   : > { %1512 = vrot.lane.b32.xlu0 %v6940_v62, %s3690_s28 }
 0x281   : > { %v1290_v42 = vpop.permute.xlu1 %1289 }
 0x282   : > { %1356 = vst.msk [vmem:[#allocation2 + $0x1e0] sm:$0xff] %vm1325_vm8, %v1290_v42  ;;  %v1288_v23 = vpop.permute.xlu0 %1287  ;;  %1516 = vrot.lane.b32.xlu2 %v6941_v28, %s3690_s28  ;;  %v5106_v42 = vmax.f32 %v1640_v22, 0.0  ;;  %v5109_v28 = vmax.f32 %v1639_v31, 0.0  ;;  %v5207_v22 = vmax.f32 %v1664_v38, 0.0 }
 0x283   : > { %1355 = vst.msk [vmem:[#allocation2 + $0x1d0] sm:$0xff] %vm1325_vm8, %v1288_v23  ;;  %v1642_v23 = vld [vmem:[%s5039_s5 + $0x78] sm:$0xff] }
 0x284   : > { %v1381_v11 = vpop.permute.xlu2 %1380  ;;  %6951 = vst [vmem:[#allocation4_spill] sm:$0xff] %v5207_v22 }
 0x285   : > { %1469 = vst.msk [vmem:[#allocation2 + $0x80] sm:$0xff] %vm1460_vm9, %v1381_v11 }
 0x287   : > { %1520 = vrot.lane.b32.xlu1 %v6910_v61, %s3690_s28  ;;  %v6943_v61 = vld [vmem:[#allocation39_spill] sm:$0xff] }
 0x288   : > { %1518 = vrot.lane.b32.xlu0 %v6942_v29, %s3690_s28  ;;  %v5112_v29 = vmax.f32 %v1642_v23, 0.0 }
 0x289   : > { %v1367_v59 = vpop.permute.xlu1 %1366 }
 0x28a   : > { %1462 = vst.msk [vmem:[#allocation2 + $0x10] sm:$0xff] %vm1460_vm9, %v1367_v59  ;;  %v1365_v58 = vpop.permute.xlu0 %1364  ;;  %1522 = vrot.lane.b32.xlu2 %v6909_v3, %s3690_s28  ;;  %v1645_v59 = vld [vmem:[%s5039_s5 + $0x90] sm:$0xff] }
 0x28b   : > { %1461 = vst.msk [vmem:[#allocation2] sm:$0xff] %vm1460_vm9, %v1365_v58 }
 0x28c   : > { %v1387_v10 = vpop.permute.xlu2 %1386 }
 0x28d   : > { %1472 = vst.msk [vmem:[#allocation2 + $0xb0] sm:$0xff] %vm1460_vm9, %v1387_v10  ;;  %v1643_v10 = vld [vmem:[%s5039_s5 + $0x80] sm:$0xff] }
 0x28f   : > { %1526 = vrot.lane.b32.xlu1 %v4313_v35, %s3690_s28  ;;  %v6945_v35 = vld [vmem:[#allocation41_spill] sm:$0xff] }
 0x290   : > { %1524 = vrot.lane.b32.xlu0 %v6943_v61, %s3690_s28 }
 0x291   : > { %v1373_v24 = vpop.permute.xlu1 %1372 }
 0x292   : > { %1465 = vst.msk [vmem:[#allocation2 + $0x40] sm:$0xff] %vm1460_vm9, %v1373_v24  ;;  %v1371_v26 = vpop.permute.xlu0 %1370  ;;  %1528 = vrot.lane.b32.xlu2 %v6944_v36, %s3690_s28  ;;  %v5124_v24 = vmax.f32 %v1645_v59, 0.0  ;;  %v5127_v36 = vmax.f32 %v1643_v10, 0.0 }
 0x293   : > { %1464 = vst.msk [vmem:[#allocation2 + $0x30] sm:$0xff] %vm1460_vm9, %v1371_v26  ;;  %v1646_v26 = vld [vmem:[%s5039_s5 + $0x98] sm:$0xff] }
 0x294   : > { %v1393_v3 = vpop.permute.xlu2 %1392 }
 0x295   : > { %1475 = vst.msk [vmem:[#allocation2 + $0xe0] sm:$0xff] %vm1460_vm9, %v1393_v3 }
 0x297   : > { %1532 = vrot.lane.b32.xlu1 %v6913_v40, %s3690_s28 }
 0x298   : > { %1530 = vrot.lane.b32.xlu0 %v6945_v35, %s3690_s28  ;;  %v5130_v35 = vmax.f32 %v1646_v26, 0.0 }
 0x299   : > { %v1379_v45 = vpop.permute.xlu1 %1378 }
 0x29a   : > { %1468 = vst.msk [vmem:[#allocation2 + $0x70] sm:$0xff] %vm1460_vm9, %v1379_v45  ;;  %v1377_v16 = vpop.permute.xlu0 %1376  ;;  %1534 = vrot.lane.b32.xlu2 %v6912_v9, %s3690_s28  ;;  %v1649_v45 = vld [vmem:[%s5039_s5 + $0xb0] sm:$0xff] }
 0x29b   : > { %1467 = vst.msk [vmem:[#allocation2 + $0x60] sm:$0xff] %vm1460_vm9, %v1377_v16 }
 0x29c   : > { %v1399_v56 = vpop.permute.xlu2 %1398 }
 0x29d   : > { %1478 = vst.msk [vmem:[#allocation2 + $0x110] sm:$0xff] %vm1460_vm9, %v1399_v56  ;;  %v1648_v56 = vld [vmem:[%s5039_s5 + $0xa8] sm:$0xff] }
 0x29f   : > { %1538 = vrot.lane.b32.xlu1 %v4361_v21, %s3690_s28  ;;  %v6946_v21 = vld [vmem:[#allocation46_spill] sm:$0xff] }
 0x2a0   : > { %1536 = vrot.lane.b32.xlu0 %v6914_v48, %s3690_s28 }
 0x2a1   : > { %v1385_v40 = vpop.permute.xlu1 %1384 }
 0x2a2   : > { %1471 = vst.msk [vmem:[#allocation2 + $0xa0] sm:$0xff] %vm1460_vm9, %v1385_v40  ;;  %v1383_v43 = vpop.permute.xlu0 %1382  ;;  %1540 = vrot.lane.b32.xlu2 %v4379_v55, %s3690_s28 }
 0x2a3   : > { %1470 = vst.msk [vmem:[#allocation2 + $0x90] sm:$0xff] %vm1460_vm9, %v1383_v43  ;;  %v5142_v43 = vmax.f32 %v1649_v45, 0.0 }
 0x2a4   : > { %v1405_v9 = vpop.permute.xlu2 %1404 }
 0x2a5   : > { %1481 = vst.msk [vmem:[#allocation2 + $0x140] sm:$0xff] %vm1460_vm9, %v1405_v9  ;;  %v1651_v9 = vld [vmem:[%s5039_s5 + $0xc0] sm:$0xff] }
 0x2a7   : > { %1544 = vrot.lane.b32.xlu1 %v4385_v17, %s3690_s28  ;;  %v6948_v17 = vld [vmem:[#allocation47_spill] sm:$0xff] }
 0x2a8   : > { %1542 = vrot.lane.b32.xlu0 %v6946_v21, %s3690_s28  ;;  %v5145_v21 = vmax.f32 %v1648_v56, 0.0 }
 0x2a9   : > { %v1391_v32 = vpop.permute.xlu1 %1390 }
 0x2aa   : > { %1474 = vst.msk [vmem:[#allocation2 + $0xd0] sm:$0xff] %vm1460_vm9, %v1391_v32  ;;  %v1389_v48 = vpop.permute.xlu0 %1388  ;;  %1546 = vrot.lane.b32.xlu2 %v6947_v2, %s3690_s28  ;;  %v1654_v2 = vld [vmem:[%s5039_s5 + $0xd8] sm:$0xff] }
 0x2ab   : > { %1473 = vst.msk [vmem:[#allocation2 + $0xc0] sm:$0xff] %vm1460_vm9, %v1389_v48  ;;  %v5148_v48 = vmax.f32 %v1651_v9, 0.0 }
 0x2ac   : > { %v1411_v55 = vpop.permute.xlu2 %1410 }
 0x2ad   : > { %1484 = vst.msk [vmem:[#allocation2 + $0x170] sm:$0xff] %vm1460_vm9, %v1411_v55 }
 0x2af   : > { %1550 = vrot.lane.b32.xlu1 %v4409_v8, %s3690_s28  ;;  %v1494_v8 = vrot.slane %v4835_v46, 2 }
 0x2b0   : > { %1548 = vrot.lane.b32.xlu0 %v6948_v17, %s3690_s28  ;;  %v1652_v17 = vld [vmem:[%s5039_s5 + $0xc8] sm:$0xff] }
 0x2b1   : > { %v1397_v12 = vpop.permute.xlu1 %1396  ;;  %v1495_v57 = vsel %vm617_vm2, %v1493_v7, %v1494_v8  ;;  %v5163_v7 = vmax.f32 %v1652_v17, 0.0  ;;  %v5252_v17 = vld [vmem:[%s5039_s5 + $0x10] sm:$0x3] }
 0x2b2   : > { %1477 = vst.msk [vmem:[#allocation2 + $0x100] sm:$0xff] %vm1460_vm9, %v1397_v12  ;;  %v1395_v1 = vpop.permute.xlu0 %1394  ;;  %1552 = vrot.lane.b32.xlu2 %v6949_v60, %s3690_s28  ;;  %v1655_v60 = vld [vmem:[%s5039_s5 + $0xe0] sm:$0xff] }
 0x2b3   : > { %1476 = vst.msk [vmem:[#allocation2 + $0xf0] sm:$0xff] %vm1460_vm9, %v1395_v1  ;;  %v5160_v1 = vmax.f32 %v1654_v2, 0.0 }
 0x2b4   : > { %v1417_v4 = vpop.permute.xlu2 %1416 }
 0x2b5   : > { %1487 = vst.msk [vmem:[#allocation2 + $0x1a0] sm:$0xff] %vm1460_vm9, %v1417_v4 }
 0x2b7   : > { %1556 = vrot.lane.b32.xlu1 %v4738_v0, %s3690_s28  ;;  %v5054_v0 = vmax.f32 %v1627_v14, 0.0 }
 0x2b8   : > { %1554 = vrot.lane.b32.xlu0 %v4727_v49, %s3690_s28  ;;  %v1497_v49 = vsel %vm617_vm2, %v1494_v8, %v1496_v27  ;;  %v5166_v8 = vmax.f32 %v1655_v60, 0.0 }
 0x2b9   : > { %v1403_v37 = vpop.permute.xlu1 %1402 }
 0x2ba   : > { %1480 = vst.msk [vmem:[#allocation2 + $0x130] sm:$0xff] %vm1460_vm9, %v1403_v37  ;;  %v1401_v46 = vpop.permute.xlu0 %1400  ;;  %1558 = vrot.lane.b32.xlu2 %v1495_v57, %s3690_s28  ;;  %v1658_v57 = vld [vmem:[%s5039_s5 + $0xf8] sm:$0xff]  ;;  %v1657_v37 = vld [vmem:[%s5039_s5 + $0xf0] sm:$0xff] }
 0x2bb   : > { %1479 = vst.msk [vmem:[#allocation2 + $0x120] sm:$0xff] %vm1460_vm9, %v1401_v46  ;;  %v5178_v46 = vmax.f32 %v1658_v57, 0.0  ;;  %v5265_v57 = vld [vmem:[%s5039_s5 + $0x70] sm:$0x3] }
 0x2bc   : > { %v1423_v54 = vpop.permute.xlu2 %1422 }
 0x2bd   : > { %1490 = vst.msk [vmem:[#allocation2 + $0x1d0] sm:$0xff] %vm1460_vm9, %v1423_v54  ;;  %v5181_v54 = vmax.f32 %v1657_v37, 0.0  ;;  %v1937_v37 = vrot.slane %v5112_v29, 1 }
 0x2bf   : > { %1767 = vrot.lane.b32.xlu1 %v5054_v0, %s3691_s6 }
 0x2c0   : > { %1560 = vrot.lane.b32.xlu0 %v1497_v49, %s3690_s28 }
 0x2c1   : > { %v1409_v33 = vpop.permute.xlu1 %1408 }
 0x2c2   : > { %1483 = vst.msk [vmem:[#allocation2 + $0x160] sm:$0xff] %vm1460_vm9, %v1409_v33  ;;  %v1407_v20 = vpop.permute.xlu0 %1406  ;;  %1769 = vrot.lane.b32.xlu2 %v5059_v18, %s3691_s6  ;;  %v1663_v33 = vld [vmem:[%s5039_s5 + $0x120] sm:$0xff] }
 0x2c3   : > { %1482 = vst.msk [vmem:[#allocation2 + $0x150] sm:$0xff] %vm1460_vm9, %v1407_v20  ;;  %v1661_v20 = vld [vmem:[%s5039_s5 + $0x110] sm:$0xff] }
 0x2c4   : > { %v1499_v15 = vpop.permute.xlu2 %1498 }
 0x2c5   : > { %1595 = vst.msk [vmem:[#allocation2] sm:$0xff] %vm1594_vm10, %v1499_v15  ;;  %v5196_v15 = vmax.f32 %v1663_v33, 0.0 }
 0x2c7   : > { %1773 = vrot.lane.b32.xlu1 %v5070_v25, %s3691_s6 }
 0x2c8   : > { %1771 = vrot.lane.b32.xlu0 %v5073_v19, %s3691_s6 }
 0x2c9   : > { %v1415_v6 = vpop.permute.xlu1 %1414 }
 0x2ca   : > { %1486 = vst.msk [vmem:[#allocation2 + $0x190] sm:$0xff] %vm1460_vm9, %v1415_v6  ;;  %v1413_v51 = vpop.permute.xlu0 %1412  ;;  %1775 = vrot.lane.b32.xlu2 %v5076_v34, %s3691_s6  ;;  %v1922_v6 = vrot.slane %v5076_v34, 1 }
 0x2cb   : > { %1485 = vst.msk [vmem:[#allocation2 + $0x180] sm:$0xff] %vm1460_vm9, %v1413_v51  ;;  %v5201_v51 = vmax.f32 %v1661_v20, 0.0 }
 0x2cc   : > { %v1505_v44 = vpop.permute.xlu2 %1504 }
 0x2cd   : > { %1598 = vst.msk [vmem:[#allocation2 + $0x30] sm:$0xff] %vm1594_vm10, %v1505_v44  ;;  %v5205_v44 = vsel %vm407_vm0, %v1922_v6, %v1923_v41  ;;  %v1933_v6 = vrot.slane %v5106_v42, 1 }
 0x2ce   : > { %6950 = vst [vmem:[#allocation3_spill] sm:$0xff] %v5205_v44 }
 0x2cf   : > { %1779 = vrot.lane.b32.xlu1 %v5088_v47, %s3691_s6  ;;  %2899 = vst.msk [vmem:[#allocation2 + $0x8] sm:$0xff] %vm326_vm1, %v5205_v44 }
 0x2d0   : > { %1777 = vrot.lane.b32.xlu0 %v5091_v5, %s3691_s6 }
 0x2d1   : > { %v1421_v39 = vpop.permute.xlu1 %1420 }
 0x2d2   : > { %1489 = vst.msk [vmem:[#allocation2 + $0x1c0] sm:$0xff] %vm1460_vm9, %v1421_v39  ;;  %v1419_v62 = vpop.permute.xlu0 %1418  ;;  %1781 = vrot.lane.b32.xlu2 %v5094_v13, %s3691_s6  ;;  %v1667_v39 = vld [vmem:[%s5039_s5 + $0x140] sm:$0xff] }
 0x2d3   : > { %1488 = vst.msk [vmem:[#allocation2 + $0x1b0] sm:$0xff] %vm1460_vm9, %v1419_v62  ;;  %v1666_v62 = vld [vmem:[%s5039_s5 + $0x138] sm:$0xff]  ;;  %v5224_v59 = vmax.f32 %v1667_v39, 0.0 }
 0x2d4   : > { %v1511_v11 = vpop.permute.xlu2 %1510  ;;  %v5229_v26 = vmax.f32 %v1666_v62, 0.0  ;;  %v1913_v62 = vrot.slane %v5059_v18, 1 }
 0x2d5   : > { %1601 = vst.msk [vmem:[#allocation2 + $0x60] sm:$0xff] %vm1594_vm10, %v1511_v11  ;;  %v5221_v11 = vld [vmem:[%s5039_s5 + $0x58] sm:$0x3] }
 0x2d6   : > { %v6754_v10 = vmax.f32 %v5221_v11, 0.0 }
 0x2d7   : > { %1785 = vrot.lane.b32.xlu1 %v5106_v42, %s3691_s6 }
 0x2d8   : > { %1783 = vrot.lane.b32.xlu0 %v5109_v28, %s3691_s6  ;;  %v1930_v45 = vrot.slane %v6754_v10, 1 }
 0x2d9   : > { %v1427_v58 = vpop.permute.xlu1 %1426 }
 0x2da   : > { %1492 = vst.msk [vmem:[#allocation2 + $0x1f0] sm:$0xff] %vm1460_vm9, %v1427_v58  ;;  %v1425_v61 = vpop.permute.xlu0 %1424  ;;  %1787 = vrot.lane.b32.xlu2 %v5112_v29, %s3691_s6  ;;  %v1669_v58 = vld [vmem:[%s5039_s5 + $0x150] sm:$0xff] }
 0x2db   : > { %1491 = vst.msk [vmem:[#allocation2 + $0x1e0] sm:$0xff] %vm1460_vm9, %v1425_v61  ;;  %v1928_v61 = vrot.slane %v5094_v13, 1  ;;  %v5235_v56 = vmax.f32 %v1669_v58, 0.0 }
 0x2dc   : > { %v1517_v3 = vpop.permute.xlu2 %1516 }
 0x2dd   : > { %1604 = vst.msk [vmem:[#allocation2 + $0x90] sm:$0xff] %vm1594_vm10, %v1517_v3  ;;  %v5241_v9 = vsel %vm407_vm0, %v1928_v61, %v1930_v45  ;;  %v5308_v45 = vld [vmem:[%s5039_s5 + $0x28] sm:$0x3] }
 0x2de   : > { %6952 = vst [vmem:[#allocation5_spill] sm:$0xff] %v5241_v9 }
 0x2df   : > { %1791 = vrot.lane.b32.xlu1 %v5124_v24, %s3691_s6  ;;  %2902 = vst.msk [vmem:[#allocation2 + $0x38] sm:$0xff] %vm326_vm1, %v5241_v9 }
 0x2e0   : > { %1789 = vrot.lane.b32.xlu0 %v5127_v36, %s3691_s6 }
 0x2e1   : > { %v1503_v16 = vpop.permute.xlu1 %1502 }
 0x2e2   : > { %1597 = vst.msk [vmem:[#allocation2 + $0x20] sm:$0xff] %vm1594_vm10, %v1503_v16  ;;  %v1501_v40 = vpop.permute.xlu0 %1500  ;;  %1793 = vrot.lane.b32.xlu2 %v5130_v35, %s3691_s6  ;;  %v1927_v16 = vrot.slane %v5088_v47, 1 }
 0x2e3   : > { %1596 = vst.msk [vmem:[#allocation2 + $0x10] sm:$0xff] %vm1594_vm10, %v1501_v40  ;;  %v1672_v40 = vld [vmem:[%s5039_s5 + $0x168] sm:$0xff] }
 0x2e4   : > { %v1523_v32 = vpop.permute.xlu2 %1522  ;;  %v5257_v60 = vmax.f32 %v1672_v40, 0.0  ;;  %v1917_v40 = vrot.slane %v5073_v19, 1 }
 0x2e5   : > { %1607 = vst.msk [vmem:[#allocation2 + $0xc0] sm:$0xff] %vm1594_vm10, %v1523_v32  ;;  %v5248_v32 = vsel %vm407_vm0, %v1927_v16, %v1928_v61  ;;  %v5316_v16 = vld [vmem:[%s5039_s5 + $0xa0] sm:$0x3] }
 0x2e6   : > { %6953 = vst [vmem:[#allocation20_spill] sm:$0xff] %v5248_v32 }
 0x2e7   : > { %1797 = vrot.lane.b32.xlu1 %v5142_v43, %s3691_s6  ;;  %2901 = vst.msk [vmem:[#allocation2 + $0x28] sm:$0xff] %vm326_vm1, %v5248_v32 }
 0x2e8   : > { %1795 = vrot.lane.b32.xlu0 %v5145_v21, %s3691_s6 }
 0x2e9   : > { %v1509_v55 = vpop.permute.xlu1 %1508 }
 0x2ea   : > { %1600 = vst.msk [vmem:[#allocation2 + $0x50] sm:$0xff] %vm1594_vm10, %v1509_v55  ;;  %v1507_v12 = vpop.permute.xlu0 %1506  ;;  %1799 = vrot.lane.b32.xlu2 %v5148_v48, %s3691_s6  ;;  %v1670_v55 = vld [vmem:[%s5039_s5 + $0x158] sm:$0xff] }
 0x2eb   : > { %1599 = vst.msk [vmem:[#allocation2 + $0x40] sm:$0xff] %vm1594_vm10, %v1507_v12  ;;  %v5273_v33 = vmax.f32 %v1670_v55, 0.0  ;;  %v1943_v55 = vrot.slane %v5130_v35, 1 }
 0x2ec   : > { %v1529_v4 = vpop.permute.xlu2 %1528 }
 0x2ed   : > { %1610 = vst.msk [vmem:[#allocation2 + $0xf0] sm:$0xff] %vm1594_vm10, %v1529_v4  ;;  %v5262_v4 = vld [vmem:[%s5039_s5 + $0x40] sm:$0x3] }
 0x2ee   : > { %v6755_v53 = vmax.f32 %v5262_v4, 0.0 }
 0x2ef   : > { %1803 = vrot.lane.b32.xlu1 %v5160_v1, %s3691_s6 }
 0x2f0   : > { %1801 = vrot.lane.b32.xlu0 %v5163_v7, %s3691_s6  ;;  %v1925_v38 = vrot.slane %v6755_v53, 1  ;;  %v1948_v53 = vrot.slane %v5142_v43, 1 }
 0x2f1   : > { %v1515_v14 = vpop.permute.xlu1 %1514 }
 0x2f2   : > { %1603 = vst.msk [vmem:[#allocation2 + $0x80] sm:$0xff] %vm1594_vm10, %v1515_v14  ;;  %v1513_v27 = vpop.permute.xlu0 %1512  ;;  %1805 = vrot.lane.b32.xlu2 %v5166_v8, %s3691_s6  ;;  %v1673_v14 = vld [vmem:[%s5039_s5 + $0x170] sm:$0xff] }
 0x2f3   : > { %1602 = vst.msk [vmem:[#allocation2 + $0x70] sm:$0xff] %vm1594_vm10, %v1513_v27  ;;  %v1938_v27 = vrot.slane %v5127_v36, 1  ;;  %v5287_v39 = vmax.f32 %v1673_v14, 0.0  ;;  %v6758_v14 = vmax.f32 %v5308_v45, 0.0 }
 0x2f4   : > { %v1535_v49 = vpop.permute.xlu2 %1534 }
 0x2f5   : > { %1613 = vst.msk [vmem:[#allocation2 + $0x120] sm:$0xff] %vm1594_vm10, %v1535_v49  ;;  %v6753_v49 = vmax.f32 %v5265_v57, 0.0 }
 0x2f7   : > { %1809 = vrot.lane.b32.xlu1 %v5178_v46, %s3691_s6 }
 0x2f8   : > { %1807 = vrot.lane.b32.xlu0 %v5181_v54, %s3691_s6 }
 0x2f9   : > { %v1521_v63 = vpop.permute.xlu1 %1520 }
 0x2fa   : > { %1606 = vst.msk [vmem:[#allocation2 + $0xb0] sm:$0xff] %vm1594_vm10, %v1521_v63  ;;  %v1519_v30 = vpop.permute.xlu0 %1518  ;;  %1811 = vrot.lane.b32.xlu2 %v5184_v50, %s3691_s6  ;;  %v6759_v63 = vmax.f32 %v5252_v17, 0.0 }
 0x2fb   : > { %1605 = vst.msk [vmem:[#allocation2 + $0xa0] sm:$0xff] %vm1594_vm10, %v1519_v30  ;;  %v5280_v30 = vsel %vm407_vm0, %v1937_v37, %v1938_v27 }
 0x2fc   : > { %v1541_v52 = vpop.permute.xlu2 %1540  ;;  %6954 = vst [vmem:[#allocation23_spill] sm:$0xff] %v5280_v30 }
 0x2fd   : > { %1616 = vst.msk [vmem:[#allocation2 + $0x150] sm:$0xff] %vm1594_vm10, %v1541_v52  ;;  %v1935_v52 = vrot.slane %v6753_v49, 1 }
 0x2fe   : > { %2905 = vst.msk [vmem:[#allocation2 + $0x68] sm:$0xff] %vm326_vm1, %v5280_v30 }
 0x2ff   : > { %1815 = vrot.lane.b32.xlu1 %v5196_v15, %s3691_s6  ;;  %v5304_v58 = vsel %vm407_vm0, %v1933_v6, %v1935_v52 }
 0x300   : > { %1813 = vrot.lane.b32.xlu0 %v5201_v51, %s3691_s6  ;;  %6956 = vst [vmem:[#allocation35_spill] sm:$0xff] %v5304_v58 }
 0x301   : > { %v1527_v31 = vpop.permute.xlu1 %1526  ;;  %2904 = vst.msk [vmem:[#allocation2 + $0x58] sm:$0xff] %vm326_vm1, %v5304_v58 }
 0x302   : > { %1609 = vst.msk [vmem:[#allocation2 + $0xe0] sm:$0xff] %vm1594_vm10, %v1527_v31  ;;  %v1525_v23 = vpop.permute.xlu0 %1524  ;;  %1817 = vrot.lane.b32.xlu2 %v5207_v22, %s3691_s6  ;;  %v5294_v31 = vsel %vm407_vm0, %v1923_v41, %v1925_v38  ;;  %v1918_v38 = vrot.slane %v5070_v25, 1 }
 0x303   : > { %1608 = vst.msk [vmem:[#allocation2 + $0xd0] sm:$0xff] %vm1594_vm10, %v1525_v23  ;;  %v1915_v23 = vrot.slane %v6759_v63, 1  ;;  %v1957_v63 = vrot.slane %v5160_v1, 1 }
 0x304   : > { %v1547_v3 = vpop.permute.xlu2 %1546  ;;  %6955 = vst [vmem:[#allocation28_spill] sm:$0xff] %v5294_v31 }
 0x305   : > { %1619 = vst.msk [vmem:[#allocation2 + $0x180] sm:$0xff] %vm1594_vm10, %v1547_v3  ;;  %v1912_v3 = vrot.slane %v5054_v0, 1 }
 0x306   : > { %2900 = vst.msk [vmem:[#allocation2 + $0x18] sm:$0xff] %vm326_vm1, %v5294_v31 }
 0x307   : > { %1821 = vrot.lane.b32.xlu1 %v5224_v59, %s3691_s6 }
 0x308   : > { %1819 = vrot.lane.b32.xlu0 %v5229_v26, %s3691_s6 }
 0x309   : > { %v1533_v2 = vpop.permute.xlu1 %1532 }
 0x30a   : > { %1612 = vst.msk [vmem:[#allocation2 + $0x110] sm:$0xff] %vm1594_vm10, %v1533_v2  ;;  %v1531_v12 = vpop.permute.xlu0 %1530  ;;  %1823 = vrot.lane.b32.xlu2 %v5235_v56, %s3691_s6  ;;  %v6752_v2 = vmax.f32 %v5316_v16, 0.0 }
 0x30b   : > { %1611 = vst.msk [vmem:[#allocation2 + $0x100] sm:$0xff] %vm1594_vm10, %v1531_v12  ;;  %v1916_v12 = vsel %vm407_vm0, %v1913_v62, %v1915_v23  ;;  %v5333_v23 = vsel %vm407_vm0, %v1917_v40, %v1918_v38 }
 0x30c   : > { %v1553_v20 = vpop.permute.xlu2 %1552  ;;  %v1945_v52 = vrot.slane %v6752_v2, 1  ;;  %6957 = vst [vmem:[#allocation33_spill] sm:$0xff] %v5333_v23 }
 0x30d   : > { %1622 = vst.msk [vmem:[#allocation2 + $0x1b0] sm:$0xff] %vm1594_vm10, %v1553_v20  ;;  %v1914_v20 = vsel %vm407_vm0, %v1912_v3, %v1913_v62  ;;  %v1920_v3 = vrot.slane %v6758_v14, 1  ;;  %v1947_v14 = vrot.slane %v5145_v21, 1 }
 0x30e   : > { %v5336_v62 = vsel %vm407_vm0, %v1943_v55, %v1945_v52  ;;  %v5358_v52 = vld [vmem:[%s5039_s5 + $0xb8] sm:$0x3] }
 0x30f   : > { %1827 = vrot.lane.b32.xlu1 %v5257_v60, %s3691_s6  ;;  %6958 = vst [vmem:[#allocation40_spill] sm:$0xff] %v5336_v62  ;;  %v5366_v10 = vsel %vm407_vm0, %v1918_v38, %v1920_v3 }
 0x310   : > { %1825 = vrot.lane.b32.xlu0 %v5273_v33, %s3691_s6  ;;  %2908 = vst.msk [vmem:[#allocation2 + $0x98] sm:$0xff] %vm326_vm1, %v5336_v62 }
 0x311   : > { %v1539_v61 = vpop.permute.xlu1 %1538  ;;  %6961 = vst [vmem:[#allocation43_spill] sm:$0xff] %v5366_v10 }
 0x312   : > { %1615 = vst.msk [vmem:[#allocation2 + $0x140] sm:$0xff] %vm1594_vm10, %v1539_v61  ;;  %v1537_v41 = vpop.permute.xlu0 %1536  ;;  %1829 = vrot.lane.b32.xlu2 %v5287_v39, %s3691_s6  ;;  %v1932_v61 = vrot.slane %v5109_v28, 1 }
 0x313   : > { %1614 = vst.msk [vmem:[#allocation2 + $0x130] sm:$0xff] %vm1594_vm10, %v1537_v41  ;;  %v1942_v41 = vrot.slane %v5124_v24, 1 }
 0x314   : > { %v1559_v37 = vpop.permute.xlu2 %1558 }
 0x315   : > { %1625 = vst.msk [vmem:[#allocation2 + $0x1e0] sm:$0xff] %vm1594_vm10, %v1559_v37  ;;  %v5344_v37 = vsel %vm407_vm0, %v1932_v61, %v1933_v6  ;;  %v1952_v6 = vrot.slane %v5148_v48, 1  ;;  %v1953_v61 = vrot.slane %v5163_v7, 1 }
 0x316   : > { %6959 = vst [vmem:[#allocation38_spill] sm:$0xff] %v5344_v37 }
 0x317   : > { %1994 = vrot.lane.b32.xlu1 %v1916_v12, %s3692_s7  ;;  %2903 = vst.msk [vmem:[#allocation2 + $0x48] sm:$0xff] %vm326_vm1, %v5344_v37  ;;  %v5352_v12 = vsel %vm407_vm0, %v1942_v41, %v1943_v55  ;;  %v5372_v41 = vsel %vm407_vm0, %v1952_v6, %v1953_v61 }
 0x318   : > { %1992 = vrot.lane.b32.xlu0 %v1914_v20, %s3692_s7  ;;  %6960 = vst [vmem:[#allocation45_spill] sm:$0xff] %v5352_v12  ;;  %v5355_v20 = vld [vmem:[%s5039_s5 + $0x88] sm:$0x3] }
 0x319   : > { %v1545_v2 = vpop.permute.xlu1 %1544  ;;  %v6757_v49 = vmax.f32 %v5355_v20, 0.0  ;;  %2907 = vst.msk [vmem:[#allocation2 + $0x88] sm:$0xff] %vm326_vm1, %v5352_v12 }
 0x31a   : > { %1618 = vst.msk [vmem:[#allocation2 + $0x170] sm:$0xff] %vm1594_vm10, %v1545_v2  ;;  %v1543_v40 = vpop.permute.xlu0 %1542  ;;  %1996 = vrot.lane.b32.xlu2 %v5333_v23, %s3692_s7  ;;  %v6756_v2 = vmax.f32 %v5358_v52, 0.0 }
 0x31b   : > { %1617 = vst.msk [vmem:[#allocation2 + $0x160] sm:$0xff] %vm1594_vm10, %v1543_v40  ;;  %v1940_v40 = vrot.slane %v6757_v49, 1  ;;  %v1958_v49 = vrot.slane %v5166_v8, 1 }
 0x31c   : > { %v1770_v55 = vpop.permute.xlu2 %1769  ;;  %6962 = vst [vmem:[#allocation44_spill] sm:$0xff] %v5372_v41  ;;  %v1950_v38 = vrot.slane %v6756_v2, 1 }
 0x31d   : > { %1865 = vst.msk [vmem:[#allocation2 + $0x10] sm:$0xff] %vm1863_vm11, %v1770_v55  ;;  %v5386_v3 = vsel %vm407_vm0, %v1938_v27, %v1940_v40  ;;  %v5401_v27 = vld [vmem:[%s5039_s5 + $0xe8] sm:$0x3] }
 0x31e   : > { %2911 = vst.msk [vmem:[#allocation2 + $0xc8] sm:$0xff] %vm326_vm1, %v5372_v41  ;;  %v5393_v6 = vsel %vm407_vm0, %v1948_v53, %v1950_v38  ;;  %v6760_v40 = vmax.f32 %v5401_v27, 0.0 }
 0x31f   : > { %2000 = vrot.lane.b32.xlu1 %v5205_v44, %s3692_s7  ;;  %6963 = vst [vmem:[#allocation7_spill] sm:$0xff] %v5386_v3 }
 0x320   : > { %1998 = vrot.lane.b32.xlu0 %v5366_v10, %s3692_s7  ;;  %2906 = vst.msk [vmem:[#allocation2 + $0x78] sm:$0xff] %vm326_vm1, %v5386_v3 }
 0x321   : > { %6964 = vst [vmem:[#allocation8_spill] sm:$0xff] %v5393_v6  ;;  %v1551_v55 = vpop.permute.xlu1 %1550 }
 0x322   : > { %2910 = vst.msk [vmem:[#allocation2 + $0xb8] sm:$0xff] %vm326_vm1, %v5393_v6  ;;  %v1549_v2 = vpop.permute.xlu0 %1548  ;;  %2002 = vrot.lane.b32.xlu2 %v5294_v31, %s3692_s7 }
 0x323   : > { %1621 = vst.msk [vmem:[#allocation2 + $0x1a0] sm:$0xff] %vm1594_vm10, %v1551_v55  ;;  %v1960_v55 = vrot.slane %v6760_v40, 1 }
 0x324   : > { %1620 = vst.msk [vmem:[#allocation2 + $0x190] sm:$0xff] %vm1594_vm10, %v1549_v2  ;;  %v1776_v38 = vpop.permute.xlu2 %1775 }
 0x325   : > { %1868 = vst.msk [vmem:[#allocation2 + $0x40] sm:$0xff] %vm1863_vm11, %v1776_v38  ;;  %v5414_v2 = vsel %vm407_vm0, %v1958_v49, %v1960_v55  ;;  %v5421_v38 = vsel %vm407_vm0, %v1947_v14, %v1948_v53  ;;  %v5429_v55 = vsel %vm407_vm0, %v1957_v63, %v1958_v49  ;;  %v1967_v53 = vrot.slane %v5184_v50, 1 }
 0x326   : > { %6965 = vst [vmem:[#allocation6_spill] sm:$0xff] %v5414_v2  ;;  %v1968_v14 = vrot.slane %v5201_v51, 1 }
 0x327   : > { %2006 = vrot.lane.b32.xlu1 %v5241_v9, %s3692_s7  ;;  %2914 = vst.msk [vmem:[#allocation2 + $0xf8] sm:$0xff] %vm326_vm1, %v5414_v2  ;;  %v5432_v9 = vld [vmem:[%s5039_s5 + $0xd0] sm:$0x3] }
 0x328   : > { %2004 = vrot.lane.b32.xlu0 %v5248_v32, %s3692_s7  ;;  %6966 = vst [vmem:[#allocation10_spill] sm:$0xff] %v5421_v38  ;;  %v5435_v32 = vld [vmem:[%s5039_s5 + $0x100] sm:$0x3]  ;;  %v6767_v44 = vmax.f32 %v5432_v9, 0.0  ;;  %v5446_v49 = vsel %vm407_vm0, %v1967_v53, %v1968_v14 }
 0x329   : > { %v1557_v40 = vpop.permute.xlu1 %1556  ;;  %2909 = vst.msk [vmem:[#allocation2 + $0xa8] sm:$0xff] %vm326_vm1, %v5421_v38 }
 0x32a   : > { %1624 = vst.msk [vmem:[#allocation2 + $0x1d0] sm:$0xff] %vm1594_vm10, %v1557_v40  ;;  %v1555_v31 = vpop.permute.xlu0 %1554  ;;  %2008 = vrot.lane.b32.xlu2 %v5344_v37, %s3692_s7  ;;  %v6768_v40 = vmax.f32 %v5435_v32, 0.0  ;;  %v1955_v63 = vrot.slane %v6767_v44, 1 }
 0x32b   : > { %6967 = vst [vmem:[#allocation11_spill] sm:$0xff] %v5429_v55 }
 0x32c   : > { %1623 = vst.msk [vmem:[#allocation2 + $0x1c0] sm:$0xff] %vm1594_vm10, %v1555_v31  ;;  %v1782_v23 = vpop.permute.xlu2 %1781  ;;  %v1963_v31 = vrot.slane %v5178_v46, 1  ;;  %v1965_v37 = vrot.slane %v6768_v40, 1 }
 0x32d   : > { %2913 = vst.msk [vmem:[#allocation2 + $0xe8] sm:$0xff] %vm326_vm1, %v5429_v55 }
 0x32e   : > { %1871 = vst.msk [vmem:[#allocation2 + $0x70] sm:$0xff] %vm1863_vm11, %v1782_v23  ;;  %v5458_v23 = vsel %vm407_vm0, %v1953_v61, %v1955_v63  ;;  %v5465_v53 = vsel %vm407_vm0, %v1963_v31, %v1965_v37  ;;  %v5473_v61 = vld [vmem:[%s5039_s5 + $0x130] sm:$0x3] }
 0x32f   : > { %2917 = vst.msk [vmem:[#allocation2 + $0x128] sm:$0xff] %vm326_vm1, %v5446_v49  ;;  %2012 = vrot.lane.b32.xlu1 %v5280_v30, %s3692_s7  ;;  %v6772_v63 = vmax.f32 %v5473_v61, 0.0  ;;  %v1973_v30 = vrot.slane %v5207_v22, 1 }
 0x330   : > { %6968 = vst [vmem:[#allocation9_spill] sm:$0xff] %v5458_v23  ;;  %2010 = vrot.lane.b32.xlu0 %v5304_v58, %s3692_s7  ;;  %v1962_v58 = vrot.slane %v5181_v54, 1 }
 0x331   : > { %2912 = vst.msk [vmem:[#allocation2 + $0xd8] sm:$0xff] %vm326_vm1, %v5458_v23  ;;  %v1768_v44 = vpop.permute.xlu1 %1767 }
 0x332   : > { %2916 = vst.msk [vmem:[#allocation2 + $0x118] sm:$0xff] %vm326_vm1, %v5465_v53  ;;  %v1561_v40 = vpop.permute.xlu0 %1560  ;;  %2014 = vrot.lane.b32.xlu2 %v5386_v3, %s3692_s7  ;;  %v1972_v3 = vrot.slane %v5196_v15, 1 }
 0x333   : > { %1864 = vst.msk [vmem:[#allocation2] sm:$0xff] %vm1863_vm11, %v1768_v44  ;;  %v1975_v44 = vrot.slane %v6772_v63, 1 }
 0x334   : > { %6969 = vst [vmem:[#allocation13_spill] sm:$0xff] %v5473_v61  ;;  %v1788_v37 = vpop.permute.xlu2 %1787 }
 0x335   : > { %1626 = vst.msk [vmem:[#allocation2 + $0x1f0] sm:$0xff] %vm1594_vm10, %v1561_v40  ;;  %v5486_v40 = vsel %vm407_vm0, %v1973_v30, %v1975_v44  ;;  %v5501_v44 = vsel %vm407_vm0, %v1972_v3, %v1973_v30  ;;  %v1978_v3 = vrot.slane %v5224_v59, 1 }
 0x336   : > { %1874 = vst.msk [vmem:[#allocation2 + $0xa0] sm:$0xff] %vm1863_vm11, %v1788_v37  ;;  %v5493_v37 = vsel %vm407_vm0, %v1962_v58, %v1963_v31  ;;  %v1982_v58 = vrot.slane %v5235_v56, 1  ;;  %v1983_v31 = vrot.slane %v5273_v33, 1 }
 0x337   : > { %2018 = vrot.lane.b32.xlu1 %v5336_v62, %s3692_s7  ;;  %2920 = vst.msk [vmem:[#allocation2 + $0x158] sm:$0xff] %vm326_vm1, %v5486_v40  ;;  %v5504_v62 = vld [vmem:[%s5039_s5 + $0x118] sm:$0x3] }
 0x338   : > { %2016 = vrot.lane.b32.xlu0 %v5352_v12, %s3692_s7  ;;  %6970 = vst [vmem:[#allocation14_spill] sm:$0xff] %v5493_v37  ;;  %v5507_v12 = vld [vmem:[%s5039_s5 + $0x148] sm:$0x3]  ;;  %v6780_v61 = vmax.f32 %v5504_v62, 0.0  ;;  %v5518_v30 = vsel %vm407_vm0, %v1982_v58, %v1983_v31 }
 0x339   : > { %v1774_v63 = vpop.permute.xlu1 %1773  ;;  %2915 = vst.msk [vmem:[#allocation2 + $0x108] sm:$0xff] %vm326_vm1, %v5493_v37 }
 0x33a   : > { %1867 = vst.msk [vmem:[#allocation2 + $0x30] sm:$0xff] %vm1863_vm11, %v1774_v63  ;;  %v1772_v10 = vpop.permute.xlu0 %1771  ;;  %2020 = vrot.lane.b32.xlu2 %v5421_v38, %s3692_s7  ;;  %v6781_v63 = vmax.f32 %v5507_v12, 0.0 }
 0x33b   : > { %1866 = vst.msk [vmem:[#allocation2 + $0x20] sm:$0xff] %vm1863_vm11, %v1772_v10  ;;  %v1970_v10 = vrot.slane %v6780_v61, 1 }
 0x33c   : > { %v1794_v22 = vpop.permute.xlu2 %1793  ;;  %2919 = vst.msk [vmem:[#allocation2 + $0x148] sm:$0xff] %vm326_vm1, %v5501_v44  ;;  %v1980_v38 = vrot.slane %v6781_v63, 1 }
 0x33d   : > { %1877 = vst.msk [vmem:[#allocation2 + $0xd0] sm:$0xff] %vm1863_vm11, %v1794_v22  ;;  %v5530_v22 = vsel %vm407_vm0, %v1968_v14, %v1970_v10  ;;  %v5545_v14 = vld [vmem:[%s5039_s5 + $0x178] sm:$0x3] }
 0x33e   : > { %6971 = vst [vmem:[#allocation12_spill] sm:$0xff] %v5518_v30  ;;  %v5537_v58 = vsel %vm407_vm0, %v1978_v3, %v1980_v38  ;;  %v6785_v10 = vmax.f32 %v5545_v14, 0.0 }
 0x33f   : > { %2923 = vst.msk [vmem:[#allocation2 + $0x188] sm:$0xff] %vm326_vm1, %v5518_v30  ;;  %2024 = vrot.lane.b32.xlu1 %v5372_v41, %s3692_s7  ;;  %v1988_v41 = vrot.slane %v5287_v39, 1 }
 0x340   : > { %2022 = vrot.lane.b32.xlu0 %v5393_v6, %s3692_s7  ;;  %2918 = vst.msk [vmem:[#allocation2 + $0x138] sm:$0xff] %vm326_vm1, %v5530_v22  ;;  %v1990_v6 = vrot.slane %v6785_v10, 1 }
 0x341   : > { %v1780_v61 = vpop.permute.xlu1 %1779  ;;  %2922 = vst.msk [vmem:[#allocation2 + $0x178] sm:$0xff] %vm326_vm1, %v5537_v58 }
 0x342   : > { %1870 = vst.msk [vmem:[#allocation2 + $0x60] sm:$0xff] %vm1863_vm11, %v1780_v61  ;;  %v1778_v63 = vpop.permute.xlu0 %1777  ;;  %2026 = vrot.lane.b32.xlu2 %v5458_v23, %s3692_s7  ;;  %v1977_v61 = vrot.slane %v5229_v26, 1  ;;  %v5557_v23 = vsel %vm407_vm0, %v1988_v41, %v1990_v6  ;;  %v5573_v6 = vld [vmem:[%s5039_s5 + $0x160] sm:$0x3] }
 0x343   : > { %1869 = vst.msk [vmem:[#allocation2 + $0x50] sm:$0xff] %vm1863_vm11, %v1778_v63  ;;  %v1987_v63 = vrot.slane %v5257_v60, 1 }
 0x344   : > { %v1800_v38 = vpop.permute.xlu2 %1799  ;;  %6972 = vst [vmem:[#allocation16_spill] sm:$0xff] %v5557_v23 }
 0x345   : > { %1880 = vst.msk [vmem:[#allocation2 + $0x100] sm:$0xff] %vm1863_vm11, %v1800_v38  ;;  %v5565_v38 = vsel %vm407_vm0, %v1977_v61, %v1978_v3  ;;  %v6789_v3 = vmax.f32 %v5573_v6, 0.0 }
 0x346   : > { %2926 = vst.msk [vmem:[#allocation2 + $0x1b8] sm:$0xff] %vm326_vm1, %v5557_v23 }
 0x347   : > { %2030 = vrot.lane.b32.xlu1 %v5414_v2, %s3692_s7  ;;  %2921 = vst.msk [vmem:[#allocation2 + $0x168] sm:$0xff] %vm326_vm1, %v5565_v38 }
 0x348   : > { %2028 = vrot.lane.b32.xlu0 %v5429_v55, %s3692_s7  ;;  %v5577_v55 = vsel %vm407_vm0, %v1987_v63, %v1988_v41 }
 0x349   : > { %v1786_v10 = vpop.permute.xlu1 %1785  ;;  %6973 = vst [vmem:[#allocation17_spill] sm:$0xff] %v5577_v55 }
 0x34a   : > { %1873 = vst.msk [vmem:[#allocation2 + $0x90] sm:$0xff] %vm1863_vm11, %v1786_v10  ;;  %v1784_v2 = vpop.permute.xlu0 %1783  ;;  %2032 = vrot.lane.b32.xlu2 %v5493_v37, %s3692_s7  ;;  %v1985_v10 = vrot.slane %v6789_v3, 1  ;;  %v2127_v3 = vrot.slane %v5070_v25, 2 }
 0x34b   : > { %1872 = vst.msk [vmem:[#allocation2 + $0x80] sm:$0xff] %vm1863_vm11, %v1784_v2 }
 0x34c   : > { %v1806_v61 = vpop.permute.xlu2 %1805  ;;  %2925 = vst.msk [vmem:[#allocation2 + $0x1a8] sm:$0xff] %vm326_vm1, %v5577_v55  ;;  %v5588_v37 = vsel %vm407_vm0, %v1983_v31, %v1985_v10 }
 0x34d   : > { %1883 = vst.msk [vmem:[#allocation2 + $0x130] sm:$0xff] %vm1863_vm11, %v1806_v61 }
 0x34e   : > { %6974 = vst [vmem:[#allocation15_spill] sm:$0xff] %v5588_v37 }
 0x34f   : > { %2036 = vrot.lane.b32.xlu1 %v5446_v49, %s3692_s7  ;;  %2924 = vst.msk [vmem:[#allocation2 + $0x198] sm:$0xff] %vm326_vm1, %v5588_v37 }
 0x350   : > { %2034 = vrot.lane.b32.xlu0 %v5465_v53, %s3692_s7 }
 0x351   : > { %v1792_v41 = vpop.permute.xlu1 %1791 }
 0x352   : > { %1876 = vst.msk [vmem:[#allocation2 + $0xc0] sm:$0xff] %vm1863_vm11, %v1792_v41  ;;  %v1790_v2 = vpop.permute.xlu0 %1789  ;;  %2038 = vrot.lane.b32.xlu2 %v5530_v22, %s3692_s7 }
 0x353   : > { %1875 = vst.msk [vmem:[#allocation2 + $0xb0] sm:$0xff] %vm1863_vm11, %v1790_v2 }
 0x354   : > { %v1812_v63 = vpop.permute.xlu2 %1811 }
 0x355   : > { %1886 = vst.msk [vmem:[#allocation2 + $0x160] sm:$0xff] %vm1863_vm11, %v1812_v63  ;;  %v2121_v63 = vrot.slane %v5054_v0, 2  ;;  %v6975_v0 = vmax.f32 %v5252_v17, 0.0 }
 0x357   : > { %2042 = vrot.lane.b32.xlu1 %v5486_v40, %s3692_s7 }
 0x358   : > { %2040 = vrot.lane.b32.xlu0 %v5501_v44, %s3692_s7 }
 0x359   : > { %v1798_v31 = vpop.permute.xlu1 %1797 }
 0x35a   : > { %1879 = vst.msk [vmem:[#allocation2 + $0xf0] sm:$0xff] %vm1863_vm11, %v1798_v31  ;;  %v1796_v61 = vpop.permute.xlu0 %1795  ;;  %2044 = vrot.lane.b32.xlu2 %v5565_v38, %s3692_s7 }
 0x35b   : > { %1878 = vst.msk [vmem:[#allocation2 + $0xe0] sm:$0xff] %vm1863_vm11, %v1796_v61  ;;  %v2122_v61 = vrot.slane %v5059_v18, 2 }
 0x35c   : > { %v1818_v10 = vpop.permute.xlu2 %1817 }
 0x35d   : > { %1889 = vst.msk [vmem:[#allocation2 + $0x190] sm:$0xff] %vm1863_vm11, %v1818_v10  ;;  %v2123_v10 = vsel %vm617_vm2, %v2121_v63, %v2122_v61  ;;  %v6976_v63 = vmax.f32 %v5308_v45, 0.0  ;;  %v6978_v45 = vmax.f32 %v5262_v4, 0.0 }
 0x35f   : > { %2048 = vrot.lane.b32.xlu1 %v5518_v30, %s3692_s7 }
 0x360   : > { %2046 = vrot.lane.b32.xlu0 %v5537_v58, %s3692_s7 }
 0x361   : > { %v1804_v41 = vpop.permute.xlu1 %1803 }
 0x362   : > { %1882 = vst.msk [vmem:[#allocation2 + $0x120] sm:$0xff] %vm1863_vm11, %v1804_v41  ;;  %v1802_v2 = vpop.permute.xlu0 %1801  ;;  %2050 = vrot.lane.b32.xlu2 %v5588_v37, %s3692_s7  ;;  %v2126_v41 = vrot.slane %v5073_v19, 2  ;;  %v2124_v37 = vrot.slane %v6975_v0, 2  ;;  %v2131_v0 = vrot.slane %v5076_v34, 2 }
 0x363   : > { %1881 = vst.msk [vmem:[#allocation2 + $0x110] sm:$0xff] %vm1863_vm11, %v1802_v2 }
 0x364   : > { %v1824_v31 = vpop.permute.xlu2 %1823  ;;  %v2125_v30 = vsel %vm617_vm2, %v2122_v61, %v2124_v37  ;;  %v2137_v61 = vrot.slane %v5094_v13, 2 }
 0x365   : > { %1892 = vst.msk [vmem:[#allocation2 + $0x1c0] sm:$0xff] %vm1863_vm11, %v1824_v31  ;;  %v2129_v31 = vrot.slane %v6976_v63, 2  ;;  %v2141_v63 = vrot.slane %v5109_v28, 2 }
 0x367   : > { %2054 = vrot.lane.b32.xlu1 %v5557_v23, %s3692_s7  ;;  %v5634_v23 = vsel %vm617_vm2, %v2126_v41, %v2127_v3  ;;  %v5641_v17 = vsel %vm617_vm2, %v2127_v3, %v2129_v31  ;;  %v2142_v31 = vrot.slane %v5106_v42, 2 }
 0x368   : > { %2052 = vrot.lane.b32.xlu0 %v5577_v55, %s3692_s7  ;;  %6977 = vst [vmem:[#allocation19_spill] sm:$0xff] %v5641_v17 }
 0x369   : > { %v1810_v2 = vpop.permute.xlu1 %1809 }
 0x36a   : > { %1885 = vst.msk [vmem:[#allocation2 + $0x150] sm:$0xff] %vm1863_vm11, %v1810_v2  ;;  %v1808_v18 = vpop.permute.xlu0 %1807  ;;  %2201 = vrot.lane.b32.xlu2 %v2123_v10, %s3693_s8  ;;  %v2132_v10 = vrot.slane %v5091_v5, 2  ;;  %v2134_v2 = vrot.slane %v6978_v45, 2 }
 0x36b   : > { %1884 = vst.msk [vmem:[#allocation2 + $0x140] sm:$0xff] %vm1863_vm11, %v1808_v18 }
 0x36c   : > { %v1830_v55 = vpop.permute.xlu2 %1829  ;;  %v5657_v4 = vsel %vm617_vm2, %v2131_v0, %v2132_v10  ;;  %v6980_v0 = vmax.f32 %v5265_v57, 0.0  ;;  %v2147_v57 = vrot.slane %v5127_v36, 2 }
 0x36d   : > { %1895 = vst.msk [vmem:[#allocation2 + $0x1f0] sm:$0xff] %vm1863_vm11, %v1830_v55  ;;  %v2136_v55 = vrot.slane %v5088_v47, 2 }
 0x36f   : > { %2205 = vrot.lane.b32.xlu1 %v5634_v23, %s3693_s8  ;;  %v5664_v18 = vsel %vm617_vm2, %v2136_v55, %v2137_v61  ;;  %v5679_v55 = vsel %vm617_vm2, %v2141_v63, %v2142_v31  ;;  %v6983_v63 = vmax.f32 %v5355_v20, 0.0 }
 0x370   : > { %2203 = vrot.lane.b32.xlu0 %v2125_v30, %s3693_s8  ;;  %v5654_v30 = vsel %vm617_vm2, %v2132_v10, %v2134_v2  ;;  %v6979_v10 = vmax.f32 %v5221_v11, 0.0  ;;  %6981 = vst [vmem:[#allocation18_spill] sm:$0xff] %v5679_v55 }
 0x371   : > { %v1816_v41 = vpop.permute.xlu1 %1815 }
 0x372   : > { %1888 = vst.msk [vmem:[#allocation2 + $0x180] sm:$0xff] %vm1863_vm11, %v1816_v41  ;;  %v1814_v37 = vpop.permute.xlu0 %1813  ;;  %2207 = vrot.lane.b32.xlu2 %v5641_v17, %s3693_s8  ;;  %v2139_v2 = vrot.slane %v6979_v10, 2 }
 0x373   : > { %1887 = vst.msk [vmem:[#allocation2 + $0x170] sm:$0xff] %vm1863_vm11, %v1814_v37  ;;  %v2144_v37 = vrot.slane %v6980_v0, 2 }
 0x374   : > { %v1997_v3 = vpop.permute.xlu2 %1996  ;;  %v5682_v17 = vsel %vm617_vm2, %v2137_v61, %v2139_v2  ;;  %v2146_v61 = vrot.slane %v5112_v29, 2 }
 0x375   : > { %2091 = vst.msk [vmem:[#allocation2 + $0x20] sm:$0xff] %vm2088_vm12, %v1997_v3  ;;  %v5688_v11 = vsel %vm617_vm2, %v2142_v31, %v2144_v37  ;;  %v2151_v31 = vrot.slane %v5124_v24, 2  ;;  %v2152_v37 = vrot.slane %v5130_v35, 2 }
 0x376   : > { %6982 = vst [vmem:[#allocation22_spill] sm:$0xff] %v5688_v11  ;;  %v5705_v20 = vsel %vm617_vm2, %v2146_v61, %v2147_v57 }
 0x377   : > { %2211 = vrot.lane.b32.xlu1 %v5654_v30, %s3693_s8  ;;  %6985 = vst [vmem:[#allocation25_spill] sm:$0xff] %v5705_v20 }
 0x378   : > { %2209 = vrot.lane.b32.xlu0 %v5657_v4, %s3693_s8 }
 0x379   : > { %v1822_v45 = vpop.permute.xlu1 %1821 }
 0x37a   : > { %1891 = vst.msk [vmem:[#allocation2 + $0x1b0] sm:$0xff] %vm1863_vm11, %v1822_v45  ;;  %v1820_v41 = vpop.permute.xlu0 %1819  ;;  %2213 = vrot.lane.b32.xlu2 %v5664_v18, %s3693_s8  ;;  %v2149_v45 = vrot.slane %v6983_v63, 2  ;;  %v2156_v63 = vrot.slane %v5145_v21, 2 }
 0x37b   : > { %1890 = vst.msk [vmem:[#allocation2 + $0x1a0] sm:$0xff] %vm1863_vm11, %v1820_v41 }
 0x37c   : > { %v2003_v3 = vpop.permute.xlu2 %2002  ;;  %v5702_v41 = vsel %vm617_vm2, %v2147_v57, %v2149_v45  ;;  %v2157_v45 = vrot.slane %v5142_v43, 2  ;;  %v6987_v57 = vmax.f32 %v5316_v16, 0.0 }
 0x37d   : > { %2094 = vst.msk [vmem:[#allocation2 + $0x50] sm:$0xff] %vm2088_vm12, %v2003_v3  ;;  %v5712_v3 = vsel %vm617_vm2, %v2151_v31, %v2152_v37  ;;  %v6988_v31 = vmax.f32 %v5358_v52, 0.0  ;;  %v2162_v52 = vrot.slane %v5163_v7, 2 }
 0x37e   : > { %6984 = vst [vmem:[#allocation21_spill] sm:$0xff] %v5702_v41  ;;  %v2154_v61 = vrot.slane %v6987_v57, 2 }
 0x37f   : > { %2217 = vrot.lane.b32.xlu1 %v5679_v55, %s3693_s8  ;;  %6986 = vst [vmem:[#allocation26_spill] sm:$0xff] %v5712_v3 }
 0x380   : > { %2215 = vrot.lane.b32.xlu0 %v5682_v17, %s3693_s8 }
 0x381   : > { %v1828_v10 = vpop.permute.xlu1 %1827 }
 0x382   : > { %1894 = vst.msk [vmem:[#allocation2 + $0x1e0] sm:$0xff] %vm1863_vm11, %v1828_v10  ;;  %v1826_v2 = vpop.permute.xlu0 %1825  ;;  %2219 = vrot.lane.b32.xlu2 %v5688_v11, %s3693_s8  ;;  %v5730_v11 = vsel %vm617_vm2, %v2152_v37, %v2154_v61  ;;  %v2161_v37 = vrot.slane %v5148_v48, 2 }
 0x383   : > { %1893 = vst.msk [vmem:[#allocation2 + $0x1d0] sm:$0xff] %vm1863_vm11, %v1826_v2 }
 0x384   : > { %v2009_v0 = vpop.permute.xlu2 %2008  ;;  %6990 = vst [vmem:[#allocation27_spill] sm:$0xff] %v5730_v11 }
 0x385   : > { %2097 = vst.msk [vmem:[#allocation2 + $0x80] sm:$0xff] %vm2088_vm12, %v2009_v0  ;;  %v2159_v0 = vrot.slane %v6988_v31, 2  ;;  %v2167_v31 = vrot.slane %v5166_v8, 2 }
 0x387   : > { %2223 = vrot.lane.b32.xlu1 %v5702_v41, %s3693_s8  ;;  %v5727_v41 = vsel %vm617_vm2, %v2156_v63, %v2157_v45  ;;  %v5736_v16 = vsel %vm617_vm2, %v2157_v45, %v2159_v0  ;;  %v6992_v63 = vmax.f32 %v5432_v9, 0.0  ;;  %v2166_v45 = vrot.slane %v5160_v1, 2 }
 0x388   : > { %2221 = vrot.lane.b32.xlu0 %v5705_v20, %s3693_s8  ;;  %6989 = vst [vmem:[#allocation24_spill] sm:$0xff] %v5727_v41  ;;  %v5753_v9 = vsel %vm617_vm2, %v2161_v37, %v2162_v52 }
 0x389   : > { %v1995_v10 = vpop.permute.xlu1 %1994  ;;  %6991 = vst [vmem:[#allocation30_spill] sm:$0xff] %v5736_v16  ;;  %v5760_v0 = vsel %vm617_vm2, %v2166_v45, %v2167_v31  ;;  %v6995_v45 = vmax.f32 %v5435_v32, 0.0  ;;  %v2177_v32 = vrot.slane %v5201_v51, 2 }
 0x38a   : > { %2090 = vst.msk [vmem:[#allocation2 + $0x10] sm:$0xff] %vm2088_vm12, %v1995_v10  ;;  %v1993_v2 = vpop.permute.xlu0 %1992  ;;  %2225 = vrot.lane.b32.xlu2 %v5712_v3, %s3693_s8  ;;  %v2164_v10 = vrot.slane %v6992_v63, 2  ;;  %v2171_v63 = vrot.slane %v5181_v54, 2 }
 0x38b   : > { %2089 = vst.msk [vmem:[#allocation2] sm:$0xff] %vm2088_vm12, %v1993_v2 }
 0x38c   : > { %v2015_v20 = vpop.permute.xlu2 %2014  ;;  %v5750_v61 = vsel %vm617_vm2, %v2162_v52, %v2164_v10  ;;  %6993 = vst [vmem:[#allocation29_spill] sm:$0xff] %v5753_v9  ;;  %v2172_v10 = vrot.slane %v5178_v46, 2  ;;  %v6994_v52 = vmax.f32 %v5401_v27, 0.0 }
 0x38d   : > { %2100 = vst.msk [vmem:[#allocation2 + $0xb0] sm:$0xff] %vm2088_vm12, %v2015_v20 }
 0x38e   : > { %v2169_v37 = vrot.slane %v6994_v52, 2 }
 0x38f   : > { %2229 = vrot.lane.b32.xlu1 %v5727_v41, %s3693_s8 }
 0x390   : > { %2227 = vrot.lane.b32.xlu0 %v5730_v11, %s3693_s8  ;;  %v5778_v41 = vsel %vm617_vm2, %v2167_v31, %v2169_v37  ;;  %v2176_v31 = vrot.slane %v5184_v50, 2 }
 0x391   : > { %v2001_v57 = vpop.permute.xlu1 %2000 }
 0x392   : > { %2093 = vst.msk [vmem:[#allocation2 + $0x40] sm:$0xff] %vm2088_vm12, %v2001_v57  ;;  %v1999_v20 = vpop.permute.xlu0 %1998  ;;  %2231 = vrot.lane.b32.xlu2 %v5736_v16, %s3693_s8 }
 0x393   : > { %2092 = vst.msk [vmem:[#allocation2 + $0x30] sm:$0xff] %vm2088_vm12, %v1999_v20 }
 0x394   : > { %v2021_v2 = vpop.permute.xlu2 %2020 }
 0x395   : > { %2103 = vst.msk [vmem:[#allocation2 + $0xe0] sm:$0xff] %vm2088_vm12, %v2021_v2  ;;  %v2174_v2 = vrot.slane %v6995_v45, 2  ;;  %v6999_v45 = vld [vmem:[#allocation4_spill] sm:$0xff] }
 0x397   : > { %2235 = vrot.lane.b32.xlu1 %v5750_v61, %s3693_s8  ;;  %v5784_v27 = vsel %vm617_vm2, %v2172_v10, %v2174_v2  ;;  %v2182_v2 = vrot.slane %v6999_v45, 2 }
 0x398   : > { %2233 = vrot.lane.b32.xlu0 %v5753_v9, %s3693_s8  ;;  %v5775_v9 = vsel %vm617_vm2, %v2171_v63, %v2172_v10  ;;  %6996 = vst [vmem:[#allocation32_spill] sm:$0xff] %v5784_v27  ;;  %v6997_v63 = vmax.f32 %v5504_v62, 0.0  ;;  %v2181_v10 = vrot.slane %v5196_v15, 2  ;;  %v5801_v62 = vsel %vm617_vm2, %v2176_v31, %v2177_v32 }
 0x399   : > { %v2007_v57 = vpop.permute.xlu1 %2006 }
 0x39a   : > { %2096 = vst.msk [vmem:[#allocation2 + $0x70] sm:$0xff] %vm2088_vm12, %v2007_v57  ;;  %v2005_v20 = vpop.permute.xlu0 %2004  ;;  %2237 = vrot.lane.b32.xlu2 %v5760_v0, %s3693_s8  ;;  %v2179_v57 = vrot.slane %v6997_v63, 2  ;;  %v5808_v63 = vsel %vm617_vm2, %v2181_v10, %v2182_v2  ;;  %v7002_v10 = vmax.f32 %v5507_v12, 0.0  ;;  %v2192_v12 = vrot.slane %v5273_v33, 2 }
 0x39b   : > { %2095 = vst.msk [vmem:[#allocation2 + $0x60] sm:$0xff] %vm2088_vm12, %v2005_v20 }
 0x39c   : > { %v2027_v16 = vpop.permute.xlu2 %2026  ;;  %v5798_v37 = vsel %vm617_vm2, %v2177_v32, %v2179_v57  ;;  %v2186_v57 = vrot.slane %v5229_v26, 2  ;;  %v7000_v32 = vld [vmem:[#allocation13_spill] sm:$0xff]  ;;  %v2189_v3 = vrot.slane %v7002_v10, 2 }
 0x39d   : > { %2106 = vst.msk [vmem:[#allocation2 + $0x110] sm:$0xff] %vm2088_vm12, %v2027_v16  ;;  %v7001_v31 = vmax.f32 %v7000_v32, 0.0 }
 0x39e   : > { %6998 = vst [vmem:[#allocation31_spill] sm:$0xff] %v5798_v37 }
 0x39f   : > { %2241 = vrot.lane.b32.xlu1 %v5775_v9, %s3693_s8  ;;  %v2184_v11 = vrot.slane %v7001_v31, 2 }
 0x3a0   : > { %2239 = vrot.lane.b32.xlu0 %v5778_v41, %s3693_s8 }
 0x3a1   : > { %v2013_v52 = vpop.permute.xlu1 %2012  ;;  %v5826_v55 = vsel %vm617_vm2, %v2182_v2, %v2184_v11  ;;  %v2191_v11 = vrot.slane %v5235_v56, 2 }
 0x3a2   : > { %2099 = vst.msk [vmem:[#allocation2 + $0xa0] sm:$0xff] %vm2088_vm12, %v2013_v52  ;;  %v2011_v16 = vpop.permute.xlu0 %2010  ;;  %2243 = vrot.lane.b32.xlu2 %v5784_v27, %s3693_s8  ;;  %v2187_v52 = vrot.slane %v5224_v59, 2 }
 0x3a3   : > { %2098 = vst.msk [vmem:[#allocation2 + $0x90] sm:$0xff] %vm2088_vm12, %v2011_v16 }
 0x3a4   : > { %v2033_v20 = vpop.permute.xlu2 %2032  ;;  %v5823_v27 = vsel %vm617_vm2, %v2186_v57, %v2187_v52  ;;  %v7003_v57 = vmax.f32 %v5573_v6, 0.0  ;;  %v5849_v6 = vsel %vm617_vm2, %v2191_v11, %v2192_v12 }
 0x3a5   : > { %2109 = vst.msk [vmem:[#allocation2 + $0x140] sm:$0xff] %vm2088_vm12, %v2033_v20 }
 0x3a6   : > { %v2194_v32 = vrot.slane %v7003_v57, 2 }
 0x3a7   : > { %2247 = vrot.lane.b32.xlu1 %v5798_v37, %s3693_s8 }
 0x3a8   : > { %2245 = vrot.lane.b32.xlu0 %v5801_v62, %s3693_s8  ;;  %v5846_v2 = vsel %vm617_vm2, %v2192_v12, %v2194_v32  ;;  %v7004_v32 = vmax.f32 %v5545_v14, 0.0 }
 0x3a9   : > { %v2019_v16 = vpop.permute.xlu1 %2018 }
 0x3aa   : > { %2102 = vst.msk [vmem:[#allocation2 + $0xd0] sm:$0xff] %vm2088_vm12, %v2019_v16  ;;  %v2017_v20 = vpop.permute.xlu0 %2016  ;;  %2249 = vrot.lane.b32.xlu2 %v5808_v63, %s3693_s8  ;;  %v5832_v16 = vsel %vm617_vm2, %v2187_v52, %v2189_v3  ;;  %v2196_v3 = vrot.slane %v5257_v60, 2 }
 0x3ab   : > { %2101 = vst.msk [vmem:[#allocation2 + $0xc0] sm:$0xff] %vm2088_vm12, %v2017_v20  ;;  %v2197_v20 = vrot.slane %v5287_v39, 2 }
 0x3ac   : > { %v2039_v37 = vpop.permute.xlu2 %2038 }
 0x3ad   : > { %2112 = vst.msk [vmem:[#allocation2 + $0x170] sm:$0xff] %vm2088_vm12, %v2039_v37  ;;  %v5856_v10 = vsel %vm617_vm2, %v2196_v3, %v2197_v20 }
 0x3af   : > { %2253 = vrot.lane.b32.xlu1 %v5823_v27, %s3693_s8 }
 0x3b0   : > { %2251 = vrot.lane.b32.xlu0 %v5826_v55, %s3693_s8 }
 0x3b1   : > { %v2025_v31 = vpop.permute.xlu1 %2024 }
 0x3b2   : > { %2105 = vst.msk [vmem:[#allocation2 + $0x100] sm:$0xff] %vm2088_vm12, %v2025_v31  ;;  %v2023_v37 = vpop.permute.xlu0 %2022  ;;  %2255 = vrot.lane.b32.xlu2 %v5832_v16, %s3693_s8  ;;  %v2199_v31 = vrot.slane %v7004_v32, 2 }
 0x3b3   : > { %2104 = vst.msk [vmem:[#allocation2 + $0xf0] sm:$0xff] %vm2088_vm12, %v2023_v37 }
 0x3b4   : > { %v2045_v52 = vpop.permute.xlu2 %2044  ;;  %v5867_v37 = vsel %vm617_vm2, %v2197_v20, %v2199_v31 }
 0x3b5   : > { %2115 = vst.msk [vmem:[#allocation2 + $0x1a0] sm:$0xff] %vm2088_vm12, %v2045_v52 }
 0x3b7   : > { %2259 = vrot.lane.b32.xlu1 %v5846_v2, %s3693_s8 }
 0x3b8   : > { %2257 = vrot.lane.b32.xlu0 %v5849_v6, %s3693_s8 }
 0x3b9   : > { %v2031_v57 = vpop.permute.xlu1 %2030 }
 0x3ba   : > { %2108 = vst.msk [vmem:[#allocation2 + $0x130] sm:$0xff] %vm2088_vm12, %v2031_v57  ;;  %v2029_v12 = vpop.permute.xlu0 %2028  ;;  %2261 = vrot.lane.b32.xlu2 %v5856_v10, %s3693_s8 }
 0x3bb   : > { %2107 = vst.msk [vmem:[#allocation2 + $0x120] sm:$0xff] %vm2088_vm12, %v2029_v12 }
 0x3bc   : > { %v2051_v11 = vpop.permute.xlu2 %2050 }
 0x3bd   : > { %2118 = vst.msk [vmem:[#allocation2 + $0x1d0] sm:$0xff] %vm2088_vm12, %v2051_v11 }
 0x3bf   : > { %2332 = vrot.lane.b32.xlu1 %v5073_v19, %s3694_s9 }
 0x3c0   : > { %2263 = vrot.lane.b32.xlu0 %v5867_v37, %s3693_s8 }
 0x3c1   : > { %v2037_v14 = vpop.permute.xlu1 %2036 }
 0x3c2   : > { %2111 = vst.msk [vmem:[#allocation2 + $0x160] sm:$0xff] %vm2088_vm12, %v2037_v14  ;;  %v2035_v3 = vpop.permute.xlu0 %2034  ;;  %2334 = vrot.lane.b32.xlu2 %v5070_v25, %s3694_s9 }
 0x3c3   : > { %2110 = vst.msk [vmem:[#allocation2 + $0x150] sm:$0xff] %vm2088_vm12, %v2035_v3 }
 0x3c4   : > { %v2202_v52 = vpop.permute.xlu2 %2201 }
 0x3c5   : > { %2298 = vst.msk [vmem:[#allocation2] sm:$0xff] %vm2297_vm13, %v2202_v52 }
 0x3c7   : > { %2338 = vrot.lane.b32.xlu1 %v5091_v5, %s3694_s9 }
 0x3c8   : > { %2336 = vrot.lane.b32.xlu0 %v5076_v34, %s3694_s9 }
 0x3c9   : > { %v2043_v19 = vpop.permute.xlu1 %2042 }
 0x3ca   : > { %2114 = vst.msk [vmem:[#allocation2 + $0x190] sm:$0xff] %vm2088_vm12, %v2043_v19  ;;  %v2041_v20 = vpop.permute.xlu0 %2040  ;;  %2340 = vrot.lane.b32.xlu2 %v5088_v47, %s3694_s9 }
 0x3cb   : > { %2113 = vst.msk [vmem:[#allocation2 + $0x180] sm:$0xff] %vm2088_vm12, %v2041_v20 }
 0x3cc   : > { %v2208_v25 = vpop.permute.xlu2 %2207 }
 0x3cd   : > { %2301 = vst.msk [vmem:[#allocation2 + $0x30] sm:$0xff] %vm2297_vm13, %v2208_v25 }
 0x3cf   : > { %2344 = vrot.lane.b32.xlu1 %v5109_v28, %s3694_s9 }
 0x3d0   : > { %2342 = vrot.lane.b32.xlu0 %v5094_v13, %s3694_s9 }
 0x3d1   : > { %v2049_v57 = vpop.permute.xlu1 %2048 }
 0x3d2   : > { %2117 = vst.msk [vmem:[#allocation2 + $0x1c0] sm:$0xff] %vm2088_vm12, %v2049_v57  ;;  %v2047_v32 = vpop.permute.xlu0 %2046  ;;  %2346 = vrot.lane.b32.xlu2 %v5106_v42, %s3694_s9 }
 0x3d3   : > { %2116 = vst.msk [vmem:[#allocation2 + $0x1b0] sm:$0xff] %vm2088_vm12, %v2047_v32 }
 0x3d4   : > { %v2214_v31 = vpop.permute.xlu2 %2213 }
 0x3d5   : > { %2304 = vst.msk [vmem:[#allocation2 + $0x60] sm:$0xff] %vm2297_vm13, %v2214_v31 }
 0x3d7   : > { %2350 = vrot.lane.b32.xlu1 %v5127_v36, %s3694_s9 }
 0x3d8   : > { %2348 = vrot.lane.b32.xlu0 %v5112_v29, %s3694_s9 }
 0x3d9   : > { %v2055_v12 = vpop.permute.xlu1 %2054 }
 0x3da   : > { %2120 = vst.msk [vmem:[#allocation2 + $0x1f0] sm:$0xff] %vm2088_vm12, %v2055_v12  ;;  %v2053_v11 = vpop.permute.xlu0 %2052  ;;  %2352 = vrot.lane.b32.xlu2 %v5124_v24, %s3694_s9 }
 0x3db   : > { %2119 = vst.msk [vmem:[#allocation2 + $0x1e0] sm:$0xff] %vm2088_vm12, %v2053_v11 }
 0x3dc   : > { %v2220_v14 = vpop.permute.xlu2 %2219 }
 0x3dd   : > { %2307 = vst.msk [vmem:[#allocation2 + $0x90] sm:$0xff] %vm2297_vm13, %v2220_v14 }
 0x3df   : > { %2356 = vrot.lane.b32.xlu1 %v5145_v21, %s3694_s9 }
 0x3e0   : > { %2354 = vrot.lane.b32.xlu0 %v5130_v35, %s3694_s9 }
 0x3e1   : > { %v2206_v3 = vpop.permute.xlu1 %2205 }
 0x3e2   : > { %2300 = vst.msk [vmem:[#allocation2 + $0x20] sm:$0xff] %vm2297_vm13, %v2206_v3  ;;  %v2204_v52 = vpop.permute.xlu0 %2203  ;;  %2358 = vrot.lane.b32.xlu2 %v5142_v43, %s3694_s9 }
 0x3e3   : > { %2299 = vst.msk [vmem:[#allocation2 + $0x10] sm:$0xff] %vm2297_vm13, %v2204_v52 }
 0x3e4   : > { %v2226_v19 = vpop.permute.xlu2 %2225 }
 0x3e5   : > { %2310 = vst.msk [vmem:[#allocation2 + $0xc0] sm:$0xff] %vm2297_vm13, %v2226_v19 }
 0x3e7   : > { %2362 = vrot.lane.b32.xlu1 %v5163_v7, %s3694_s9 }
 0x3e8   : > { %2360 = vrot.lane.b32.xlu0 %v5148_v48, %s3694_s9 }
 0x3e9   : > { %v2212_v20 = vpop.permute.xlu1 %2211 }
 0x3ea   : > { %2303 = vst.msk [vmem:[#allocation2 + $0x50] sm:$0xff] %vm2297_vm13, %v2212_v20  ;;  %v2210_v25 = vpop.permute.xlu0 %2209  ;;  %2364 = vrot.lane.b32.xlu2 %v5160_v1, %s3694_s9 }
 0x3eb   : > { %2302 = vst.msk [vmem:[#allocation2 + $0x40] sm:$0xff] %vm2297_vm13, %v2210_v25  ;;  %v1675_v25 = vld [vmem:[%s5039_s5 + $0x180] sm:$0xff] }
 0x3ec   : > { %v2232_v57 = vpop.permute.xlu2 %2231 }
 0x3ed   : > { %2313 = vst.msk [vmem:[#allocation2 + $0xf0] sm:$0xff] %vm2297_vm13, %v2232_v57 }
 0x3ef   : > { %2368 = vrot.lane.b32.xlu1 %v5181_v54, %s3694_s9 }
 0x3f0   : > { %2366 = vrot.lane.b32.xlu0 %v5166_v8, %s3694_s9 }
 0x3f1   : > { %v2218_v32 = vpop.permute.xlu1 %2217 }
 0x3f2   : > { %2306 = vst.msk [vmem:[#allocation2 + $0x80] sm:$0xff] %vm2297_vm13, %v2218_v32  ;;  %v2216_v31 = vpop.permute.xlu0 %2215  ;;  %2370 = vrot.lane.b32.xlu2 %v5178_v46, %s3694_s9 }
 0x3f3   : > { %2305 = vst.msk [vmem:[#allocation2 + $0x70] sm:$0xff] %vm2297_vm13, %v2216_v31  ;;  %v5960_v31 = vmax.f32 %v1675_v25, 0.0  ;;  %v7006_v25 = vld [vmem:[#allocation33_spill] sm:$0xff] }
 0x3f4   : > { %v2238_v12 = vpop.permute.xlu2 %2237 }
 0x3f5   : > { %2316 = vst.msk [vmem:[#allocation2 + $0x120] sm:$0xff] %vm2297_vm13, %v2238_v12  ;;  %v1676_v12 = vld [vmem:[%s5039_s5 + $0x188] sm:$0xff] }
 0x3f7   : > { %2374 = vrot.lane.b32.xlu1 %v5201_v51, %s3694_s9 }
 0x3f8   : > { %2372 = vrot.lane.b32.xlu0 %v5184_v50, %s3694_s9 }
 0x3f9   : > { %v2224_v11 = vpop.permute.xlu1 %2223 }
 0x3fa   : > { %2309 = vst.msk [vmem:[#allocation2 + $0xb0] sm:$0xff] %vm2297_vm13, %v2224_v11  ;;  %v2222_v14 = vpop.permute.xlu0 %2221  ;;  %2376 = vrot.lane.b32.xlu2 %v5196_v15, %s3694_s9 }
 0x3fb   : > { %2308 = vst.msk [vmem:[#allocation2 + $0xa0] sm:$0xff] %vm2297_vm13, %v2222_v14  ;;  %v5964_v14 = vmax.f32 %v1676_v12, 0.0  ;;  %v7007_v12 = vld [vmem:[#allocation3_spill] sm:$0xff] }
 0x3fc   : > { %v2244_v3 = vpop.permute.xlu2 %2243 }
 0x3fd   : > { %2319 = vst.msk [vmem:[#allocation2 + $0x150] sm:$0xff] %vm2297_vm13, %v2244_v3 }
 0x3ff   : > { %2380 = vrot.lane.b32.xlu1 %v5229_v26, %s3694_s9 }
 0x400   : > { %2378 = vrot.lane.b32.xlu0 %v6999_v45, %s3694_s9 }
 0x401   : > { %v2230_v52 = vpop.permute.xlu1 %2229 }
 0x402   : > { %2312 = vst.msk [vmem:[#allocation2 + $0xe0] sm:$0xff] %vm2297_vm13, %v2230_v52  ;;  %v2228_v19 = vpop.permute.xlu0 %2227  ;;  %2382 = vrot.lane.b32.xlu2 %v5224_v59, %s3694_s9 }
 0x403   : > { %2311 = vst.msk [vmem:[#allocation2 + $0xd0] sm:$0xff] %vm2297_vm13, %v2228_v19 }
 0x404   : > { %v2250_v20 = vpop.permute.xlu2 %2249 }
 0x405   : > { %2322 = vst.msk [vmem:[#allocation2 + $0x180] sm:$0xff] %vm2297_vm13, %v2250_v20  ;;  %v7005_v20 = vld [vmem:[#allocation43_spill] sm:$0xff] }
 0x407   : > { %2386 = vrot.lane.b32.xlu1 %v5273_v33, %s3694_s9 }
 0x408   : > { %2384 = vrot.lane.b32.xlu0 %v5235_v56, %s3694_s9 }
 0x409   : > { %v2236_v57 = vpop.permute.xlu1 %2235 }
 0x40a   : > { %2315 = vst.msk [vmem:[#allocation2 + $0x110] sm:$0xff] %vm2297_vm13, %v2236_v57  ;;  %v2234_v32 = vpop.permute.xlu0 %2233  ;;  %2388 = vrot.lane.b32.xlu2 %v5257_v60, %s3694_s9 }
 0x40b   : > { %2314 = vst.msk [vmem:[#allocation2 + $0x100] sm:$0xff] %vm2297_vm13, %v2234_v32 }
 0x40c   : > { %v2256_v11 = vpop.permute.xlu2 %2255 }
 0x40d   : > { %2325 = vst.msk [vmem:[#allocation2 + $0x1b0] sm:$0xff] %vm2297_vm13, %v2256_v11 }
 0x40f   : > { %2392 = vrot.lane.b32.xlu1 %v5960_v31, %s3694_s9 }
 0x410   : > { %2390 = vrot.lane.b32.xlu0 %v5287_v39, %s3694_s9 }
 0x411   : > { %v2242_v3 = vpop.permute.xlu1 %2241 }
 0x412   : > { %2318 = vst.msk [vmem:[#allocation2 + $0x140] sm:$0xff] %vm2297_vm13, %v2242_v3  ;;  %v2240_v52 = vpop.permute.xlu0 %2239  ;;  %2394 = vrot.lane.b32.xlu2 %v5964_v14, %s3694_s9  ;;  %v7008_v3 = vld [vmem:[#allocation20_spill] sm:$0xff] }
 0x413   : > { %2317 = vst.msk [vmem:[#allocation2 + $0x130] sm:$0xff] %vm2297_vm13, %v2240_v52  ;;  %v7009_v52 = vld [vmem:[#allocation28_spill] sm:$0xff] }
 0x414   : > { %v2262_v19 = vpop.permute.xlu2 %2261 }
 0x415   : > { %2328 = vst.msk [vmem:[#allocation2 + $0x1e0] sm:$0xff] %vm2297_vm13, %v2262_v19 }
 0x417   : > { %2469 = vrot.lane.b32.xlu1 %v7005_v20, %s3695_s10 }
 0x418   : > { %2467 = vrot.lane.b32.xlu0 %v7006_v25, %s3695_s10  ;;  %v7010_v25 = vld [vmem:[#allocation5_spill] sm:$0xff] }
 0x419   : > { %v2248_v57 = vpop.permute.xlu1 %2247 }
 0x41a   : > { %2321 = vst.msk [vmem:[#allocation2 + $0x170] sm:$0xff] %vm2297_vm13, %v2248_v57  ;;  %v2246_v32 = vpop.permute.xlu0 %2245  ;;  %2471 = vrot.lane.b32.xlu2 %v7007_v12, %s3695_s10  ;;  %v7012_v12 = vld [vmem:[#allocation38_spill] sm:$0xff] }
 0x41b   : > { %2320 = vst.msk [vmem:[#allocation2 + $0x160] sm:$0xff] %vm2297_vm13, %v2246_v32  ;;  %v7011_v32 = vld [vmem:[#allocation35_spill] sm:$0xff] }
 0x41c   : > { %v2335_v11 = vpop.permute.xlu2 %2334 }
 0x41d   : > { %2430 = vst.msk [vmem:[#allocation2 + $0x10] sm:$0xff] %vm2428_vm14, %v2335_v11 }
 0x41f   : > { %2475 = vrot.lane.b32.xlu1 %v7008_v3, %s3695_s10 }
 0x420   : > { %2473 = vrot.lane.b32.xlu0 %v7009_v52, %s3695_s10  ;;  %v7013_v52 = vld [vmem:[#allocation23_spill] sm:$0xff] }
 0x421   : > { %v2254_v19 = vpop.permute.xlu1 %2253 }
 0x422   : > { %2324 = vst.msk [vmem:[#allocation2 + $0x1a0] sm:$0xff] %vm2297_vm13, %v2254_v19  ;;  %v2252_v20 = vpop.permute.xlu0 %2251  ;;  %2477 = vrot.lane.b32.xlu2 %v7010_v25, %s3695_s10  ;;  %v7015_v25 = vld [vmem:[#allocation7_spill] sm:$0xff] }
 0x423   : > { %2323 = vst.msk [vmem:[#allocation2 + $0x190] sm:$0xff] %vm2297_vm13, %v2252_v20  ;;  %v7014_v20 = vld [vmem:[#allocation45_spill] sm:$0xff] }
 0x424   : > { %v2341_v57 = vpop.permute.xlu2 %2340 }
 0x425   : > { %2433 = vst.msk [vmem:[#allocation2 + $0x40] sm:$0xff] %vm2428_vm14, %v2341_v57 }
 0x427   : > { %2481 = vrot.lane.b32.xlu1 %v7011_v32, %s3695_s10 }
 0x428   : > { %2479 = vrot.lane.b32.xlu0 %v7012_v12, %s3695_s10  ;;  %v7016_v12 = vld [vmem:[#allocation40_spill] sm:$0xff] }
 0x429   : > { %v2260_v11 = vpop.permute.xlu1 %2259 }
 0x42a   : > { %2327 = vst.msk [vmem:[#allocation2 + $0x1d0] sm:$0xff] %vm2297_vm13, %v2260_v11  ;;  %v2258_v3 = vpop.permute.xlu0 %2257  ;;  %2483 = vrot.lane.b32.xlu2 %v7013_v52, %s3695_s10  ;;  %v7018_v52 = vld [vmem:[#allocation10_spill] sm:$0xff] }
 0x42b   : > { %2326 = vst.msk [vmem:[#allocation2 + $0x1c0] sm:$0xff] %vm2297_vm13, %v2258_v3  ;;  %v7017_v3 = vld [vmem:[#allocation8_spill] sm:$0xff] }
 0x42c   : > { %v2347_v19 = vpop.permute.xlu2 %2346 }
 0x42d   : > { %2436 = vst.msk [vmem:[#allocation2 + $0x70] sm:$0xff] %vm2428_vm14, %v2347_v19 }
 0x42f   : > { %2487 = vrot.lane.b32.xlu1 %v7014_v20, %s3695_s10 }
 0x430   : > { %2485 = vrot.lane.b32.xlu0 %v7015_v25, %s3695_s10  ;;  %v7019_v25 = vld [vmem:[#allocation44_spill] sm:$0xff] }
 0x431   : > { %v2333_v57 = vpop.permute.xlu1 %2332 }
 0x432   : > { %2429 = vst.msk [vmem:[#allocation2] sm:$0xff] %vm2428_vm14, %v2333_v57  ;;  %v2264_v32 = vpop.permute.xlu0 %2263  ;;  %2489 = vrot.lane.b32.xlu2 %v7016_v12, %s3695_s10  ;;  %v7021_v12 = vld [vmem:[#allocation9_spill] sm:$0xff] }
 0x433   : > { %2329 = vst.msk [vmem:[#allocation2 + $0x1f0] sm:$0xff] %vm2297_vm13, %v2264_v32  ;;  %v7020_v32 = vld [vmem:[#allocation11_spill] sm:$0xff] }
 0x434   : > { %v2353_v11 = vpop.permute.xlu2 %2352 }
 0x435   : > { %2439 = vst.msk [vmem:[#allocation2 + $0xa0] sm:$0xff] %vm2428_vm14, %v2353_v11 }
 0x437   : > { %2493 = vrot.lane.b32.xlu1 %v7017_v3, %s3695_s10 }
 0x438   : > { %2491 = vrot.lane.b32.xlu0 %v7018_v52, %s3695_s10  ;;  %v7022_v52 = vld [vmem:[#allocation6_spill] sm:$0xff] }
 0x439   : > { %v2339_v19 = vpop.permute.xlu1 %2338 }
 0x43a   : > { %2432 = vst.msk [vmem:[#allocation2 + $0x30] sm:$0xff] %vm2428_vm14, %v2339_v19  ;;  %v2337_v20 = vpop.permute.xlu0 %2336  ;;  %2495 = vrot.lane.b32.xlu2 %v7019_v25, %s3695_s10  ;;  %v1677_v19 = vld [vmem:[%s5039_s5 + $0x190] sm:$0x3]  ;;  %v2463_v25 = vrot.slane %v5964_v14, 1 }
 0x43b   : > { %2431 = vst.msk [vmem:[#allocation2 + $0x20] sm:$0xff] %vm2428_vm14, %v2337_v20  ;;  %v1731_v20 = vmax.f32 %v1677_v19, 0.0 }
 0x43c   : > { %v2359_v57 = vpop.permute.xlu2 %2358 }
 0x43d   : > { %2442 = vst.msk [vmem:[#allocation2 + $0xd0] sm:$0xff] %vm2428_vm14, %v2359_v57 }
 0x43f   : > { %2499 = vrot.lane.b32.xlu1 %v7020_v32, %s3695_s10  ;;  %v2465_v32 = vrot.slane %v1731_v20, 1 }
 0x440   : > { %2497 = vrot.lane.b32.xlu0 %v7021_v12, %s3695_s10 }
 0x441   : > { %v2345_v11 = vpop.permute.xlu1 %2344  ;;  %v2466_v12 = vsel %vm407_vm0, %v2463_v25, %v2465_v32 }
 0x442   : > { %2435 = vst.msk [vmem:[#allocation2 + $0x60] sm:$0xff] %vm2428_vm14, %v2345_v11  ;;  %v2343_v3 = vpop.permute.xlu0 %2342  ;;  %2501 = vrot.lane.b32.xlu2 %v7022_v52, %s3695_s10  ;;  %v7023_v11 = vld [vmem:[#allocation14_spill] sm:$0xff] }
 0x443   : > { %2434 = vst.msk [vmem:[#allocation2 + $0x50] sm:$0xff] %vm2428_vm14, %v2343_v3 }
 0x444   : > { %v2365_v57 = vpop.permute.xlu2 %2364  ;;  %2928 = vst.msk [vmem:[#allocation2 + $0x1d8] sm:$0xff] %vm326_vm1, %v2466_v12 }
 0x445   : > { %2445 = vst.msk [vmem:[#allocation2 + $0x100] sm:$0xff] %vm2428_vm14, %v2365_v57 }
 0x447   : > { %2505 = vrot.lane.b32.xlu1 %v5465_v53, %s3695_s10 }
 0x448   : > { %2503 = vrot.lane.b32.xlu0 %v7023_v11, %s3695_s10  ;;  %v2599_v11 = vrot.slane %v1731_v20, 2 }
 0x449   : > { %v2351_v3 = vpop.permute.xlu1 %2350 }
 0x44a   : > { %2438 = vst.msk [vmem:[#allocation2 + $0x90] sm:$0xff] %vm2428_vm14, %v2351_v3  ;;  %v2349_v52 = vpop.permute.xlu0 %2348  ;;  %2507 = vrot.lane.b32.xlu2 %v5446_v49, %s3695_s10 }
 0x44b   : > { %2437 = vst.msk [vmem:[#allocation2 + $0x80] sm:$0xff] %vm2428_vm14, %v2349_v52 }
 0x44c   : > { %v2371_v19 = vpop.permute.xlu2 %2370 }
 0x44d   : > { %2448 = vst.msk [vmem:[#allocation2 + $0x130] sm:$0xff] %vm2428_vm14, %v2371_v19  ;;  %v1679_v19 = vld [vmem:[%s5039_s5 + $0x1a0] sm:$0xff] }
 0x44f   : > { %2511 = vrot.lane.b32.xlu1 %v5501_v44, %s3695_s10 }
 0x450   : > { %2509 = vrot.lane.b32.xlu0 %v5530_v22, %s3695_s10 }
 0x451   : > { %v2357_v53 = vpop.permute.xlu1 %2356 }
 0x452   : > { %2441 = vst.msk [vmem:[#allocation2 + $0xc0] sm:$0xff] %vm2428_vm14, %v2357_v53  ;;  %v2355_v57 = vpop.permute.xlu0 %2354  ;;  %2513 = vrot.lane.b32.xlu2 %v5486_v40, %s3695_s10 }
 0x453   : > { %2440 = vst.msk [vmem:[#allocation2 + $0xb0] sm:$0xff] %vm2428_vm14, %v2355_v57  ;;  %v6086_v57 = vmax.f32 %v1679_v19, 0.0  ;;  %v7026_v19 = vld [vmem:[#allocation31_spill] sm:$0xff] }
 0x454   : > { %v2377_v49 = vpop.permute.xlu2 %2376 }
 0x455   : > { %2451 = vst.msk [vmem:[#allocation2 + $0x160] sm:$0xff] %vm2428_vm14, %v2377_v49 }
 0x457   : > { %2936 = vrot.lane.b32.xlu1 %v5657_v4, %s3683_s21 }
 0x458   : > { %2515 = vrot.lane.b32.xlu0 %v5565_v38, %s3695_s10 }
 0x459   : > { %v2363_v44 = vpop.permute.xlu1 %2362 }
 0x45a   : > { %2444 = vst.msk [vmem:[#allocation2 + $0xf0] sm:$0xff] %vm2428_vm14, %v2363_v44  ;;  %v2361_v22 = vpop.permute.xlu0 %2360  ;;  %2517 = vrot.lane.b32.xlu2 %v5537_v58, %s3695_s10 }
 0x45b   : > { %2443 = vst.msk [vmem:[#allocation2 + $0xe0] sm:$0xff] %vm2428_vm14, %v2361_v22 }
 0x45c   : > { %v2383_v40 = vpop.permute.xlu2 %2382 }
 0x45d   : > { %2454 = vst.msk [vmem:[#allocation2 + $0x190] sm:$0xff] %vm2428_vm14, %v2383_v40 }
 0x45f   : > { %2762 = vrot.lane.b32.xlu1 %v5166_v8, %s3696_s11  ;;  %v2597_v8 = vrot.slane %v5964_v14, 2 }
 0x460   : > { %2631 = vrot.lane.b32.xlu0 %v5750_v61, %s3697_s12 }
 0x461   : > { %v2369_v38 = vpop.permute.xlu1 %2368 }
 0x462   : > { %2447 = vst.msk [vmem:[#allocation2 + $0x120] sm:$0xff] %vm2428_vm14, %v2369_v38  ;;  %v2367_v32 = vpop.permute.xlu0 %2366  ;;  %2938 = vrot.lane.b32.xlu2 %v5654_v30, %s3683_s21 }
 0x463   : > { %2446 = vst.msk [vmem:[#allocation2 + $0x110] sm:$0xff] %vm2428_vm14, %v2367_v32  ;;  %v7024_v32 = vld [vmem:[#allocation19_spill] sm:$0xff] }
 0x464   : > { %v2389_v58 = vpop.permute.xlu2 %2388 }
 0x465   : > { %2457 = vst.msk [vmem:[#allocation2 + $0x1c0] sm:$0xff] %vm2428_vm14, %v2389_v58 }
 0x467   : > { %2529 = vrot.lane.b32.xlu1 %v2466_v12, %s3695_s10  ;;  %v6083_v12 = vsel %vm617_vm2, %v2597_v8, %v2599_v11 }
 0x468   : > { %2633 = vrot.lane.b32.xlu0 %v5760_v0, %s3697_s12 }
 0x469   : > { %v2375_v3 = vpop.permute.xlu1 %2374 }
 0x46a   : > { %2450 = vst.msk [vmem:[#allocation2 + $0x150] sm:$0xff] %vm2428_vm14, %v2375_v3  ;;  %v2373_v52 = vpop.permute.xlu0 %2372  ;;  %2764 = vrot.lane.b32.xlu2 %v5181_v54, %s3696_s11  ;;  %v7025_v3 = vld [vmem:[#allocation18_spill] sm:$0xff] }
 0x46b   : > { %2449 = vst.msk [vmem:[#allocation2 + $0x140] sm:$0xff] %vm2428_vm14, %v2373_v52 }
 0x46c   : > { %v2395_v53 = vpop.permute.xlu2 %2394 }
 0x46d   : > { %2460 = vst.msk [vmem:[#allocation2 + $0x1f0] sm:$0xff] %vm2428_vm14, %v2395_v53 }
 0x46f   : > { %2663 = vrot.lane.b32.xlu1 %v6083_v12, %s3697_s12 }
 0x470   : > { %2940 = vrot.lane.b32.xlu0 %v5664_v18, %s3683_s21 }
 0x471   : > { %v2381_v54 = vpop.permute.xlu1 %2380 }
 0x472   : > { %2453 = vst.msk [vmem:[#allocation2 + $0x180] sm:$0xff] %vm2428_vm14, %v2381_v54  ;;  %v2379_v20 = vpop.permute.xlu0 %2378  ;;  %2794 = vrot.lane.b32.xlu2 %v6086_v57, %s3696_s11 }
 0x473   : > { %2452 = vst.msk [vmem:[#allocation2 + $0x170] sm:$0xff] %vm2428_vm14, %v2379_v20  ;;  %v7027_v20 = vld [vmem:[#allocation32_spill] sm:$0xff] }
 0x474   : > { %v2472_v49 = vpop.permute.xlu2 %2471 }
 0x475   : > { %2566 = vst.msk [vmem:[#allocation2 + $0x20] sm:$0xff] %vm2563_vm15, %v2472_v49  ;;  %v3143_v49 = vld [vmem:[%s6651_s2 + $0x78] sm:$0xff] }
 0x476   : > { %3616 = vmatpush.msra.mxu2 %v3143_v49  ;;  %3617 = vmatpush.msra.mxu3 %v3143_v49 }
 0x477   : > { %2732 = vrot.lane.b32.xlu1 %v5076_v34, %s3696_s11  ;;  %3247 = vmatpush.msra.mxu0 %v3143_v49 }
 0x478   : > { %2601 = vrot.lane.b32.xlu0 %v5634_v23, %s3697_s12 }
 0x479   : > { %v2387_v44 = vpop.permute.xlu1 %2386 }
 0x47a   : > { %2456 = vst.msk [vmem:[#allocation2 + $0x1b0] sm:$0xff] %vm2428_vm14, %v2387_v44  ;;  %v2385_v22 = vpop.permute.xlu0 %2384  ;;  %2635 = vrot.lane.b32.xlu2 %v5778_v41, %s3697_s12 }
 0x47b   : > { %2455 = vst.msk [vmem:[#allocation2 + $0x1a0] sm:$0xff] %vm2428_vm14, %v2385_v22  ;;  %v3141_v22 = vld [vmem:[%s6651_s2 + $0x68] sm:$0xff] }
 0x47c   : > { %v2478_v40 = vpop.permute.xlu2 %2477 }
 0x47d   : > { %2569 = vst.msk [vmem:[#allocation2 + $0x50] sm:$0xff] %vm2563_vm15, %v2478_v40 }
 0x47f   : > { %2942 = vrot.lane.b32.xlu1 %v5682_v17, %s3683_s21 }
 0x480   : > { %2766 = vrot.lane.b32.xlu0 %v5178_v46, %s3696_s11 }
 0x481   : > { %v2393_v34 = vpop.permute.xlu1 %2392 }
 0x482   : > { %2459 = vst.msk [vmem:[#allocation2 + $0x1e0] sm:$0xff] %vm2428_vm14, %v2393_v34  ;;  %v2391_v23 = vpop.permute.xlu0 %2390  ;;  %2972 = vrot.lane.b32.xlu2 %v5801_v62, %s3683_s21 }
 0x483   : > { %2458 = vst.msk [vmem:[#allocation2 + $0x1d0] sm:$0xff] %vm2428_vm14, %v2391_v23  ;;  %v3139_v23 = vld [vmem:[%s6651_s2 + $0x58] sm:$0xff] }
 0x484   : > { %v2484_v38 = vpop.permute.xlu2 %2483 }
 0x485   : > { %2572 = vst.msk [vmem:[#allocation2 + $0x80] sm:$0xff] %vm2563_vm15, %v2484_v38 }
 0x487   : > { %2734 = vrot.lane.b32.xlu1 %v5091_v5, %s3696_s11 }
 0x488   : > { %2603 = vrot.lane.b32.xlu0 %v7024_v32, %s3697_s12  ;;  %v3138_v32 = vld [vmem:[%s6651_s2 + $0x50] sm:$0xff] }
 0x489   : > { %v2470_v58 = vpop.permute.xlu1 %2469 }
 0x48a   : > { %2565 = vst.msk [vmem:[#allocation2 + $0x10] sm:$0xff] %vm2563_vm15, %v2470_v58  ;;  %v2468_v46 = vpop.permute.xlu0 %2467  ;;  %2637 = vrot.lane.b32.xlu2 %v5775_v9, %s3697_s12  ;;  %v3137_v58 = vld [vmem:[%s6651_s2 + $0x48] sm:$0xff] }
 0x48b   : > { %2564 = vst.msk [vmem:[#allocation2] sm:$0xff] %vm2563_vm15, %v2468_v46 }
 0x48c   : > { %v2490_v11 = vpop.permute.xlu2 %2489 }
 0x48d   : > { %2575 = vst.msk [vmem:[#allocation2 + $0xb0] sm:$0xff] %vm2563_vm15, %v2490_v11 }
 0x48f   : > { %2944 = vrot.lane.b32.xlu1 %v7025_v3, %s3683_s21 }
 0x490   : > { %2768 = vrot.lane.b32.xlu0 %v5184_v50, %s3696_s11 }
 0x491   : > { %v2476_v5 = vpop.permute.xlu1 %2475 }
 0x492   : > { %2568 = vst.msk [vmem:[#allocation2 + $0x40] sm:$0xff] %vm2563_vm15, %v2476_v5  ;;  %v2474_v52 = vpop.permute.xlu0 %2473  ;;  %2974 = vrot.lane.b32.xlu2 %v7026_v19, %s3683_s21 }
 0x493   : > { %2567 = vst.msk [vmem:[#allocation2 + $0x30] sm:$0xff] %vm2563_vm15, %v2474_v52  ;;  %v7029_v52 = vld [vmem:[#allocation25_spill] sm:$0xff] }
 0x494   : > { %v2496_v53 = vpop.permute.xlu2 %2495 }
 0x495   : > { %2578 = vst.msk [vmem:[#allocation2 + $0xe0] sm:$0xff] %vm2563_vm15, %v2496_v53  ;;  %v3133_v53 = vld [vmem:[%s6651_s2 + $0x28] sm:$0xff] }
 0x497   : > { %2736 = vrot.lane.b32.xlu1 %v5088_v47, %s3696_s11  ;;  %v3142_v47 = vld [vmem:[%s6651_s2 + $0x70] sm:$0xff] }
 0x498   : > { %2605 = vrot.lane.b32.xlu0 %v5657_v4, %s3697_s12  ;;  %3618 = vmatpush.msra.mxu2 %v3142_v47  ;;  %v7028_v4 = vld [vmem:[#allocation22_spill] sm:$0xff] }
 0x499   : > { %v2482_v54 = vpop.permute.xlu1 %2481  ;;  %3619 = vmatpush.msra.mxu3 %v3142_v47  ;;  %3248 = vmatpush.msra.mxu0 %v3142_v47  ;;  %v3144_v47 = vld [vmem:[%s6651_s2 + $0x80] sm:$0xff] }
 0x49a   : > { %2571 = vst.msk [vmem:[#allocation2 + $0x70] sm:$0xff] %vm2563_vm15, %v2482_v54  ;;  %v2480_v50 = vpop.permute.xlu0 %2479  ;;  %2639 = vrot.lane.b32.xlu2 %v7027_v20, %s3697_s12  ;;  %3620 = vmatpush.msra.mxu2 %v3141_v22  ;;  %v3145_v54 = vld [vmem:[%s6651_s2 + $0x88] sm:$0xff] }
 0x49b   : > { %2570 = vst.msk [vmem:[#allocation2 + $0x60] sm:$0xff] %vm2563_vm15, %v2480_v50  ;;  %3621 = vmatpush.msra.mxu3 %v3141_v22  ;;  %3249 = vmatpush.msra.mxu0 %v3141_v22  ;;  %v3131_v22 = vld [vmem:[%s6651_s2 + $0x18] sm:$0xff] }
 0x49c   : > { %v2502_v44 = vpop.permute.xlu2 %2501  ;;  %3374 = vmatpush.msra.mxu1 %v3145_v54 }
 0x49d   : > { %2581 = vst.msk [vmem:[#allocation2 + $0x110] sm:$0xff] %vm2563_vm15, %v2502_v44 }
 0x49e   : > { %3375 = vmatpush.msra.mxu1 %v3144_v47 }
 0x49f   : > { %2946 = vrot.lane.b32.xlu1 %v7028_v4, %s3683_s21 }
 0x4a0   : > { %2770 = vrot.lane.b32.xlu0 %v5201_v51, %s3696_s11  ;;  %v3140_v51 = vld [vmem:[%s6651_s2 + $0x60] sm:$0xff] }
 0x4a1   : > { %v2488_v40 = vpop.permute.xlu1 %2487  ;;  %3622 = vmatpush.msra.mxu2 %v3140_v51  ;;  %3623 = vmatpush.msra.mxu3 %v3140_v51 }
 0x4a2   : > { %2574 = vst.msk [vmem:[#allocation2 + $0xa0] sm:$0xff] %vm2563_vm15, %v2488_v40  ;;  %v2486_v34 = vpop.permute.xlu0 %2485  ;;  %2976 = vrot.lane.b32.xlu2 %v5808_v63, %s3683_s21  ;;  %3250 = vmatpush.msra.mxu0 %v3140_v51  ;;  %v3130_v40 = vld [vmem:[%s6651_s2 + $0x10] sm:$0xff] }
 0x4a3   : > { %2573 = vst.msk [vmem:[#allocation2 + $0x90] sm:$0xff] %vm2563_vm15, %v2486_v34  ;;  %3624 = vmatpush.msra.mxu2 %v3139_v23  ;;  %3625 = vmatpush.msra.mxu3 %v3139_v23  ;;  %v3129_v34 = vld [vmem:[%s6651_s2 + $0x8] sm:$0xff] }
 0x4a4   : > { %v2508_v38 = vpop.permute.xlu2 %2507  ;;  %3251 = vmatpush.msra.mxu0 %v3139_v23 }
 0x4a5   : > { %2584 = vst.msk [vmem:[#allocation2 + $0x140] sm:$0xff] %vm2563_vm15, %v2508_v38  ;;  %3626 = vmatpush.msra.mxu2 %v3138_v32  ;;  %3627 = vmatpush.msra.mxu3 %v3138_v32  ;;  %v7030_v38 = vld [vmem:[#allocation21_spill] sm:$0xff] }
 0x4a6   : > { %3252 = vmatpush.msra.mxu0 %v3138_v32 }
 0x4a7   : > { %2738 = vrot.lane.b32.xlu1 %v5094_v13, %s3696_s11  ;;  %3628 = vmatpush.msra.mxu2 %v3137_v58  ;;  %v3136_v13 = vld [vmem:[%s6651_s2 + $0x40] sm:$0xff] }
 0x4a8   : > { %2607 = vrot.lane.b32.xlu0 %v5654_v30, %s3697_s12  ;;  %v3135_v30 = vld [vmem:[%s6651_s2 + $0x38] sm:$0xff]  ;;  %3629 = vmatpush.msra.mxu3 %v3137_v58 }
 0x4a9   : > { %v2494_v46 = vpop.permute.xlu1 %2493  ;;  %3253 = vmatpush.msra.mxu0 %v3137_v58  ;;  %3630 = vmatpush.msra.mxu2 %v3136_v13 }
 0x4aa   : > { %2577 = vst.msk [vmem:[#allocation2 + $0xd0] sm:$0xff] %vm2563_vm15, %v2494_v46  ;;  %v2492_v11 = vpop.permute.xlu0 %2491  ;;  %2641 = vrot.lane.b32.xlu2 %v5801_v62, %s3697_s12  ;;  %v3134_v62 = vld [vmem:[%s6651_s2 + $0x30] sm:$0xff]  ;;  %3631 = vmatpush.msra.mxu3 %v3136_v13 }
 0x4ab   : > { %2576 = vst.msk [vmem:[#allocation2 + $0xc0] sm:$0xff] %vm2563_vm15, %v2492_v11  ;;  %3254 = vmatpush.msra.mxu0 %v3136_v13  ;;  %3632 = vmatpush.msra.mxu2 %v3135_v30  ;;  %v7031_v13 = vld [vmem:[#allocation26_spill] sm:$0xff] }
 0x4ac   : > { %v2514_v5 = vpop.permute.xlu2 %2513  ;;  %3633 = vmatpush.msra.mxu3 %v3135_v30 }
 0x4ad   : > { %2587 = vst.msk [vmem:[#allocation2 + $0x170] sm:$0xff] %vm2563_vm15, %v2514_v5  ;;  %3634 = vmatpush.msra.mxu2 %v3134_v62  ;;  %3255 = vmatpush.msra.mxu0 %v3135_v30 }
 0x4ae   : > { %3635 = vmatpush.msra.mxu3 %v3134_v62 }
 0x4af   : > { %2948 = vrot.lane.b32.xlu1 %v7029_v52, %s3683_s21  ;;  %3636 = vmatpush.msra.mxu2 %v3133_v53 }
 0x4b0   : > { %2772 = vrot.lane.b32.xlu0 %v5196_v15, %s3696_s11  ;;  %v3132_v15 = vld [vmem:[%s6651_s2 + $0x20] sm:$0xff]  ;;  %3256 = vmatpush.msra.mxu0 %v3134_v62 }
 0x4b1   : > { %v2500_v50 = vpop.permute.xlu1 %2499  ;;  %3638 = vmatpush.msra.mxu2 %v3132_v15  ;;  %3637 = vmatpush.msra.mxu3 %v3133_v53 }
 0x4b2   : > { %2580 = vst.msk [vmem:[#allocation2 + $0x100] sm:$0xff] %vm2563_vm15, %v2500_v50  ;;  %v2498_v49 = vpop.permute.xlu0 %2497  ;;  %2978 = vrot.lane.b32.xlu2 %v5826_v55, %s3683_s21  ;;  %3257 = vmatpush.msra.mxu0 %v3133_v53 }
 0x4b3   : > { %2579 = vst.msk [vmem:[#allocation2 + $0xf0] sm:$0xff] %vm2563_vm15, %v2498_v49  ;;  %3640 = vmatpush.msra.mxu2 %v3131_v22  ;;  %3639 = vmatpush.msra.mxu3 %v3132_v15 }
 0x4b4   : > { %v2518_v44 = vpop.permute.xlu2 %2517  ;;  %3258 = vmatpush.msra.mxu0 %v3132_v15 }
 0x4b5   : > { %2589 = vst.msk [vmem:[#allocation2 + $0x190] sm:$0xff] %vm2563_vm15, %v2518_v44  ;;  %3642 = vmatpush.msra.mxu2 %v3130_v40  ;;  %3641 = vmatpush.msra.mxu3 %v3131_v22 }
 0x4b6   : > { %3259 = vmatpush.msra.mxu0 %v3131_v22 }
 0x4b7   : > { %2740 = vrot.lane.b32.xlu1 %v5109_v28, %s3696_s11  ;;  %3644 = vmatpush.msra.mxu2 %v3129_v34  ;;  %v3128_v28 = vld [vmem:[%s6651_s2] sm:$0xff] }
 0x4b8   : > { %2609 = vrot.lane.b32.xlu0 %v5664_v18, %s3697_s12  ;;  %3643 = vmatpush.msra.mxu3 %v3130_v40 }
 0x4b9   : > { %v2506_v51 = vpop.permute.xlu1 %2505  ;;  %3646 = vmatpush.msra.mxu2 %v3128_v28  ;;  %3260 = vmatpush.msra.mxu0 %v3130_v40 }
 0x4ba   : > { %2583 = vst.msk [vmem:[#allocation2 + $0x130] sm:$0xff] %vm2563_vm15, %v2506_v51  ;;  %v2504_v23 = vpop.permute.xlu0 %2503  ;;  %2643 = vrot.lane.b32.xlu2 %v7026_v19, %s3697_s12  ;;  %3645 = vmatpush.msra.mxu3 %v3129_v34 }
 0x4bb   : > { %2582 = vst.msk [vmem:[#allocation2 + $0x120] sm:$0xff] %vm2563_vm15, %v2504_v23  ;;  %3261 = vmatpush.msra.mxu0 %v3129_v34 }
 0x4bc   : > { %v2939_v18 = vpop.permute.xlu2 %2938  ;;  %3647 = vmatpush.msra.mxu3 %v3128_v28 }
 0x4bd   : > { %3033 = vst.msk [vmem:[#allocation2 + $0x18] sm:$0xff] %vm584_vm3, %v2939_v18  ;;  %3262 = vmatpush.msra.mxu0 %v3128_v28 }
 0x4be   : > { %3648 = vmatpush.msrb.mxu3 %v3145_v54 }
 0x4bf   : > { %2950 = vrot.lane.b32.xlu1 %v7030_v38, %s3683_s21 }
 0x4c0   : > { %2774 = vrot.lane.b32.xlu0 %v6999_v45, %s3696_s11  ;;  %3649 = vmatpush.msrb.mxu3 %v3144_v47 }
 0x4c1   : > { %v2512_v19 = vpop.permute.xlu1 %2511 }
 0x4c2   : > { %2586 = vst.msk [vmem:[#allocation2 + $0x160] sm:$0xff] %vm2563_vm15, %v2512_v19  ;;  %v2510_v32 = vpop.permute.xlu0 %2509  ;;  %2980 = vrot.lane.b32.xlu2 %v5823_v27, %s3683_s21 }
 0x4c3   : > { %2585 = vst.msk [vmem:[#allocation2 + $0x150] sm:$0xff] %vm2563_vm15, %v2510_v32 }
 0x4c4   : > { %v2765_v58 = vpop.permute.xlu2 %2764 }
 0x4c7   : > { %2742 = vrot.lane.b32.xlu1 %v5106_v42, %s3696_s11 }
 0x4c8   : > { %2611 = vrot.lane.b32.xlu0 %v5682_v17, %s3697_s12 }
 0x4c9   : > { %v2937_v45 = vpop.permute.xlu1 %2936 }
 0x4ca   : > { %3032 = vst.msk [vmem:[#allocation2 + $0x8] sm:$0xff] %vm584_vm3, %v2937_v45  ;;  %v2516_v46 = vpop.permute.xlu0 %2515  ;;  %2645 = vrot.lane.b32.xlu2 %v5808_v63, %s3697_s12 }
 0x4cb   : > { %2588 = vst.msk [vmem:[#allocation2 + $0x180] sm:$0xff] %vm2563_vm15, %v2516_v46 }
 0x4cc   : > { %v2795_v11 = vpop.permute.xlu2 %2794 }
 0x4cf   : > { %2952 = vrot.lane.b32.xlu1 %v7031_v13, %s3683_s21 }
 0x4d0   : > { %2776 = vrot.lane.b32.xlu0 %v5229_v26, %s3696_s11  ;;  %v3067_v26 = vld [vmem:[#allocation2 + $0x18] sm:$0xff] }
 0x4d1   : > { %v2763_v42 = vpop.permute.xlu1 %2762  ;;  %v3065_v17 = vld [vmem:[#allocation2 + $0x8] sm:$0xff] }
 0x4d2   : > { %v2632_v30 = vpop.permute.xlu0 %2631  ;;  %3581 = vmatmul.msk.f32.vlgmr.msra.gmra.mxu1 %vm3150_vm4, %v3065_v17  ;;  %2982 = vrot.lane.b32.xlu2 %v5832_v16, %s3683_s21 }
 0x4d3   : > { %2713 = vst.msk [vmem:[#allocation2 + $0xf0] sm:$0xff] %vm2697_vm5, %v2632_v30 }
 0x4d4   : > { %2844 = vst.msk [vmem:[#allocation2 + $0xf0] sm:$0xff] %vm2828_vm6, %v2763_v42  ;;  %v2636_v63 = vpop.permute.xlu2 %2635 }
 0x4d5   : > { %2715 = vst.msk [vmem:[#allocation2 + $0x110] sm:$0xff] %vm2697_vm5, %v2636_v63 }
 0x4d7   : > { %2744 = vrot.lane.b32.xlu1 %v5112_v29, %s3696_s11 }
 0x4d8   : > { %2613 = vrot.lane.b32.xlu0 %v7025_v3, %s3697_s12  ;;  %v7032_v3 = vld [vmem:[#allocation27_spill] sm:$0xff] }
 0x4d9   : > { %v2530_v5 = vpop.permute.xlu1 %2529 }
 0x4da   : > { %2595 = vst.msk [vmem:[#allocation2 + $0x1f0] sm:$0xff] %vm2563_vm15, %v2530_v5  ;;  %v2634_v62 = vpop.permute.xlu0 %2633  ;;  %3582 = vmatmul.msk.f32.gmra.mxu1 %vm3150_vm4, %v3067_v26  ;;  %2647 = vrot.lane.b32.xlu2 %v5826_v55, %s3697_s12 }
 0x4db   : > { %2714 = vst.msk [vmem:[#allocation2 + $0x100] sm:$0xff] %vm2697_vm5, %v2634_v62  ;;  %v3094_v53 = vld [vmem:[#allocation2 + $0xf0] sm:$0xff] }
 0x4dc   : > { %2845 = vst.msk [vmem:[#allocation2 + $0x100] sm:$0xff] %vm2828_vm6, %v2765_v58  ;;  %3308 = vmatmul.f32.vlgmr.msra.gmra.mxu2 %v3094_v53  ;;  %v2973_v29 = vpop.permute.xlu2 %2972 }
 0x4dd   : > { %3050 = vst.msk [vmem:[#allocation2 + $0x128] sm:$0xff] %vm584_vm3, %v2973_v29 }
 0x4df   : > { %2954 = vrot.lane.b32.xlu1 %v7032_v3, %s3683_s21 }
 0x4e0   : > { %2778 = vrot.lane.b32.xlu0 %v5224_v59, %s3696_s11 }
 0x4e1   : > { %v2664_v54 = vpop.permute.xlu1 %2663 }
 0x4e2   : > { %2729 = vst.msk [vmem:[#allocation2 + $0x1f0] sm:$0xff] %vm2697_vm5, %v2664_v54  ;;  %v2941_v50 = vpop.permute.xlu0 %2940  ;;  %2984 = vrot.lane.b32.xlu2 %v5849_v6, %s3683_s21 }
 0x4e3   : > { %2860 = vst.msk [vmem:[#allocation2 + $0x1f0] sm:$0xff] %vm2828_vm6, %v2795_v11  ;;  %v3096_v55 = vld [vmem:[#allocation2 + $0x100] sm:$0xff]  ;;  %v7035_v11 = vld [vmem:[#allocation12_spill] sm:$0xff] }
 0x4e4   : > { %3034 = vst.msk [vmem:[#allocation2 + $0x28] sm:$0xff] %vm584_vm3, %v2941_v50  ;;  %3311 = vmatmul.f32.gmra.mxu2 %v3096_v55  ;;  %v2638_v49 = vpop.permute.xlu2 %2637  ;;  %v7037_v50 = vld [vmem:[#allocation15_spill] sm:$0xff] }
 0x4e5   : > { %2716 = vst.msk [vmem:[#allocation2 + $0x120] sm:$0xff] %vm2697_vm5, %v2638_v49 }
 0x4e7   : > { %2746 = vrot.lane.b32.xlu1 %v5127_v36, %s3696_s11  ;;  %v7033_v36 = vld [vmem:[#allocation24_spill] sm:$0xff] }
 0x4e8   : > { %2615 = vrot.lane.b32.xlu0 %v7028_v4, %s3697_s12  ;;  %v3101_v4 = vld [vmem:[#allocation2 + $0x128] sm:$0xff] }
 0x4e9   : > { %v2733_v59 = vpop.permute.xlu1 %2732 }
 0x4ea   : > { %v2602_v15 = vpop.permute.xlu0 %2601  ;;  %v3126_v47 = vld [vmem:[#allocation2 + $0x1f0] sm:$0xff]  ;;  %2649 = vrot.lane.b32.xlu2 %v5823_v27, %s3697_s12 }
 0x4eb   : > { %2698 = vst.msk [vmem:[#allocation2] sm:$0xff] %vm2697_vm5, %v2602_v15  ;;  %v3069_v44 = vld [vmem:[#allocation2 + $0x28] sm:$0xff]  ;;  %3356 = vmatmul.f32.vlgmr.msra.gmra.mxu3 %v3126_v47 }
 0x4ec   : > { %2829 = vst.msk [vmem:[#allocation2] sm:$0xff] %vm2828_vm6, %v2733_v59  ;;  %3583 = vmatmul.msk.f32.gmra.mxu1 %vm3150_vm4, %v3069_v44  ;;  %v2975_v22 = vpop.permute.xlu2 %2974 }
 0x4ed   : > { %3051 = vst.msk [vmem:[#allocation2 + $0x138] sm:$0xff] %vm584_vm3, %v2975_v22 }
 0x4ef   : > { %2956 = vrot.lane.b32.xlu1 %v7033_v36, %s3683_s21 }
 0x4f0   : > { %2780 = vrot.lane.b32.xlu0 %v5235_v56, %s3696_s11 }
 0x4f1   : > { %v2943_v40 = vpop.permute.xlu1 %2942 }
 0x4f2   : > { %3035 = vst.msk [vmem:[#allocation2 + $0x38] sm:$0xff] %vm584_vm3, %v2943_v40  ;;  %v2767_v27 = vpop.permute.xlu0 %2766  ;;  %2986 = vrot.lane.b32.xlu2 %v5846_v2, %s3683_s21 }
 0x4f3   : > { %2846 = vst.msk [vmem:[#allocation2 + $0x110] sm:$0xff] %vm2828_vm6, %v2767_v27  ;;  %v3064_v34 = vld [vmem:[#allocation2] sm:$0xff]  ;;  %3599 = vmatmul.msk.f32.vlgmr.msrb.gmra.mxu3 %vm3150_vm4, %v3101_v4 }
 0x4f4   : > { %3263 = vmatmul.f32.vlgmr.msra.gmra.mxu0 %v3064_v34  ;;  %v2640_v51 = vpop.permute.xlu2 %2639  ;;  %v3103_v56 = vld [vmem:[#allocation2 + $0x138] sm:$0xff] }
 0x4f5   : > { %2717 = vst.msk [vmem:[#allocation2 + $0x130] sm:$0xff] %vm2697_vm5, %v2640_v51 }
 0x4f7   : > { %2748 = vrot.lane.b32.xlu1 %v5124_v24, %s3696_s11 }
 0x4f8   : > { %2617 = vrot.lane.b32.xlu0 %v7029_v52, %s3697_s12  ;;  %v7034_v52 = vld [vmem:[#allocation30_spill] sm:$0xff] }
 0x4f9   : > { %v2735_v23 = vpop.permute.xlu1 %2734  ;;  %v3071_v28 = vld [vmem:[#allocation2 + $0x38] sm:$0xff] }
 0x4fa   : > { %v2604_v18 = vpop.permute.xlu0 %2603  ;;  %v3098_v19 = vld [vmem:[#allocation2 + $0x110] sm:$0xff]  ;;  %3584 = vmatmul.msk.f32.gmra.mxu1 %vm3150_vm4, %v3071_v28  ;;  %2651 = vrot.lane.b32.xlu2 %v5832_v16, %s3697_s12 }
 0x4fb   : > { %2699 = vst.msk [vmem:[#allocation2 + $0x10] sm:$0xff] %vm2697_vm5, %v2604_v18  ;;  %3314 = vmatmul.f32.gmra.mxu2 %v3098_v19  ;;  %3600 = vmatmul.msk.f32.gmra.mxu3 %vm3150_vm4, %v3103_v56 }
 0x4fc   : > { %2830 = vst.msk [vmem:[#allocation2 + $0x10] sm:$0xff] %vm2828_vm6, %v2735_v23  ;;  %v2977_v24 = vpop.permute.xlu2 %2976 }
 0x4fd   : > { %3052 = vst.msk [vmem:[#allocation2 + $0x148] sm:$0xff] %vm584_vm3, %v2977_v24 }
 0x4ff   : > { %2958 = vrot.lane.b32.xlu1 %v7034_v52, %s3683_s21 }
 0x500   : > { %2782 = vrot.lane.b32.xlu0 %v5273_v33, %s3696_s11 }
 0x501   : > { %v2945_v32 = vpop.permute.xlu1 %2944 }
 0x502   : > { %3036 = vst.msk [vmem:[#allocation2 + $0x48] sm:$0xff] %vm584_vm3, %v2945_v32  ;;  %v2769_v16 = vpop.permute.xlu0 %2768  ;;  %2988 = vrot.lane.b32.xlu2 %v5856_v10, %s3683_s21 }
 0x503   : > { %2847 = vst.msk [vmem:[#allocation2 + $0x120] sm:$0xff] %vm2828_vm6, %v2769_v16  ;;  %v3066_v58 = vld [vmem:[#allocation2 + $0x10] sm:$0xff] }
 0x504   : > { %3266 = vmatmul.f32.gmra.mxu0 %v3066_v58  ;;  %v2642_v45 = vpop.permute.xlu2 %2641  ;;  %v3105_v46 = vld [vmem:[#allocation2 + $0x148] sm:$0xff] }
 0x505   : > { %2718 = vst.msk [vmem:[#allocation2 + $0x140] sm:$0xff] %vm2697_vm5, %v2642_v45  ;;  %3601 = vmatmul.msk.f32.gmra.mxu3 %vm3150_vm4, %v3105_v46 }
 0x507   : > { %2519 = vrot.lane.b32.xlu1 %v7035_v11, %s3695_s10  ;;  %v2932_v11 = vrot.slane %v6086_v57, 2 }
 0x508   : > { %2619 = vrot.lane.b32.xlu0 %v7030_v38, %s3697_s12 }
 0x509   : > { %v2737_v33 = vpop.permute.xlu1 %2736  ;;  %v3073_v42 = vld [vmem:[#allocation2 + $0x48] sm:$0xff] }
 0x50a   : > { %v2606_v17 = vpop.permute.xlu0 %2605  ;;  %v3100_v30 = vld [vmem:[#allocation2 + $0x120] sm:$0xff]  ;;  %3585 = vmatmul.msk.f32.gmra.mxu1 %vm3150_vm4, %v3073_v42  ;;  %2750 = vrot.lane.b32.xlu2 %v5130_v35, %s3696_s11  ;;  %v7036_v35 = vld [vmem:[#allocation29_spill] sm:$0xff] }
 0x50b   : > { %2700 = vst.msk [vmem:[#allocation2 + $0x20] sm:$0xff] %vm2697_vm5, %v2606_v17  ;;  %3317 = vmatmul.f32.gmra.mxu2 %v3100_v30 }
 0x50c   : > { %2831 = vst.msk [vmem:[#allocation2 + $0x20] sm:$0xff] %vm2828_vm6, %v2737_v33  ;;  %v2979_v63 = vpop.permute.xlu2 %2978 }
 0x50d   : > { %3053 = vst.msk [vmem:[#allocation2 + $0x158] sm:$0xff] %vm584_vm3, %v2979_v63 }
 0x50f   : > { %2784 = vrot.lane.b32.xlu1 %v5257_v60, %s3696_s11 }
 0x510   : > { %2653 = vrot.lane.b32.xlu0 %v5849_v6, %s3697_s12 }
 0x511   : > { %v2947_v38 = vpop.permute.xlu1 %2946 }
 0x512   : > { %3037 = vst.msk [vmem:[#allocation2 + $0x58] sm:$0xff] %vm584_vm3, %v2947_v38  ;;  %v2771_v26 = vpop.permute.xlu0 %2770  ;;  %2960 = vrot.lane.b32.xlu2 %v7036_v35, %s3683_s21 }
 0x513   : > { %2848 = vst.msk [vmem:[#allocation2 + $0x130] sm:$0xff] %vm2828_vm6, %v2771_v26  ;;  %v3068_v5 = vld [vmem:[#allocation2 + $0x20] sm:$0xff] }
 0x514   : > { %3269 = vmatmul.f32.gmra.mxu0 %v3068_v5  ;;  %v2644_v62 = vpop.permute.xlu2 %2643  ;;  %v3107_v53 = vld [vmem:[#allocation2 + $0x158] sm:$0xff] }
 0x515   : > { %2719 = vst.msk [vmem:[#allocation2 + $0x150] sm:$0xff] %vm2697_vm5, %v2644_v62  ;;  %3602 = vmatmul.msk.f32.gmra.mxu3 %vm3150_vm4, %v3107_v53 }
 0x517   : > { %2621 = vrot.lane.b32.xlu1 %v7031_v13, %s3697_s12  ;;  %v2596_v13 = vrot.slane %v5960_v31, 2 }
 0x518   : > { %2990 = vrot.lane.b32.xlu0 %v5867_v37, %s3683_s21 }
 0x519   : > { %v2739_v60 = vpop.permute.xlu1 %2738  ;;  %v3075_v6 = vld [vmem:[#allocation2 + $0x58] sm:$0xff] }
 0x51a   : > { %v2608_v29 = vpop.permute.xlu0 %2607  ;;  %v3102_v54 = vld [vmem:[#allocation2 + $0x130] sm:$0xff]  ;;  %3586 = vmatmul.msk.f32.gmra.mxu1 %vm3150_vm4, %v3075_v6  ;;  %2521 = vrot.lane.b32.xlu2 %v7037_v50, %s3695_s10 }
 0x51b   : > { %2701 = vst.msk [vmem:[#allocation2 + $0x30] sm:$0xff] %vm2697_vm5, %v2608_v29  ;;  %3320 = vmatmul.f32.gmra.mxu2 %v3102_v54 }
 0x51c   : > { %2832 = vst.msk [vmem:[#allocation2 + $0x30] sm:$0xff] %vm2828_vm6, %v2739_v60  ;;  %v2981_v55 = vpop.permute.xlu2 %2980 }
 0x51d   : > { %3054 = vst.msk [vmem:[#allocation2 + $0x168] sm:$0xff] %vm584_vm3, %v2981_v55 }
 0x51f   : > { %2655 = vrot.lane.b32.xlu1 %v5846_v2, %s3697_s12  ;;  %v6362_v2 = vsel %vm617_vm2, %v2596_v13, %v2597_v8 }
 0x520   : > { %2752 = vrot.lane.b32.xlu0 %v5145_v21, %s3696_s11 }
 0x521   : > { %v2949_v49 = vpop.permute.xlu1 %2948 }
 0x522   : > { %3038 = vst.msk [vmem:[#allocation2 + $0x68] sm:$0xff] %vm584_vm3, %v2949_v49  ;;  %v2773_v59 = vpop.permute.xlu0 %2772  ;;  %2786 = vrot.lane.b32.xlu2 %v5287_v39, %s3696_s11 }
 0x523   : > { %2849 = vst.msk [vmem:[#allocation2 + $0x140] sm:$0xff] %vm2828_vm6, %v2773_v59  ;;  %v3070_v15 = vld [vmem:[#allocation2 + $0x30] sm:$0xff] }
 0x524   : > { %3272 = vmatmul.f32.gmra.mxu0 %v3070_v15  ;;  %v2646_v47 = vpop.permute.xlu2 %2645  ;;  %v3109_v21 = vld [vmem:[#allocation2 + $0x168] sm:$0xff] }
 0x525   : > { %2720 = vst.msk [vmem:[#allocation2 + $0x160] sm:$0xff] %vm2697_vm5, %v2646_v47  ;;  %3603 = vmatmul.msk.f32.gmra.mxu3 %vm3150_vm4, %v3109_v21 }
 0x527   : > { %2992 = vrot.lane.b32.xlu1 %v6362_v2, %s3683_s21 }
 0x528   : > { %2962 = vrot.lane.b32.xlu0 %v5750_v61, %s3683_s21  ;;  %v7038_v61 = vld [vmem:[#allocation17_spill] sm:$0xff] }
 0x529   : > { %v2741_v39 = vpop.permute.xlu1 %2740  ;;  %v3077_v44 = vld [vmem:[#allocation2 + $0x68] sm:$0xff] }
 0x52a   : > { %v2610_v22 = vpop.permute.xlu0 %2609  ;;  %v3104_v4 = vld [vmem:[#allocation2 + $0x140] sm:$0xff]  ;;  %3587 = vmatmul.msk.f32.gmra.mxu1 %vm3150_vm4, %v3077_v44  ;;  %2623 = vrot.lane.b32.xlu2 %v7032_v3, %s3697_s12 }
 0x52b   : > { %2702 = vst.msk [vmem:[#allocation2 + $0x40] sm:$0xff] %vm2697_vm5, %v2610_v22  ;;  %3323 = vmatmul.f32.gmra.mxu2 %v3104_v4 }
 0x52c   : > { %2833 = vst.msk [vmem:[#allocation2 + $0x40] sm:$0xff] %vm2828_vm6, %v2741_v39  ;;  %v2983_v8 = vpop.permute.xlu2 %2982 }
 0x52d   : > { %3055 = vst.msk [vmem:[#allocation2 + $0x178] sm:$0xff] %vm584_vm3, %v2983_v8 }
 0x52f   : > { %2754 = vrot.lane.b32.xlu1 %v5142_v43, %s3696_s11 }
 0x530   : > { %2523 = vrot.lane.b32.xlu0 %v7038_v61, %s3695_s10 }
 0x531   : > { %v2951_v40 = vpop.permute.xlu1 %2950 }
 0x532   : > { %3039 = vst.msk [vmem:[#allocation2 + $0x78] sm:$0xff] %vm584_vm3, %v2951_v40  ;;  %v2775_v27 = vpop.permute.xlu0 %2774  ;;  %2657 = vrot.lane.b32.xlu2 %v5856_v10, %s3697_s12 }
 0x533   : > { %2850 = vst.msk [vmem:[#allocation2 + $0x150] sm:$0xff] %vm2828_vm6, %v2775_v27  ;;  %v3072_v3 = vld [vmem:[#allocation2 + $0x40] sm:$0xff] }
 0x534   : > { %3275 = vmatmul.f32.gmra.mxu0 %v3072_v3  ;;  %v2648_v34 = vpop.permute.xlu2 %2647  ;;  %v3111_v51 = vld [vmem:[#allocation2 + $0x178] sm:$0xff] }
 0x535   : > { %2721 = vst.msk [vmem:[#allocation2 + $0x170] sm:$0xff] %vm2697_vm5, %v2648_v34  ;;  %3604 = vmatmul.msk.f32.gmra.mxu3 %vm3150_vm4, %v3111_v51 }
 0x537   : > { %2964 = vrot.lane.b32.xlu1 %v5760_v0, %s3683_s21  ;;  %v7039_v0 = vld [vmem:[#allocation16_spill] sm:$0xff] }
 0x538   : > { %2788 = vrot.lane.b32.xlu0 %v5960_v31, %s3696_s11 }
 0x539   : > { %v2743_v43 = vpop.permute.xlu1 %2742  ;;  %v3079_v56 = vld [vmem:[#allocation2 + $0x78] sm:$0xff] }
 0x53a   : > { %v2612_v10 = vpop.permute.xlu0 %2611  ;;  %v3106_v23 = vld [vmem:[#allocation2 + $0x150] sm:$0xff]  ;;  %3588 = vmatmul.msk.f32.gmra.mxu1 %vm3150_vm4, %v3079_v56  ;;  %2994 = vrot.lane.b32.xlu2 %v6083_v12, %s3683_s21  ;;  %v1678_v12 = vld [vmem:[%s5039_s5 + $0x198] sm:$0xff] }
 0x53b   : > { %2703 = vst.msk [vmem:[#allocation2 + $0x50] sm:$0xff] %vm2697_vm5, %v2612_v10  ;;  %3326 = vmatmul.f32.gmra.mxu2 %v3106_v23  ;;  %v6405_v58 = vmax.f32 %v1678_v12, 0.0 }
 0x53c   : > { %2834 = vst.msk [vmem:[#allocation2 + $0x50] sm:$0xff] %vm2828_vm6, %v2743_v43  ;;  %v2985_v28 = vpop.permute.xlu2 %2984 }
 0x53d   : > { %3056 = vst.msk [vmem:[#allocation2 + $0x188] sm:$0xff] %vm584_vm3, %v2985_v28  ;;  %v2931_v46 = vrot.slane %v6405_v58, 2 }
 0x53f   : > { %2525 = vrot.lane.b32.xlu1 %v7039_v0, %s3695_s10 }
 0x540   : > { %2625 = vrot.lane.b32.xlu0 %v7033_v36, %s3697_s12  ;;  %v2462_v36 = vrot.slane %v5960_v31, 1  ;;  %v2933_v31 = vsel %vm617_vm2, %v2931_v46, %v2932_v11 }
 0x541   : > { %v2953_v18 = vpop.permute.xlu1 %2952 }
 0x542   : > { %3040 = vst.msk [vmem:[#allocation2 + $0x88] sm:$0xff] %vm584_vm3, %v2953_v18  ;;  %v2777_v19 = vpop.permute.xlu0 %2776  ;;  %2756 = vrot.lane.b32.xlu2 %v5148_v48, %s3696_s11  ;;  %v2464_v33 = vsel %vm407_vm0, %v2462_v36, %v2463_v25  ;;  %v6431_v25 = vld [vmem:[%s5039_s5 + $0x1a8] sm:$0x3] }
 0x543   : > { %2851 = vst.msk [vmem:[#allocation2 + $0x160] sm:$0xff] %vm2828_vm6, %v2777_v19  ;;  %v3074_v24 = vld [vmem:[#allocation2 + $0x50] sm:$0xff]  ;;  %v1734_v63 = vmax.f32 %v6431_v25, 0.0 }
 0x544   : > { %3278 = vmatmul.f32.gmra.mxu0 %v3074_v24  ;;  %v2650_v32 = vpop.permute.xlu2 %2649  ;;  %v3113_v16 = vld [vmem:[#allocation2 + $0x188] sm:$0xff]  ;;  %2927 = vst.msk [vmem:[#allocation2 + $0x1c8] sm:$0xff] %vm326_vm1, %v2464_v33 }
 0x545   : > { %2722 = vst.msk [vmem:[#allocation2 + $0x180] sm:$0xff] %vm2697_vm5, %v2650_v32  ;;  %3605 = vmatmul.msk.f32.gmra.mxu3 %vm3150_vm4, %v3113_v16 }
 0x547   : > { %2790 = vrot.lane.b32.xlu1 %v5964_v14, %s3696_s11 }
 0x548   : > { %2659 = vrot.lane.b32.xlu0 %v5867_v37, %s3697_s12 }
 0x549   : > { %v2745_v48 = vpop.permute.xlu1 %2744  ;;  %v3081_v45 = vld [vmem:[#allocation2 + $0x88] sm:$0xff] }
 0x54a   : > { %v2614_v42 = vpop.permute.xlu0 %2613  ;;  %v3108_v17 = vld [vmem:[#allocation2 + $0x160] sm:$0xff]  ;;  %3589 = vmatmul.msk.f32.gmra.mxu1 %vm3150_vm4, %v3081_v45  ;;  %2966 = vrot.lane.b32.xlu2 %v5778_v41, %s3683_s21 }
 0x54b   : > { %2704 = vst.msk [vmem:[#allocation2 + $0x60] sm:$0xff] %vm2697_vm5, %v2614_v42  ;;  %3329 = vmatmul.f32.gmra.mxu2 %v3108_v17 }
 0x54c   : > { %2835 = vst.msk [vmem:[#allocation2 + $0x60] sm:$0xff] %vm2828_vm6, %v2745_v48  ;;  %v2987_v37 = vpop.permute.xlu2 %2986 }
 0x54d   : > { %3057 = vst.msk [vmem:[#allocation2 + $0x198] sm:$0xff] %vm584_vm3, %v2987_v37 }
 0x54f   : > { %2627 = vrot.lane.b32.xlu1 %v7034_v52, %s3697_s12  ;;  %v2934_v52 = vrot.slane %v1734_v63, 2  ;;  %v3377_v39 = vpop.f32.mrf.mxu1 }
 0x550   : > { %2996 = vrot.lane.b32.xlu0 %v2933_v31, %s3683_s21 }
 0x551   : > { %v2955_v14 = vpop.permute.xlu1 %2954  ;;  %v2935_v6 = vsel %vm617_vm2, %v2932_v11, %v2934_v52 }
 0x552   : > { %3041 = vst.msk [vmem:[#allocation2 + $0x98] sm:$0xff] %vm584_vm3, %v2955_v14  ;;  %v2779_v41 = vpop.permute.xlu0 %2778  ;;  %2527 = vrot.lane.b32.xlu2 %v2464_v33, %s3695_s10 }
 0x553   : > { %2852 = vst.msk [vmem:[#allocation2 + $0x170] sm:$0xff] %vm2828_vm6, %v2779_v41  ;;  %v3076_v30 = vld [vmem:[#allocation2 + $0x60] sm:$0xff] }
 0x554   : > { %3281 = vmatmul.f32.gmra.mxu0 %v3076_v30  ;;  %v2652_v38 = vpop.permute.xlu2 %2651  ;;  %v3115_v26 = vld [vmem:[#allocation2 + $0x198] sm:$0xff] }
 0x555   : > { %2723 = vst.msk [vmem:[#allocation2 + $0x190] sm:$0xff] %vm2697_vm5, %v2652_v38  ;;  %3606 = vmatmul.msk.f32.gmra.mxu3 %vm3150_vm4, %v3115_v26 }
 0x557   : > { %2661 = vrot.lane.b32.xlu1 %v6362_v2, %s3697_s12  ;;  %v3380_v0 = vpop.f32.mrf.mxu1 }
 0x558   : > { %2758 = vrot.lane.b32.xlu0 %v5163_v7, %s3696_s11 }
 0x559   : > { %v2747_v5 = vpop.permute.xlu1 %2746  ;;  %v3083_v62 = vld [vmem:[#allocation2 + $0x98] sm:$0xff] }
 0x55a   : > { %v2616_v53 = vpop.permute.xlu0 %2615  ;;  %v3110_v60 = vld [vmem:[#allocation2 + $0x170] sm:$0xff]  ;;  %3590 = vmatmul.msk.f32.gmra.mxu1 %vm3150_vm4, %v3083_v62  ;;  %2792 = vrot.lane.b32.xlu2 %v6405_v58, %s3696_s11 }
 0x55b   : > { %2705 = vst.msk [vmem:[#allocation2 + $0x70] sm:$0xff] %vm2697_vm5, %v2616_v53  ;;  %3332 = vmatmul.f32.gmra.mxu2 %v3110_v60 }
 0x55c   : > { %2836 = vst.msk [vmem:[#allocation2 + $0x70] sm:$0xff] %vm2828_vm6, %v2747_v5  ;;  %v2989_v7 = vpop.permute.xlu2 %2988 }
 0x55d   : > { %3058 = vst.msk [vmem:[#allocation2 + $0x1a8] sm:$0xff] %vm584_vm3, %v2989_v7 }
 0x55f   : > { %2998 = vrot.lane.b32.xlu1 %v2935_v6, %s3683_s21  ;;  %v6483_v8 = vpop.f32.mrf.mxu2 }
 0x560   : > { %2968 = vrot.lane.b32.xlu0 %v5775_v9, %s3683_s21 }
 0x561   : > { %v2957_v29 = vpop.permute.xlu1 %2956 }
 0x562   : > { %3042 = vst.msk [vmem:[#allocation2 + $0xa8] sm:$0xff] %vm584_vm3, %v2957_v29  ;;  %v2781_v54 = vpop.permute.xlu0 %2780  ;;  %2629 = vrot.lane.b32.xlu2 %v7036_v35, %s3697_s12 }
 0x563   : > { %2853 = vst.msk [vmem:[#allocation2 + $0x180] sm:$0xff] %vm2828_vm6, %v2781_v54  ;;  %v3078_v50 = vld [vmem:[#allocation2 + $0x70] sm:$0xff] }
 0x564   : > { %3284 = vmatmul.f32.gmra.mxu0 %v3078_v50  ;;  %v2751_v55 = vpop.permute.xlu2 %2750  ;;  %v3117_v13 = vld [vmem:[#allocation2 + $0x1a8] sm:$0xff] }
 0x565   : > { %3607 = vmatmul.msk.f32.gmra.mxu3 %vm3150_vm4, %v3117_v13 }
 0x567   : > { %2970 = vrot.lane.b32.xlu1 %v7027_v20, %s3683_s21  ;;  %v6471_v20 = vld [vmem:[%s6652_s3] ss:$0 sm:$0xff]  ;;  %s3615_s21 = sshll.u32 %s7041_s16, 8  ;;  %v6491_v51 = vpop.f32.mrf.mxu2 }
 0x568   : > { %2760 = vrot.lane.b32.xlu0 %v5160_v1, %s3696_s11  ;;  %s6479_s8 = scalar_lea.vmem %s6653_s4, %s3615_s21 }
 0x569   : > { %v2749_v9 = vpop.permute.xlu1 %2748  ;;  %v3085_v49 = vld [vmem:[#allocation2 + $0xa8] sm:$0xff]  ;;  %v3383_v30 = vpop.f32.mrf.mxu1 }
 0x56a   : > { %v2618_v59 = vpop.permute.xlu0 %2617  ;;  %v3112_v15 = vld [vmem:[#allocation2 + $0x180] sm:$0xff]  ;;  %3591 = vmatmul.msk.f32.gmra.mxu1 %vm3150_vm4, %v3085_v49  ;;  %v2863_v49 = vrot.slane %v6086_v57, 1 }
 0x56b   : > { %2706 = vst.msk [vmem:[#allocation2 + $0x80] sm:$0xff] %vm2697_vm5, %v2618_v59  ;;  %3335 = vmatmul.f32.gmra.mxu2 %v3112_v15 }
 0x56c   : > { %2837 = vst.msk [vmem:[#allocation2 + $0x80] sm:$0xff] %vm2828_vm6, %v2749_v9  ;;  %v2961_v35 = vpop.permute.xlu2 %2960  ;;  %v2862_v9 = vrot.slane %v6405_v58, 1 }
 0x56d   : > { %3044 = vst.msk [vmem:[#allocation2 + $0xc8] sm:$0xff] %vm584_vm3, %v2961_v35 }
 0x56e   : > { %v6502_v32 = vpop.f32.mrf.mxu3  ;;  %v2864_v57 = vsel %vm407_vm0, %v2862_v9, %v2863_v49 }
 0x56f   : > { %2929 = vst.msk [vmem:[#allocation2 + $0x1e8] sm:$0xff] %vm326_vm1, %v2864_v57 }
 0x571   : > { %v3264_v1 = vpop.f32.mrf.mxu0  ;;  %v2959_v2 = vpop.permute.xlu1 %2958 }
 0x572   : > { %v3265_v47 = vadd.f32 %v6471_v20, %v3264_v1  ;;  %3043 = vst.msk [vmem:[#allocation2 + $0xb8] sm:$0xff] %vm584_vm3, %v2959_v2  ;;  %v2783_v21 = vpop.permute.xlu0 %2782 }
 0x573   : > { %2854 = vst.msk [vmem:[#allocation2 + $0x190] sm:$0xff] %vm2828_vm6, %v2783_v21  ;;  %v3080_v44 = vld [vmem:[#allocation2 + $0x80] sm:$0xff] }
 0x574   : > { %v3378_v22 = vadd.f32 %v3377_v39, %v3265_v47  ;;  %3287 = vmatmul.f32.gmra.mxu0 %v3080_v44  ;;  %v2522_v4 = vpop.permute.xlu2 %2521  ;;  %v3089_v43 = vld [vmem:[#allocation2 + $0xc8] sm:$0xff] }
 0x575   : > { %2591 = vst.msk [vmem:[#allocation2 + $0x1b0] sm:$0xff] %vm2563_vm15, %v2522_v4 }
 0x576   : > { %3473 = vst.msk [vmem:[%s6479_s8] sm:$0xff] %vm326_vm1, %v3378_v22  ;;  %v3431_v33 = vpop.f32.mrf.mxu3 }
 0x577   : > { %v3386_v1 = vpop.f32.mrf.mxu1 }
 0x579   : > { %v2520_v61 = vpop.permute.xlu1 %2519  ;;  %v3087_v40 = vld [vmem:[#allocation2 + $0xb8] sm:$0xff] }
 0x57a   : > { %2590 = vst.msk [vmem:[#allocation2 + $0x1a0] sm:$0xff] %vm2563_vm15, %v2520_v61  ;;  %v2620_v27 = vpop.permute.xlu0 %2619  ;;  %v3114_v3 = vld [vmem:[#allocation2 + $0x190] sm:$0xff]  ;;  %3592 = vmatmul.msk.f32.gmra.mxu1 %vm3150_vm4, %v3087_v40 }
 0x57b   : > { %2707 = vst.msk [vmem:[#allocation2 + $0x90] sm:$0xff] %vm2697_vm5, %v2620_v27  ;;  %3338 = vmatmul.f32.gmra.mxu2 %v3114_v3 }
 0x57c   : > { %2838 = vst.msk [vmem:[#allocation2 + $0x90] sm:$0xff] %vm2828_vm6, %v2751_v55  ;;  %v2787_v34 = vpop.permute.xlu2 %2786 }
 0x57e   : > { %v6498_v24 = vpop.f32.mrf.mxu2  ;;  %v3434_v29 = vpop.f32.mrf.mxu3 }
 0x581   : > { %v3267_v56 = vpop.f32.mrf.mxu0  ;;  %v2785_v10 = vpop.permute.xlu1 %2784 }
 0x582   : > { %v3268_v23 = vadd.f32 %v6471_v20, %v3267_v56  ;;  %v2654_v28 = vpop.permute.xlu0 %2653  ;;  %3593 = vmatmul.msk.f32.gmra.mxu1 %vm3150_vm4, %v3089_v43  ;;  %v2865_v56 = vrot.slane %v1734_v63, 1 }
 0x583   : > { %2724 = vst.msk [vmem:[#allocation2 + $0x1a0] sm:$0xff] %vm2697_vm5, %v2654_v28  ;;  %v3082_v18 = vld [vmem:[#allocation2 + $0x90] sm:$0xff] }
 0x584   : > { %v3381_v19 = vadd.f32 %v3380_v0, %v3268_v23  ;;  %2855 = vst.msk [vmem:[#allocation2 + $0x1a0] sm:$0xff] %vm2828_vm6, %v2785_v10  ;;  %3290 = vmatmul.f32.gmra.mxu0 %v3082_v18  ;;  %v2624_v12 = vpop.permute.xlu2 %2623 }
 0x585   : > { %2709 = vst.msk [vmem:[#allocation2 + $0xb0] sm:$0xff] %vm2697_vm5, %v2624_v12  ;;  %v2866_v12 = vsel %vm407_vm0, %v2863_v49, %v2865_v56 }
 0x586   : > { %3474 = vst.msk [vmem:[%s6479_s8 + $0x8] sm:$0xff] %vm326_vm1, %v3381_v19 }
 0x587   : > { %v3389_v0 = vpop.f32.mrf.mxu1  ;;  %2930 = vst.msk [vmem:[#allocation2 + $0x1f8] sm:$0xff] %vm326_vm1, %v2866_v12 }
 0x588   : > { %v3437_v40 = vpop.f32.mrf.mxu3 }
 0x589   : > { %v2622_v16 = vpop.permute.xlu1 %2621 }
 0x58a   : > { %2708 = vst.msk [vmem:[#allocation2 + $0xa0] sm:$0xff] %vm2697_vm5, %v2622_v16  ;;  %v2991_v36 = vpop.permute.xlu0 %2990 }
 0x58b   : > { %3059 = vst.msk [vmem:[#allocation2 + $0x1b8] sm:$0xff] %vm584_vm3, %v2991_v36  ;;  %v3116_v48 = vld [vmem:[#allocation2 + $0x1a0] sm:$0xff] }
 0x58c   : > { %3341 = vmatmul.f32.gmra.mxu2 %v3116_v48  ;;  %v2658_v45 = vpop.permute.xlu2 %2657 }
 0x58e   : > { %v3318_v46 = vpop.f32.mrf.mxu2 }
 0x58f   : > { %v3319_v11 = vadd.f32 %v6471_v20, %v3318_v46 }
 0x591   : > { %v3432_v42 = vadd.f32 %v3431_v33, %v3319_v11  ;;  %v3270_v17 = vpop.f32.mrf.mxu0  ;;  %v2656_v37 = vpop.permute.xlu1 %2655 }
 0x592   : > { %v3271_v31 = vadd.f32 %v6471_v20, %v3270_v17  ;;  %2725 = vst.msk [vmem:[#allocation2 + $0x1b0] sm:$0xff] %vm2697_vm5, %v2656_v37  ;;  %v2753_v14 = vpop.permute.xlu0 %2752  ;;  %v3119_v41 = vld [vmem:[#allocation2 + $0x1b8] sm:$0xff] }
 0x593   : > { %3491 = vst.msk [vmem:[%s6479_s8 + $0x90] sm:$0xff] %vm326_vm1, %v3432_v42  ;;  %3608 = vmatmul.msk.f32.gmra.mxu3 %vm3150_vm4, %v3119_v41 }
 0x594   : > { %v3384_v38 = vadd.f32 %v3383_v30, %v3271_v31  ;;  %2856 = vst.msk [vmem:[#allocation2 + $0x1b0] sm:$0xff] %vm2828_vm6, %v2787_v34  ;;  %v2995_v26 = vpop.permute.xlu2 %2994 }
 0x595   : > { %2839 = vst.msk [vmem:[#allocation2 + $0xa0] sm:$0xff] %vm2828_vm6, %v2753_v14 }
 0x596   : > { %3475 = vst.msk [vmem:[%s6479_s8 + $0x10] sm:$0xff] %vm326_vm1, %v3384_v38 }
 0x597   : > { %3061 = vst.msk [vmem:[#allocation2 + $0x1d8] sm:$0xff] %vm584_vm3, %v2995_v26  ;;  %v3392_v14 = vpop.f32.mrf.mxu1 }
 0x598   : > { %v3440_v11 = vpop.f32.mrf.mxu3 }
 0x599   : > { %v2993_v52 = vpop.permute.xlu1 %2992 }
 0x59a   : > { %3060 = vst.msk [vmem:[#allocation2 + $0x1c8] sm:$0xff] %vm584_vm3, %v2993_v52  ;;  %v2963_v5 = vpop.permute.xlu0 %2962 }
 0x59b   : > { %3045 = vst.msk [vmem:[#allocation2 + $0xd8] sm:$0xff] %vm584_vm3, %v2963_v5  ;;  %v3118_v62 = vld [vmem:[#allocation2 + $0x1b0] sm:$0xff] }
 0x59c   : > { %v3084_v53 = vld [vmem:[#allocation2 + $0xa0] sm:$0xff]  ;;  %3344 = vmatmul.f32.gmra.mxu2 %v3118_v62  ;;  %v2757_v60 = vpop.permute.xlu2 %2756 }
 0x59d   : > { %3293 = vmatmul.f32.gmra.mxu0 %v3084_v53 }
 0x59e   : > { %v3321_v6 = vpop.f32.mrf.mxu2  ;;  %v3123_v58 = vld [vmem:[#allocation2 + $0x1d8] sm:$0xff] }
 0x59f   : > { %v3322_v7 = vadd.f32 %v6471_v20, %v3321_v6 }
 0x5a1   : > { %v3435_v54 = vadd.f32 %v3434_v29, %v3322_v7  ;;  %v3273_v50 = vpop.f32.mrf.mxu0  ;;  %v2755_v55 = vpop.permute.xlu1 %2754  ;;  %v3121_v13 = vld [vmem:[#allocation2 + $0x1c8] sm:$0xff] }
 0x5a2   : > { %v3274_v59 = vadd.f32 %v6471_v20, %v3273_v50  ;;  %2840 = vst.msk [vmem:[#allocation2 + $0xb0] sm:$0xff] %vm2828_vm6, %v2755_v55  ;;  %v2524_v15 = vpop.permute.xlu0 %2523  ;;  %v3091_v35 = vld [vmem:[#allocation2 + $0xd8] sm:$0xff]  ;;  %3609 = vmatmul.msk.f32.gmra.mxu3 %vm3150_vm4, %v3121_v13 }
 0x5a3   : > { %3492 = vst.msk [vmem:[%s6479_s8 + $0x98] sm:$0xff] %vm326_vm1, %v3435_v54  ;;  %3594 = vmatmul.msk.f32.gmra.mxu1 %vm3150_vm4, %v3091_v35 }
 0x5a4   : > { %v3387_v2 = vadd.f32 %v3386_v1, %v3274_v59  ;;  %2592 = vst.msk [vmem:[#allocation2 + $0x1c0] sm:$0xff] %vm2563_vm15, %v2524_v15  ;;  %v2967_v47 = vpop.permute.xlu2 %2966 }
 0x5a5   : > { %2726 = vst.msk [vmem:[#allocation2 + $0x1c0] sm:$0xff] %vm2697_vm5, %v2658_v45 }
 0x5a6   : > { %3476 = vst.msk [vmem:[%s6479_s8 + $0x18] sm:$0xff] %vm326_vm1, %v3387_v2 }
 0x5a7   : > { %3047 = vst.msk [vmem:[#allocation2 + $0xf8] sm:$0xff] %vm584_vm3, %v2967_v47  ;;  %v3395_v55 = vpop.f32.mrf.mxu1 }
 0x5a8   : > { %v3443_v53 = vpop.f32.mrf.mxu3 }
 0x5a9   : > { %v2965_v21 = vpop.permute.xlu1 %2964  ;;  %v3086_v39 = vld [vmem:[#allocation2 + $0xb0] sm:$0xff] }
 0x5aa   : > { %3046 = vst.msk [vmem:[#allocation2 + $0xe8] sm:$0xff] %vm584_vm3, %v2965_v21  ;;  %v2789_v44 = vpop.permute.xlu0 %2788  ;;  %3296 = vmatmul.f32.gmra.mxu0 %v3086_v39  ;;  %3610 = vmatmul.msk.f32.gmra.mxu3 %vm3150_vm4, %v3123_v58 }
 0x5ab   : > { %2857 = vst.msk [vmem:[#allocation2 + $0x1c0] sm:$0xff] %vm2828_vm6, %v2789_v44 }
 0x5ac   : > { %v2528_v22 = vpop.permute.xlu2 %2527 }
 0x5ad   : > { %2594 = vst.msk [vmem:[#allocation2 + $0x1e0] sm:$0xff] %vm2563_vm15, %v2528_v22 }
 0x5ae   : > { %v3324_v4 = vpop.f32.mrf.mxu2  ;;  %v3095_v25 = vld [vmem:[#allocation2 + $0xf8] sm:$0xff] }
 0x5af   : > { %v3325_v61 = vadd.f32 %v6471_v20, %v3324_v4 }
 0x5b1   : > { %v3438_v27 = vadd.f32 %v3437_v40, %v3325_v61  ;;  %v3276_v3 = vpop.f32.mrf.mxu0  ;;  %v2526_v34 = vpop.permute.xlu1 %2525  ;;  %v3093_v43 = vld [vmem:[#allocation2 + $0xe8] sm:$0xff] }
 0x5b2   : > { %v3277_v10 = vadd.f32 %v6471_v20, %v3276_v3  ;;  %2593 = vst.msk [vmem:[#allocation2 + $0x1d0] sm:$0xff] %vm2563_vm15, %v2526_v34  ;;  %v2626_v23 = vpop.permute.xlu0 %2625  ;;  %v3120_v28 = vld [vmem:[#allocation2 + $0x1c0] sm:$0xff]  ;;  %3595 = vmatmul.msk.f32.gmra.mxu1 %vm3150_vm4, %v3093_v43 }
 0x5b3   : > { %3493 = vst.msk [vmem:[%s6479_s8 + $0xa0] sm:$0xff] %vm326_vm1, %v3438_v27  ;;  %3347 = vmatmul.f32.gmra.mxu2 %v3120_v28 }
 0x5b4   : > { %v3390_v18 = vadd.f32 %v3389_v0, %v3277_v10  ;;  %2710 = vst.msk [vmem:[#allocation2 + $0xc0] sm:$0xff] %vm2697_vm5, %v2626_v23  ;;  %v2793_v19 = vpop.permute.xlu2 %2792 }
 0x5b5   : > { %2841 = vst.msk [vmem:[#allocation2 + $0xc0] sm:$0xff] %vm2828_vm6, %v2757_v60 }
 0x5b6   : > { %3477 = vst.msk [vmem:[%s6479_s8 + $0x20] sm:$0xff] %vm326_vm1, %v3390_v18 }
 0x5b7   : > { %v3398_v22 = vpop.f32.mrf.mxu1 }
 0x5b8   : > { %v3446_v47 = vpop.f32.mrf.mxu3 }
 0x5b9   : > { %v2791_v63 = vpop.permute.xlu1 %2790 }
 0x5ba   : > { %v2660_v16 = vpop.permute.xlu0 %2659  ;;  %3596 = vmatmul.msk.f32.gmra.mxu1 %vm3150_vm4, %v3095_v25 }
 0x5bb   : > { %2727 = vst.msk [vmem:[#allocation2 + $0x1d0] sm:$0xff] %vm2697_vm5, %v2660_v16 }
 0x5bc   : > { %2858 = vst.msk [vmem:[#allocation2 + $0x1d0] sm:$0xff] %vm2828_vm6, %v2791_v63  ;;  %v3088_v36 = vld [vmem:[#allocation2 + $0xc0] sm:$0xff]  ;;  %v2630_v48 = vpop.permute.xlu2 %2629 }
 0x5bd   : > { %3299 = vmatmul.f32.gmra.mxu0 %v3088_v36  ;;  %2712 = vst.msk [vmem:[#allocation2 + $0xe0] sm:$0xff] %vm2697_vm5, %v2630_v48 }
 0x5be   : > { %v3327_v45 = vpop.f32.mrf.mxu2 }
 0x5bf   : > { %v3328_v46 = vadd.f32 %v6471_v20, %v3327_v45 }
 0x5c1   : > { %v3441_v33 = vadd.f32 %v3440_v11, %v3328_v46  ;;  %v3279_v42 = vpop.f32.mrf.mxu0  ;;  %v2628_v17 = vpop.permute.xlu1 %2627 }
 0x5c2   : > { %v3280_v37 = vadd.f32 %v6471_v20, %v3279_v42  ;;  %2711 = vst.msk [vmem:[#allocation2 + $0xd0] sm:$0xff] %vm2697_vm5, %v2628_v17  ;;  %v2997_v31 = vpop.permute.xlu0 %2996 }
 0x5c3   : > { %3494 = vst.msk [vmem:[%s6479_s8 + $0xa8] sm:$0xff] %vm326_vm1, %v3441_v33  ;;  %v3122_v41 = vld [vmem:[#allocation2 + $0x1d0] sm:$0xff] }
 0x5c4   : > { %v3393_v30 = vadd.f32 %v3392_v14, %v3280_v37  ;;  %3062 = vst.msk [vmem:[#allocation2 + $0x1e8] sm:$0xff] %vm584_vm3, %v2997_v31  ;;  %3350 = vmatmul.f32.gmra.mxu2 %v3122_v41 }
 0x5c6   : > { %3478 = vst.msk [vmem:[%s6479_s8 + $0x28] sm:$0xff] %vm326_vm1, %v3393_v30 }
 0x5c7   : > { %v3401_v56 = vpop.f32.mrf.mxu1 }
 0x5c8   : > { %v3449_v27 = vpop.f32.mrf.mxu3 }
 0x5c9   : > { %v2662_v38 = vpop.permute.xlu1 %2661 }
 0x5ca   : > { %2728 = vst.msk [vmem:[#allocation2 + $0x1e0] sm:$0xff] %vm2697_vm5, %v2662_v38  ;;  %v2759_v26 = vpop.permute.xlu0 %2758 }
 0x5cb   : > { %2842 = vst.msk [vmem:[#allocation2 + $0xd0] sm:$0xff] %vm2828_vm6, %v2759_v26  ;;  %v3125_v52 = vld [vmem:[#allocation2 + $0x1e8] sm:$0xff] }
 0x5cc   : > { %2859 = vst.msk [vmem:[#allocation2 + $0x1e0] sm:$0xff] %vm2828_vm6, %v2793_v19  ;;  %3611 = vmatmul.msk.f32.gmra.mxu3 %vm3150_vm4, %v3125_v52 }
 0x5ce   : > { %v3330_v5 = vpop.f32.mrf.mxu2 }
 0x5cf   : > { %v3331_v62 = vadd.f32 %v6471_v20, %v3330_v5 }
 0x5d1   : > { %v3444_v60 = vadd.f32 %v3443_v53, %v3331_v62  ;;  %v3282_v6 = vpop.f32.mrf.mxu0  ;;  %v2999_v7 = vpop.permute.xlu1 %2998  ;;  %v3310_v53 = vadd.f32 %v6471_v20, %v6483_v8 }
 0x5d2   : > { %v3283_v29 = vadd.f32 %v6471_v20, %v3282_v6  ;;  %3063 = vst.msk [vmem:[#allocation2 + $0x1f8] sm:$0xff] %vm584_vm3, %v2999_v7  ;;  %v2969_v54 = vpop.permute.xlu0 %2968  ;;  %v3090_v50 = vld [vmem:[#allocation2 + $0xd0] sm:$0xff] }
 0x5d3   : > { %3495 = vst.msk [vmem:[%s6479_s8 + $0xb0] sm:$0xff] %vm326_vm1, %v3444_v60  ;;  %3302 = vmatmul.f32.gmra.mxu0 %v3090_v50  ;;  %v3124_v13 = vld [vmem:[#allocation2 + $0x1e0] sm:$0xff] }
 0x5d4   : > { %v3396_v9 = vadd.f32 %v3395_v55, %v3283_v29  ;;  %3048 = vst.msk [vmem:[#allocation2 + $0x108] sm:$0xff] %vm584_vm3, %v2969_v54  ;;  %3353 = vmatmul.f32.gmra.mxu2 %v3124_v13 }
 0x5d6   : > { %3479 = vst.msk [vmem:[%s6479_s8 + $0x30] sm:$0xff] %vm326_vm1, %v3396_v9 }
 0x5d7   : > { %v3404_v25 = vpop.f32.mrf.mxu1 }
 0x5d8   : > { %v3452_v0 = vpop.f32.mrf.mxu3 }
 0x5d9   : > { %v2971_v49 = vpop.permute.xlu1 %2970  ;;  %v3127_v59 = vld [vmem:[#allocation2 + $0x1f8] sm:$0xff] }
 0x5da   : > { %3049 = vst.msk [vmem:[#allocation2 + $0x118] sm:$0xff] %vm584_vm3, %v2971_v49  ;;  %v2761_v15 = vpop.permute.xlu0 %2760  ;;  %3612 = vmatmul.msk.f32.gmra.mxu3 %vm3150_vm4, %v3127_v59 }
 0x5db   : > { %2843 = vst.msk [vmem:[#allocation2 + $0xe0] sm:$0xff] %vm2828_vm6, %v2761_v15  ;;  %v3097_v35 = vld [vmem:[#allocation2 + $0x108] sm:$0xff] }
 0x5dc   : > { %3597 = vmatmul.msk.f32.gmra.mxu1 %vm3150_vm4, %v3097_v35 }
 0x5de   : > { %v3333_v1 = vpop.f32.mrf.mxu2 }
 0x5df   : > { %v3334_v2 = vadd.f32 %v6471_v20, %v3333_v1 }
 0x5e1   : > { %v3447_v57 = vadd.f32 %v3446_v47, %v3334_v2  ;;  %v3285_v58 = vpop.f32.mrf.mxu0  ;;  %v3099_v21 = vld [vmem:[#allocation2 + $0x118] sm:$0xff] }
 0x5e2   : > { %v3286_v39 = vadd.f32 %v6471_v20, %v3285_v58  ;;  %v3092_v44 = vld [vmem:[#allocation2 + $0xe0] sm:$0xff]  ;;  %v3313_v58 = vadd.f32 %v6471_v20, %v6491_v51 }
 0x5e3   : > { %3496 = vst.msk [vmem:[%s6479_s8 + $0xb8] sm:$0xff] %vm326_vm1, %v3447_v57  ;;  %3305 = vmatmul.f32.gmra.mxu0 %v3092_v44 }
 0x5e4   : > { %v3399_v4 = vadd.f32 %v3398_v22, %v3286_v39  ;;  %3598 = vmatmul.msk.f32.gmra.mxu1 %vm3150_vm4, %v3099_v21 }
 0x5e6   : > { %3480 = vst.msk [vmem:[%s6479_s8 + $0x38] sm:$0xff] %vm326_vm1, %v3399_v4  ;;  %v3358_v4 = vadd.f32 %v6471_v20, %v6502_v32 }
 0x5e7   : > { %v3407_v16 = vpop.f32.mrf.mxu1 }
 0x5e8   : > { %v3455_v45 = vpop.f32.mrf.mxu3 }
 0x5ee   : > { %v3336_v61 = vpop.f32.mrf.mxu2 }
 0x5ef   : > { %v3337_v40 = vadd.f32 %v6471_v20, %v3336_v61 }
 0x5f1   : > { %v3450_v3 = vadd.f32 %v3449_v27, %v3337_v40  ;;  %v3288_v34 = vpop.f32.mrf.mxu0  ;;  %v3316_v27 = vadd.f32 %v6471_v20, %v6498_v24 }
 0x5f2   : > { %v3289_v43 = vadd.f32 %v6471_v20, %v3288_v34 }
 0x5f3   : > { %3497 = vst.msk [vmem:[%s6479_s8 + $0xc0] sm:$0xff] %vm326_vm1, %v3450_v3 }
 0x5f4   : > { %v3402_v10 = vadd.f32 %v3401_v56, %v3289_v43 }
 0x5f6   : > { %3481 = vst.msk [vmem:[%s6479_s8 + $0x40] sm:$0xff] %vm326_vm1, %v3402_v10 }
 0x5f7   : > { %v3410_v11 = vpop.f32.mrf.mxu1 }
 0x5fe   : > { %v3339_v23 = vpop.f32.mrf.mxu2 }
 0x5ff   : > { %v3340_v28 = vadd.f32 %v6471_v20, %v3339_v23  ;;  %v3413_v37 = vpop.f32.mrf.mxu1 }
 0x601   : > { %v3453_v18 = vadd.f32 %v3452_v0, %v3340_v28  ;;  %v3291_v19 = vpop.f32.mrf.mxu0 }
 0x602   : > { %v3292_v12 = vadd.f32 %v6471_v20, %v3291_v19 }
 0x603   : > { %3498 = vst.msk [vmem:[%s6479_s8 + $0xc8] sm:$0xff] %vm326_vm1, %v3453_v18 }
 0x604   : > { %v3405_v63 = vadd.f32 %v3404_v25, %v3292_v12 }
 0x606   : > { %3482 = vst.msk [vmem:[%s6479_s8 + $0x48] sm:$0xff] %vm326_vm1, %v3405_v63 }
 0x60f   : > { %v3342_v36 = vpop.f32.mrf.mxu2 }
 0x610   : > { %v3343_v48 = vadd.f32 %v6471_v20, %v3342_v36 }
 0x612   : > { %v3456_v46 = vadd.f32 %v3455_v45, %v3343_v48 }
 0x614   : > { %3499 = vst.msk [vmem:[%s6479_s8 + $0xd0] sm:$0xff] %vm326_vm1, %v3456_v46 }
 0x616   : > { %v3458_v41 = vpop.f32.mrf.mxu3 }
 0x61a   : > { %v3294_v33 = vpop.f32.mrf.mxu0 }
 0x61b   : > { %v3295_v42 = vadd.f32 %v6471_v20, %v3294_v33 }
 0x61d   : > { %v3408_v17 = vadd.f32 %v3407_v16, %v3295_v42 }
 0x61f   : > { %3483 = vst.msk [vmem:[%s6479_s8 + $0x50] sm:$0xff] %vm326_vm1, %v3408_v17  ;;  %v3345_v31 = vpop.f32.mrf.mxu2 }
 0x620   : > { %v3346_v14 = vadd.f32 %v6471_v20, %v3345_v31  ;;  %v3416_v38 = vpop.f32.mrf.mxu1 }
 0x622   : > { %v3459_v30 = vadd.f32 %v3458_v41, %v3346_v14 }
 0x624   : > { %3500 = vst.msk [vmem:[%s6479_s8 + $0xd8] sm:$0xff] %vm326_vm1, %v3459_v30 }
 0x625   : > { %v3461_v29 = vpop.f32.mrf.mxu3 }
 0x627   : > { %v3297_v26 = vpop.f32.mrf.mxu0 }
 0x628   : > { %v3298_v52 = vadd.f32 %v6471_v20, %v3297_v26 }
 0x62a   : > { %v3411_v5 = vadd.f32 %v3410_v11, %v3298_v52 }
 0x62c   : > { %3484 = vst.msk [vmem:[%s6479_s8 + $0x58] sm:$0xff] %vm326_vm1, %v3411_v5 }
 0x62d   : > { %v3464_v59 = vpop.f32.mrf.mxu3 }
 0x62f   : > { %v3419_v62 = vpop.f32.mrf.mxu1 }
 0x636   : > { %v3348_v60 = vpop.f32.mrf.mxu2 }
 0x637   : > { %v3349_v6 = vadd.f32 %v6471_v20, %v3348_v60  ;;  %v3422_v7 = vpop.f32.mrf.mxu1 }
 0x638   : > { %v3423_v54 = vadd.f32 %v3422_v7, %v3310_v53 }
 0x639   : > { %v3462_v50 = vadd.f32 %v3461_v29, %v3349_v6 }
 0x63a   : > { %3488 = vst.msk [vmem:[%s6479_s8 + $0x78] sm:$0xff] %vm326_vm1, %v3423_v54  ;;  %v3300_v55 = vpop.f32.mrf.mxu0 }
 0x63b   : > { %3501 = vst.msk [vmem:[%s6479_s8 + $0xe0] sm:$0xff] %vm326_vm1, %v3462_v50  ;;  %v3301_v13 = vadd.f32 %v6471_v20, %v3300_v55 }
 0x63d   : > { %v3414_v9 = vadd.f32 %v3413_v37, %v3301_v13 }
 0x63f   : > { %3485 = vst.msk [vmem:[%s6479_s8 + $0x60] sm:$0xff] %vm326_vm1, %v3414_v9 }
 0x647   : > { %v3351_v8 = vpop.f32.mrf.mxu2 }
 0x648   : > { %v3352_v49 = vadd.f32 %v6471_v20, %v3351_v8 }
 0x64a   : > { %v3465_v15 = vadd.f32 %v3464_v59, %v3352_v49 }
 0x64c   : > { %3502 = vst.msk [vmem:[%s6479_s8 + $0xe8] sm:$0xff] %vm326_vm1, %v3465_v15 }
 0x64f   : > { %v3467_v47 = vpop.f32.mrf.mxu3 }
 0x650   : > { %v3303_v35 = vpop.f32.mrf.mxu0 }
 0x651   : > { %v3304_v1 = vadd.f32 %v6471_v20, %v3303_v35 }
 0x653   : > { %v3417_v2 = vadd.f32 %v3416_v38, %v3304_v1 }
 0x655   : > { %3486 = vst.msk [vmem:[%s6479_s8 + $0x68] sm:$0xff] %vm326_vm1, %v3417_v2 }
 0x657   : > { %v3354_v57 = vpop.f32.mrf.mxu2 }
 0x658   : > { %v3355_v21 = vadd.f32 %v6471_v20, %v3354_v57 }
 0x659   : > { %v3425_v39 = vpop.f32.mrf.mxu1 }
 0x65a   : > { %v3468_v44 = vadd.f32 %v3467_v47, %v3355_v21  ;;  %v3426_v22 = vadd.f32 %v3425_v39, %v3313_v58 }
 0x65c   : > { %3503 = vst.msk [vmem:[%s6479_s8 + $0xf0] sm:$0xff] %vm326_vm1, %v3468_v44 }
 0x65d   : > { %3489 = vst.msk [vmem:[%s6479_s8 + $0x80] sm:$0xff] %vm326_vm1, %v3426_v22  ;;  %v3470_v61 = vpop.f32.mrf.mxu3 }
 0x65e   : > { %v3471_v40 = vadd.f32 %v3470_v61, %v3358_v4 }
 0x660   : > { %3504 = vst.msk [vmem:[%s6479_s8 + $0xf8] sm:$0xff] %vm326_vm1, %v3471_v40  ;;  %v3306_v51 = vpop.f32.mrf.mxu0 }
 0x661   : > { %v3307_v3 = vadd.f32 %v6471_v20, %v3306_v51  ;;  %v3428_v34 = vpop.f32.mrf.mxu1 }
 0x662   : > { %v3429_v43 = vadd.f32 %v3428_v34, %v3316_v27 }
 0x663   : > { %v3420_v56 = vadd.f32 %v3419_v62, %v3307_v3 }
 0x664   : > { %3490 = vst.msk [vmem:[%s6479_s8 + $0x88] sm:$0xff] %vm326_vm1, %v3429_v43 }
 0x665   : > { %3487 = vst.msk [vmem:[%s6479_s8 + $0x70] sm:$0xff] %vm326_vm1, %v3420_v56 }
 0x666 PF: > { %s14_s15 = sadd.s32 1, %s3681_s15  }
 0x667   : > { %p11_p4 = scmp.ge.s32.totalorder %s14_s15, 4  }
 0x669   :  { %13 = sbr.rel (!%p11_p4) target bundleno = 1 (0x1), region = 69 }

</bundles_post_ra>
